<compile_context>
chip_gen: v7x
topology: tpu7x:2x2x1
jax: 0.10.0
libtpu: 0.0.40
codegen_flags: <defaults>
</compile_context>

<pallas_src>
import functools

import jax
import jax.numpy as jnp
from jax import lax
from jax.experimental import pallas as pl
from jax.experimental.pallas import tpu as pltpu


def _leaky(v, slope):
    # 2 VPU ops (mul + max) instead of cmp+mul+select; valid for 0 < slope < 1.
    return jnp.maximum(v, v * slope)


def _mpnn_kernel(heads, hidden1, num_gcn_layers,
                 # inputs
                 x0_ref, a_ref, b_ref, deg_ref, dis_ref, rand_ref,
                 wgat_ref, attd_ref, atts_ref, bgat_ref,
                 wgcn_ref, bgcn_ref, w1_ref, b1_ref, w2t_ref, b2_ref,
                 # outputs
                 node_out_ref, stats_ref,
                 # scratch
                 gat_ref):
    f32 = jnp.float32
    bf16 = jnp.bfloat16
    h1 = hidden1
    HH = heads * h1

    x0 = x0_ref[...]          # [N, 1]
    A_bf = a_ref[...]         # [N, N] bf16 0/1 adjacency, no self loops
    B = b_ref[...]            # [N, G] one-hot batch assignment
    deg = deg_ref[...]        # [N, 1]
    dis = dis_ref[...]        # [N, 1]  deg^-1/2 (0 for isolated nodes)
    rnd = rand_ref[...]       # [N, 1]
    N = x0.shape[0]
    G = B.shape[1]

    def prop(v):              # A @ v with bf16 MXU operands, f32 accumulation
        return jnp.dot(A_bf, v.astype(bf16), preferred_element_type=f32)

    # receptive-field mask: data.x is strictly positive in this model, so
    # get_mask(x, edge_index, 1) == (deg > 0); saves one [N,N] MXU pass.
    mask = (deg > 0).astype(f32)                                           # [N,1]

    # GraphSizeNorm factor: 1/sqrt(#nodes in own graph), gathered per node
    counts = jnp.sum(B, axis=0, keepdims=True)                             # [1,G]
    inv_sqrt_n = jnp.sum(B * lax.rsqrt(counts), axis=1, keepdims=True)     # [N,1]

    # GAT additive softmax bias: 0 on edges + diagonal, -1e30 elsewhere.
    # (diagonal stays unmasked -> softmax denominator >= 1, sentinel is safe)
    row_ids = lax.broadcasted_iota(jnp.int32, (N, N), 0)
    col_ids = lax.broadcasted_iota(jnp.int32, (N, N), 1)
    eye_f = (row_ids == col_ids).astype(f32)
    neg_bias = (A_bf.astype(f32) + eye_f - 1.0) * 1e30                     # [N,N]

    # theta for all heads at once: in_channels == 1 so x0 @ W == x0 * W (VPU)
    th_all = x0 * wgat_ref[...]                                            # [N,HH]
    ones_col = jnp.ones((N, 1), f32)

    # ---------------- GAT layer (dense masked attention) ---------------------
    # Softmax row-sum fused into the value matmul via a ones column; each
    # head's normalized output is stored into the gat_ref scratch slab so the
    # per-head [N,N] temporaries retire at the store.
    for h in range(heads):
        sl = slice(h * h1, (h + 1) * h1)
        th = th_all[:, sl]                                                 # [N,h1]
        s_i = jnp.sum(th * attd_ref[:, sl], axis=1, keepdims=True)         # [N,1]
        s_j_row = lax.dot_general(atts_ref[:, sl].astype(bf16), th.astype(bf16),
                                  (((1,), (1,)), ((), ())),
                                  preferred_element_type=f32)              # [1,N]
        masked = _leaky(s_i + s_j_row, 0.2) + neg_bias                     # [N,N]
        m = jnp.max(masked, axis=1, keepdims=True)
        e = jnp.exp(masked - m)           # non-neighbors underflow to exact 0
        thp = jnp.concatenate([th, ones_col], axis=1).astype(bf16)         # [N,h1+1]
        acc = jnp.dot(e.astype(bf16), thp, preferred_element_type=f32)     # [N,h1+1]
        inv_l = pl.reciprocal(acc[:, h1:h1 + 1], approx=True)              # [N,1]
        gat_ref[:, sl] = acc[:, :h1] * inv_l

    gat = gat_ref[...] + bgat_ref[...]                                     # [N,HH]

    x = _leaky(gat, 0.01) + x0            # residual (broadcast [N,1])
    x = x * inv_sqrt_n                    # GraphSizeNorm
    mu = jnp.mean(x, axis=0, keepdims=True)                                # BN (train)
    var = jnp.mean((x - mu) ** 2, axis=0, keepdims=True)
    x = (x - mu) * lax.rsqrt(var + 1e-5)
    x = x * mask                          # torch GAT block: gnorm -> bn -> mask

    # ---------------- GCN layers:  D^-1/2 A D^-1/2 h == dis*(A@(dis*h)) ------
    for l in range(num_gcn_layers):
        W = wgcn_ref[l]                                                    # bf16 [HH,HH]
        bb = bgcn_ref[l]                                                   # [1,HH]
        h_lin = jnp.dot(x.astype(bf16), W, preferred_element_type=f32)     # [N,HH]
        # width-1 mask propagation batched into the aggregation matmul
        agg = prop(jnp.concatenate([dis * h_lin, mask], axis=1))           # [N,HH+1]
        h_agg = dis * agg[:, :HH] + bb
        x = x + _leaky(h_agg, 0.01)
        mask = (agg[:, HH:HH + 1] > 0).astype(f32)
        x = x * mask                      # torch GCN block: mask -> gnorm -> bn
        x = x * inv_sqrt_n
        mu = jnp.mean(x, axis=0, keepdims=True)
        var = jnp.mean((x - mu) ** 2, axis=0, keepdims=True)
        x = (x - mu) * lax.rsqrt(var + 1e-5)

    # ---------------- MLP head -----------------------------------------------
    x = _leaky(jnp.dot(x.astype(bf16), w1_ref[...],
                       preferred_element_type=f32) + b1_ref[...], 0.01)
    x = x * mask
    # lin2 output width is 1 -> VPU multiply + lane reduction, not MXU
    x = _leaky(jnp.sum(x * w2t_ref[...], axis=1, keepdims=True) + b2_ref[...], 0.01)
    x = x * mask                                                           # [N,1]

    # per-graph min/max normalization (scatter_max/scatter_min + index_select)
    big = 1e30
    gmax = jnp.max(jnp.where(B > 0, x, -big), axis=0, keepdims=True)       # [1,G]
    gmin = jnp.min(jnp.where(B > 0, x, big), axis=0, keepdims=True)        # [1,G]
    bmax = jnp.sum(B * gmax, axis=1, keepdims=True)                        # [N,1]
    bmin = jnp.sum(B * gmin, axis=1, keepdims=True)                        # [N,1]
    x = (x - bmin) * pl.reciprocal(bmax + 1e-6 - bmin, approx=True)
    probs = x * mask + mask * 1e-6
    x2 = ((probs - rnd) > 0).astype(f32)

    # batched A @ [probs, x2]: one MXU pass instead of two width-1 matvecs
    apv = prop(jnp.concatenate([probs, x2], axis=1))                       # [N,2]
    a_p = apv[:, 0:1]
    a_x2 = apv[:, 1:2]

    ones = jnp.ones_like(probs)
    C = jnp.concatenate([
        probs * deg,     # 0  vol_1 (pre-eps)
        probs,           # 1  card_1
        mask,            # 2  rec_field / reccard_hard (pre-eps)
        x2,              # 3  set_size
        deg * x2,        # 4  vol_hard (pre-eps)
        deg,             # 5  totalvol (pre-eps)
        ones,            # 6  totalcard (pre-eps)
        deg * mask,      # 7  recvol_hard (pre-eps)
        probs * probs,   # 8  2 * self_sums
        probs * a_p,     # 9  2 * expected_weight_G
        x2 * a_x2,       # 10 2 * set_weight (pre-eps)
        jnp.zeros((N, 5), f32),                                            # pad
    ], axis=1)                                                             # [N,16]
    # per-graph scatter_adds: exact-f32 masked sublane reductions (G is small,
    # and this pins the stats numerics without MXU precision games)
    rows = [jnp.sum(C * B[:, g:g + 1], axis=0, keepdims=True) for g in range(G)]
    stats_ref[...] = jnp.concatenate(rows, axis=0)                         # [G,16]

    # lane-dense node outputs: [8, N] with N on the lane axis.
    # node_cat.T realized as a tiny eye8 NT-matmul (MXU), avoids XLU transpose.
    node_cat = jnp.concatenate(
        [probs, x2, mask, jnp.zeros((N, 5), f32)], axis=1)                 # [N,8]
    r8 = lax.broadcasted_iota(jnp.int32, (8, 8), 0)
    c8 = lax.broadcasted_iota(jnp.int32, (8, 8), 1)
    eye8 = (r8 == c8).astype(f32)
    node_out_ref[...] = lax.dot_general(
        eye8, node_cat, (((1,), (1,)), ((), ())),
        preferred_element_type=f32)                                        # [8,N]


def _vmem_limit_bytes(estimate):
    """~0.85 x physical VMEM (hardware-derived), floored at 4 MiB."""
    cap = None
    try:
        cap = getattr(pltpu.get_tpu_info(), "vmem_capacity_bytes", None)
    except Exception:
        cap = None
    if not cap:
        cap = 128 << 20
    return int(max(4 << 20, min(int(estimate), int(0.85 * cap))))


def forward(x0, A, B, rand, params, heads, hidden1, num_layers, penalty_coeff=0.25):
    N = x0.shape[0]
    G = B.shape[1]
    L1 = num_layers - 1
    HH = heads * hidden1
    f32 = jnp.float32
    bf16 = jnp.bfloat16
    eps = 1e-6

    eye = jnp.eye(N, dtype=f32)
    A_nl = A * (1.0 - eye)                       # remove_self_loops
    deg = jnp.sum(A_nl, axis=1, keepdims=True)   # degree(row) on symmetric edges
    dis = jnp.where(deg > 0, deg ** -0.5, 0.0)   # deg^-1/2 with inf -> 0
    A_bf = A_nl.astype(bf16)                     # 0/1 adjacency: exact in bf16

    kernel = functools.partial(_mpnn_kernel, heads, hidden1, L1)
    inputs = (x0, A_bf, B, deg, dis, rand,
              params['wgat'], params['att_d'], params['att_s'], params['bgat'],
              params['wgcn'].astype(bf16), params['bgcn'],
              params['w1'].astype(bf16), params['b1'],
              params['w2'].T, params['b2'])

    out_shape = (
        jax.ShapeDtypeStruct((8, N), f32),    # rows 0..2: probs, x2, mask
        jax.ShapeDtypeStruct((G, 16), f32),   # fused per-graph stats
    )

    # VMEM budget: resident inputs + bias + attention transients + node tensors.
    est = (2 * N * N                            # adjacency (bf16)
           + 4 * N * N                          # additive softmax bias (f32)
           + 10 * N * N                         # per-head logits/exp (+bf16 copies)
           + 18 * N * max(HH + 1, 16) * 4       # node features + scratch slab
           + N * G * 4
           + L1 * HH * HH * 2 + (L1 + 8) * HH * 4
           + HH * hidden1 * 2 + 4 * hidden1 * 4
           + (4 << 20))                         # headroom
    vmem_bytes = _vmem_limit_bytes(est)

    vmem = lambda: pl.BlockSpec(memory_space=pltpu.MemorySpace.VMEM)
    node_out, stats = pl.pallas_call(
        kernel,
        out_shape=out_shape,
        in_specs=[vmem() for _ in inputs],
        out_specs=tuple(vmem() for _ in range(2)),
        scratch_shapes=[pltpu.VMEM((N, HH), jnp.float32)],   # GAT head slab
        compiler_params=pltpu.CompilerParams(vmem_limit_bytes=vmem_bytes),
    )(*inputs)

    probs = node_out[0][:, None]                 # [N,1]
    x2 = node_out[1][:, None]                    # [N,1]
    mask = node_out[2][:, None]                  # [N,1]

    # ---------- glue: assemble the same retdict as the torch module ----------
    col = lambda k: stats[:, k:k + 1]            # [G,1]
    vol_1 = col(0) + eps
    card_1 = col(1)
    rec_field = col(2) + eps
    set_size = col(3)
    vol_hard = col(4) + eps
    totalvol = col(5) + eps
    totalcard = col(6) + eps
    recvol_hard = col(7) + eps
    reccard_hard = col(2) + eps
    self_sums = col(8) / 2.0
    expected_weight_G = col(9) / 2.0
    set_weight = col(10) / 2.0 + eps

    pairwise_prodsums = (card_1 ** 2) / 2.0      # == conv1d pairwise-product trick
    expected_clique_weight = pairwise_prodsums - self_sums
    expected_distance = expected_clique_weight - expected_weight_G
    expected_loss = penalty_coeff * expected_distance - 0.5 * expected_weight_G
    clique_edges_hard = set_size * (set_size - 1.0) / 2.0 + eps
    clique_dist_hard = set_weight / clique_edges_hard
    rec_field_ratio = set_size / rec_field
    rec_field_volratio = vol_hard / recvol_hard
    total_vol_ratio = vol_hard / totalvol
    loss = expected_loss
    current_edge_percentage = jnp.asarray(1.0, f32)   # edge_dropout is None

    retdict = {}
    retdict['output'] = [probs.squeeze(-1), 'hist']
    retdict['clique_check'] = [clique_edges_hard, 'hist']
    retdict['set_weight_check'] = [set_weight, 'hist']
    retdict['Expected_volume'] = [vol_1.mean(), 'sequence']
    retdict['Expected_cardinality'] = [card_1.mean(), 'sequence']
    retdict['Expected_cardinality_hist'] = [card_1, 'hist']
    retdict['losses histogram'] = [loss.squeeze(-1), 'hist']
    retdict['Set sizes'] = [set_size.squeeze(-1), 'hist']
    retdict['volume_hard'] = [vol_hard.mean(), 'aux']
    retdict['cardinality_hard'] = [set_size[0], 'sequence']
    retdict['Expected weight(G)'] = [expected_weight_G.mean(), 'sequence']
    retdict['Expected maximum weight'] = [expected_clique_weight.mean(), 'sequence']
    retdict['Expected distance'] = [expected_distance.mean(), 'sequence']
    retdict['Currvol/Cliquevol'] = [clique_dist_hard.mean(), 'sequence']
    retdict['Currvol/Cliquevol all graphs in batch'] = [clique_dist_hard.squeeze(-1), 'hist']
    retdict['Average ratio of total volume'] = [total_vol_ratio.mean(), 'sequence']
    retdict['Current edge percentage'] = [current_edge_percentage, 'sequence']
    retdict['loss'] = [loss.mean(), 'sequence']

    aux = dict(recvol_hard=recvol_hard, totalvol=totalvol,
               clique_dist_hard=clique_dist_hard, x2=x2, mask=mask,
               rec_field_ratio=rec_field_ratio, rec_field_volratio=rec_field_volratio,
               totalcard=totalcard, reccard_hard=reccard_hard)
    return retdict, aux


def build_graph(key, nodes_per_graph, num_graphs, p=0.4):
    n = nodes_per_graph
    N = n * num_graphs
    A = jnp.zeros((N, N), jnp.float32)
    keys = jax.random.split(key, num_graphs)
    for g in range(num_graphs):
        u = jax.random.uniform(keys[g], (n, n))
        upper = jnp.triu((u < p).astype(jnp.float32), k=1)
        Ag = upper + upper.T                       # symmetric, zero diag
        A = A.at[g * n:(g + 1) * n, g * n:(g + 1) * n].set(Ag)
    batch = jnp.repeat(jnp.arange(num_graphs), n)
    B = jax.nn.one_hot(batch, num_graphs, dtype=jnp.float32)
    return A, B


def init_params(key, heads, hidden1, num_layers):
    HH = heads * hidden1
    L1 = num_layers - 1
    ks = jax.random.split(key, 8)

    def glorot(k, shape, fan_in, fan_out):
        lim = jnp.sqrt(6.0 / (fan_in + fan_out))
        return jax.random.uniform(k, shape, jnp.float32, -lim, lim)

    p = {}
    p['wgat'] = glorot(ks[0], (1, HH), 1, HH)                     # GAT Theta
    att = glorot(ks[1], (heads, 2 * hidden1), 1, 2 * hidden1)     # GAT attention a
    p['att_d'] = att[:, :hidden1].reshape(1, HH)                  # x_i half
    p['att_s'] = att[:, hidden1:].reshape(1, HH)                  # x_j half
    p['bgat'] = jnp.zeros((1, HH), jnp.float32)                   # zeros() init
    p['wgcn'] = glorot(ks[2], (L1, HH, HH), HH, HH)
    p['bgcn'] = jnp.zeros((L1, 1, HH), jnp.float32)               # zeros() init
    p['w1'] = glorot(ks[3], (HH, hidden1), HH, hidden1)
    p['b1'] = glorot(ks[4], (1, hidden1), HH, hidden1)
    p['w2'] = glorot(ks[5], (hidden1, 1), hidden1, 1)
    p['b2'] = glorot(ks[6], (1, 1), hidden1, 1)
    return p


if __name__ == "__main__":
    heads, hidden1, num_layers = 4, 32, 3           # hidden2/deltas unused in forward
    nodes_per_graph, num_graphs = 16, 2

    key = jax.random.PRNGKey(0)
    k_graph, k_x, k_rand, k_param = jax.random.split(key, 4)

    A, B = build_graph(k_graph, nodes_per_graph, num_graphs)
    N = A.shape[0]
    x0 = jax.random.uniform(k_x, (N, 1), jnp.float32, 0.1, 1.0)   # data.x (positive feats)
    rand = jax.random.uniform(k_rand, (N, 1), jnp.float32)        # torch.rand_like(x)
    params = init_params(k_param, heads, hidden1, num_layers)

    retdict, aux = forward(x0, A, B, rand, params, heads, hidden1, num_layers)

    jax.block_until_ready(retdict['loss'][0])
    jax.block_until_ready(retdict['output'][0])

    # mirror the torch module's sanity asserts
    assert float(aux['recvol_hard'].mean() / aux['totalvol'].mean()) <= 1.0, \
        'Something went wrong! Receptive field is larger than total volume.'
    assert float((aux['clique_dist_hard'] >= 1.1).sum()) <= 1e-06, \
        'Invalid set vol/clique vol ratio.'

    print("KERNEL_OK")
</pallas_src>

<mosaic_0001>
module attributes {stable_mosaic.version = 11 : i64} {
  func.func @_mpnn_kernel(%arg0: memref<32x1xf32, #tpu.memory_space<vmem>>, %arg1: memref<32x32xbf16, #tpu.memory_space<vmem>>, %arg2: memref<32x2xf32, #tpu.memory_space<vmem>>, %arg3: memref<32x1xf32, #tpu.memory_space<vmem>>, %arg4: memref<32x1xf32, #tpu.memory_space<vmem>>, %arg5: memref<32x1xf32, #tpu.memory_space<vmem>>, %arg6: memref<1x128xf32, #tpu.memory_space<vmem>>, %arg7: memref<1x128xf32, #tpu.memory_space<vmem>>, %arg8: memref<1x128xf32, #tpu.memory_space<vmem>>, %arg9: memref<1x128xf32, #tpu.memory_space<vmem>>, %arg10: memref<2x128x128xbf16, #tpu.memory_space<vmem>>, %arg11: memref<2x1x128xf32, #tpu.memory_space<vmem>>, %arg12: memref<128x32xbf16, #tpu.memory_space<vmem>>, %arg13: memref<1x32xf32, #tpu.memory_space<vmem>>, %arg14: memref<1x32xf32, #tpu.memory_space<vmem>>, %arg15: memref<1x1xf32, #tpu.memory_space<vmem>>, %arg16: memref<8x32xf32, #tpu.memory_space<vmem>>, %arg17: memref<2x16xf32, #tpu.memory_space<vmem>>, %arg18: memref<32x128xf32, #tpu.memory_space<vmem>>) attributes {dimension_semantics = [], scalar_prefetch = 0 : i64, scratch_operands = 1 : i64, tpu.core_type = #tpu.core_type<tc>} {
    %c0 = arith.constant 0 : index
    %c0_0 = arith.constant 0 : index
    %0 = vector.load %arg0[%c0, %c0_0] : memref<32x1xf32, #tpu.memory_space<vmem>>, vector<32x1xf32>
    %c0_1 = arith.constant 0 : index
    %c0_2 = arith.constant 0 : index
    %1 = vector.load %arg1[%c0_1, %c0_2] : memref<32x32xbf16, #tpu.memory_space<vmem>>, vector<32x32xbf16>
    %c0_3 = arith.constant 0 : index
    %c0_4 = arith.constant 0 : index
    %2 = vector.load %arg2[%c0_3, %c0_4] : memref<32x2xf32, #tpu.memory_space<vmem>>, vector<32x2xf32>
    %c0_5 = arith.constant 0 : index
    %c0_6 = arith.constant 0 : index
    %3 = vector.load %arg3[%c0_5, %c0_6] : memref<32x1xf32, #tpu.memory_space<vmem>>, vector<32x1xf32>
    %c0_7 = arith.constant 0 : index
    %c0_8 = arith.constant 0 : index
    %4 = vector.load %arg4[%c0_7, %c0_8] : memref<32x1xf32, #tpu.memory_space<vmem>>, vector<32x1xf32>
    %c0_9 = arith.constant 0 : index
    %c0_10 = arith.constant 0 : index
    %5 = vector.load %arg5[%c0_9, %c0_10] : memref<32x1xf32, #tpu.memory_space<vmem>>, vector<32x1xf32>
    %cst = arith.constant 0.000000e+00 : f32
    %6 = vector.broadcast %cst : f32 to vector<32x1xf32>
    %7 = arith.cmpf ogt, %3, %6 : vector<32x1xf32>
    %8 = arith.extui %7 : vector<32x1xi1> to vector<32x1xi32>
    %9 = arith.sitofp %8 : vector<32x1xi32> to vector<32x1xf32>
    %cst_11 = arith.constant dense<0.000000e+00> : vector<2xf32>
    %10 = vector.multi_reduction <add>, %2, %cst_11 [0] : vector<32x2xf32> to vector<2xf32>
    %11 = vector.shape_cast %10 : vector<2xf32> to vector<1x2xf32>
    %12 = math.rsqrt %11 : vector<1x2xf32>
    %13 = vector.broadcast %12 : vector<1x2xf32> to vector<32x2xf32>
    %14 = arith.mulf %2, %13 : vector<32x2xf32>
    %cst_12 = arith.constant dense<0.000000e+00> : vector<32xf32>
    %15 = vector.multi_reduction <add>, %14, %cst_12 [1] : vector<32x2xf32> to vector<32xf32>
    %16 = vector.shape_cast %15 : vector<32xf32> to vector<32x1xf32>
    %17 = tpu.iota {dimensions = array<i32: 0>} : vector<32x32xi32>
    %18 = tpu.iota {dimensions = array<i32: 1>} : vector<32x32xi32>
    %19 = arith.cmpi eq, %17, %18 : vector<32x32xi32>
    %20 = arith.extui %19 : vector<32x32xi1> to vector<32x32xi32>
    %21 = arith.sitofp %20 : vector<32x32xi32> to vector<32x32xf32>
    %22 = arith.extf %1 : vector<32x32xbf16> to vector<32x32xf32>
    %23 = arith.addf %22, %21 : vector<32x32xf32>
    %cst_13 = arith.constant 1.000000e+00 : f32
    %24 = vector.broadcast %cst_13 : f32 to vector<32x32xf32>
    %25 = arith.subf %23, %24 : vector<32x32xf32>
    %cst_14 = arith.constant 1.000000e+30 : f32
    %26 = vector.broadcast %cst_14 : f32 to vector<32x32xf32>
    %27 = arith.mulf %25, %26 : vector<32x32xf32>
    %c0_15 = arith.constant 0 : index
    %c0_16 = arith.constant 0 : index
    %28 = vector.load %arg6[%c0_15, %c0_16] : memref<1x128xf32, #tpu.memory_space<vmem>>, vector<1x128xf32>
    %29 = vector.broadcast %0 : vector<32x1xf32> to vector<32x128xf32>
    %30 = vector.broadcast %28 : vector<1x128xf32> to vector<32x128xf32>
    %31 = arith.mulf %29, %30 : vector<32x128xf32>
    %cst_17 = arith.constant 1.000000e+00 : f32
    %32 = vector.broadcast %cst_17 : f32 to vector<32x1xf32>
    %33 = vector.extract_strided_slice %31 {offsets = [0, 0], sizes = [32, 32], strides = [1, 1]} : vector<32x128xf32> to vector<32x32xf32>
    %c0_18 = arith.constant 0 : index
    %c0_19 = arith.constant 0 : index
    %34 = vector.load %arg7[%c0_18, %c0_19] : memref<1x128xf32, #tpu.memory_space<vmem>>, vector<1x32xf32>
    %35 = vector.broadcast %34 : vector<1x32xf32> to vector<32x32xf32>
    %36 = arith.mulf %33, %35 : vector<32x32xf32>
    %cst_20 = arith.constant dense<0.000000e+00> : vector<32xf32>
    %37 = vector.multi_reduction <add>, %36, %cst_20 [1] : vector<32x32xf32> to vector<32xf32>
    %38 = vector.shape_cast %37 : vector<32xf32> to vector<32x1xf32>
    %c0_21 = arith.constant 0 : index
    %c0_22 = arith.constant 0 : index
    %39 = vector.load %arg8[%c0_21, %c0_22] : memref<1x128xf32, #tpu.memory_space<vmem>>, vector<1x32xf32>
    %40 = arith.truncf %39 : vector<1x32xf32> to vector<1x32xbf16>
    %41 = arith.truncf %33 : vector<32x32xf32> to vector<32x32xbf16>
    %cst_23 = arith.constant dense<0.000000e+00> : vector<1x32xf32>
    %42 = tpu.matmul %40, %41, %cst_23 {dimension_numbers = #tpu.dot_dimension_numbers<[1], [1], [0], [0], [0, 0, 1, 0], [], []>} : vector<1x32xbf16>, vector<32x32xbf16>, vector<1x32xf32> -> vector<1x32xf32>
    %43 = vector.broadcast %38 : vector<32x1xf32> to vector<32x32xf32>
    %44 = vector.broadcast %42 : vector<1x32xf32> to vector<32x32xf32>
    %45 = arith.addf %43, %44 : vector<32x32xf32>
    %cst_24 = arith.constant 2.000000e-01 : f32
    %46 = vector.broadcast %cst_24 : f32 to vector<32x32xf32>
    %47 = arith.mulf %45, %46 : vector<32x32xf32>
    %48 = arith.maximumf %45, %47 : vector<32x32xf32>
    %49 = arith.addf %48, %27 : vector<32x32xf32>
    %cst_25 = arith.constant dense<0xFF800000> : vector<32xf32>
    %50 = vector.multi_reduction <maximumf>, %49, %cst_25 [1] : vector<32x32xf32> to vector<32xf32>
    %51 = vector.shape_cast %50 : vector<32xf32> to vector<32x1xf32>
    %52 = vector.broadcast %51 : vector<32x1xf32> to vector<32x32xf32>
    %53 = arith.subf %49, %52 : vector<32x32xf32>
    %54 = math.exp %53 : vector<32x32xf32>
    %55 = tpu.concatenate %33, %32 in 1 : vector<32x32xf32>, vector<32x1xf32> -> vector<32x33xf32>
    %56 = arith.truncf %55 : vector<32x33xf32> to vector<32x33xbf16>
    %57 = arith.truncf %54 : vector<32x32xf32> to vector<32x32xbf16>
    %cst_26 = arith.constant dense<0.000000e+00> : vector<32x33xf32>
    %58 = tpu.matmul %57, %56, %cst_26 {dimension_numbers = #tpu.dot_dimension_numbers<[1], [0], [0], [1], [0, 0, 1, 1], [], []>} : vector<32x32xbf16>, vector<32x33xbf16>, vector<32x33xf32> -> vector<32x33xf32>
    %59 = vector.extract_strided_slice %58 {offsets = [0, 32], sizes = [32, 1], strides = [1, 1]} : vector<32x33xf32> to vector<32x1xf32>
    %60 = tpu.reciprocal %59 {approx = true} : vector<32x1xf32> -> vector<32x1xf32>
    %61 = vector.extract_strided_slice %58 {offsets = [0, 0], sizes = [32, 32], strides = [1, 1]} : vector<32x33xf32> to vector<32x32xf32>
    %62 = vector.broadcast %60 : vector<32x1xf32> to vector<32x32xf32>
    %63 = arith.mulf %61, %62 : vector<32x32xf32>
    %c0_27 = arith.constant 0 : index
    %c0_28 = arith.constant 0 : index
    %64 = vector.load %arg18[%c0_27, %c0_28] : memref<32x128xf32, #tpu.memory_space<vmem>>, vector<32x32xf32>
    tpu.vector_store %arg18[%c0_27, %c0_28], %63 {strides = array<i32>} : memref<32x128xf32, #tpu.memory_space<vmem>>, vector<32x32xf32>,
    %65 = vector.extract_strided_slice %31 {offsets = [0, 32], sizes = [32, 32], strides = [1, 1]} : vector<32x128xf32> to vector<32x32xf32>
    %c0_29 = arith.constant 0 : index
    %c32 = arith.constant 32 : index
    %66 = vector.load %arg7[%c0_29, %c32] : memref<1x128xf32, #tpu.memory_space<vmem>>, vector<1x32xf32>
    %67 = vector.broadcast %66 : vector<1x32xf32> to vector<32x32xf32>
    %68 = arith.mulf %65, %67 : vector<32x32xf32>
    %cst_30 = arith.constant dense<0.000000e+00> : vector<32xf32>
    %69 = vector.multi_reduction <add>, %68, %cst_30 [1] : vector<32x32xf32> to vector<32xf32>
    %70 = vector.shape_cast %69 : vector<32xf32> to vector<32x1xf32>
    %c0_31 = arith.constant 0 : index
    %c32_32 = arith.constant 32 : index
    %71 = vector.load %arg8[%c0_31, %c32_32] : memref<1x128xf32, #tpu.memory_space<vmem>>, vector<1x32xf32>
    %72 = arith.truncf %71 : vector<1x32xf32> to vector<1x32xbf16>
    %73 = arith.truncf %65 : vector<32x32xf32> to vector<32x32xbf16>
    %cst_33 = arith.constant dense<0.000000e+00> : vector<1x32xf32>
    %74 = tpu.matmul %72, %73, %cst_33 {dimension_numbers = #tpu.dot_dimension_numbers<[1], [1], [0], [0], [0, 0, 1, 0], [], []>} : vector<1x32xbf16>, vector<32x32xbf16>, vector<1x32xf32> -> vector<1x32xf32>
    %75 = vector.broadcast %70 : vector<32x1xf32> to vector<32x32xf32>
    %76 = vector.broadcast %74 : vector<1x32xf32> to vector<32x32xf32>
    %77 = arith.addf %75, %76 : vector<32x32xf32>
    %cst_34 = arith.constant 2.000000e-01 : f32
    %78 = vector.broadcast %cst_34 : f32 to vector<32x32xf32>
    %79 = arith.mulf %77, %78 : vector<32x32xf32>
    %80 = arith.maximumf %77, %79 : vector<32x32xf32>
    %81 = arith.addf %80, %27 : vector<32x32xf32>
    %cst_35 = arith.constant dense<0xFF800000> : vector<32xf32>
    %82 = vector.multi_reduction <maximumf>, %81, %cst_35 [1] : vector<32x32xf32> to vector<32xf32>
    %83 = vector.shape_cast %82 : vector<32xf32> to vector<32x1xf32>
    %84 = vector.broadcast %83 : vector<32x1xf32> to vector<32x32xf32>
    %85 = arith.subf %81, %84 : vector<32x32xf32>
    %86 = math.exp %85 : vector<32x32xf32>
    %87 = tpu.concatenate %65, %32 in 1 : vector<32x32xf32>, vector<32x1xf32> -> vector<32x33xf32>
    %88 = arith.truncf %87 : vector<32x33xf32> to vector<32x33xbf16>
    %89 = arith.truncf %86 : vector<32x32xf32> to vector<32x32xbf16>
    %cst_36 = arith.constant dense<0.000000e+00> : vector<32x33xf32>
    %90 = tpu.matmul %89, %88, %cst_36 {dimension_numbers = #tpu.dot_dimension_numbers<[1], [0], [0], [1], [0, 0, 1, 1], [], []>} : vector<32x32xbf16>, vector<32x33xbf16>, vector<32x33xf32> -> vector<32x33xf32>
    %91 = vector.extract_strided_slice %90 {offsets = [0, 32], sizes = [32, 1], strides = [1, 1]} : vector<32x33xf32> to vector<32x1xf32>
    %92 = tpu.reciprocal %91 {approx = true} : vector<32x1xf32> -> vector<32x1xf32>
    %93 = vector.extract_strided_slice %90 {offsets = [0, 0], sizes = [32, 32], strides = [1, 1]} : vector<32x33xf32> to vector<32x32xf32>
    %94 = vector.broadcast %92 : vector<32x1xf32> to vector<32x32xf32>
    %95 = arith.mulf %93, %94 : vector<32x32xf32>
    %c0_37 = arith.constant 0 : index
    %c32_38 = arith.constant 32 : index
    %96 = vector.load %arg18[%c0_37, %c32_38] : memref<32x128xf32, #tpu.memory_space<vmem>>, vector<32x32xf32>
    tpu.vector_store %arg18[%c0_37, %c32_38], %95 {strides = array<i32>} : memref<32x128xf32, #tpu.memory_space<vmem>>, vector<32x32xf32>,
    %97 = vector.extract_strided_slice %31 {offsets = [0, 64], sizes = [32, 32], strides = [1, 1]} : vector<32x128xf32> to vector<32x32xf32>
    %c0_39 = arith.constant 0 : index
    %c64 = arith.constant 64 : index
    %98 = vector.load %arg7[%c0_39, %c64] : memref<1x128xf32, #tpu.memory_space<vmem>>, vector<1x32xf32>
    %99 = vector.broadcast %98 : vector<1x32xf32> to vector<32x32xf32>
    %100 = arith.mulf %97, %99 : vector<32x32xf32>
    %cst_40 = arith.constant dense<0.000000e+00> : vector<32xf32>
    %101 = vector.multi_reduction <add>, %100, %cst_40 [1] : vector<32x32xf32> to vector<32xf32>
    %102 = vector.shape_cast %101 : vector<32xf32> to vector<32x1xf32>
    %c0_41 = arith.constant 0 : index
    %c64_42 = arith.constant 64 : index
    %103 = vector.load %arg8[%c0_41, %c64_42] : memref<1x128xf32, #tpu.memory_space<vmem>>, vector<1x32xf32>
    %104 = arith.truncf %103 : vector<1x32xf32> to vector<1x32xbf16>
    %105 = arith.truncf %97 : vector<32x32xf32> to vector<32x32xbf16>
    %cst_43 = arith.constant dense<0.000000e+00> : vector<1x32xf32>
    %106 = tpu.matmul %104, %105, %cst_43 {dimension_numbers = #tpu.dot_dimension_numbers<[1], [1], [0], [0], [0, 0, 1, 0], [], []>} : vector<1x32xbf16>, vector<32x32xbf16>, vector<1x32xf32> -> vector<1x32xf32>
    %107 = vector.broadcast %102 : vector<32x1xf32> to vector<32x32xf32>
    %108 = vector.broadcast %106 : vector<1x32xf32> to vector<32x32xf32>
    %109 = arith.addf %107, %108 : vector<32x32xf32>
    %cst_44 = arith.constant 2.000000e-01 : f32
    %110 = vector.broadcast %cst_44 : f32 to vector<32x32xf32>
    %111 = arith.mulf %109, %110 : vector<32x32xf32>
    %112 = arith.maximumf %109, %111 : vector<32x32xf32>
    %113 = arith.addf %112, %27 : vector<32x32xf32>
    %cst_45 = arith.constant dense<0xFF800000> : vector<32xf32>
    %114 = vector.multi_reduction <maximumf>, %113, %cst_45 [1] : vector<32x32xf32> to vector<32xf32>
    %115 = vector.shape_cast %114 : vector<32xf32> to vector<32x1xf32>
    %116 = vector.broadcast %115 : vector<32x1xf32> to vector<32x32xf32>
    %117 = arith.subf %113, %116 : vector<32x32xf32>
    %118 = math.exp %117 : vector<32x32xf32>
    %119 = tpu.concatenate %97, %32 in 1 : vector<32x32xf32>, vector<32x1xf32> -> vector<32x33xf32>
    %120 = arith.truncf %119 : vector<32x33xf32> to vector<32x33xbf16>
    %121 = arith.truncf %118 : vector<32x32xf32> to vector<32x32xbf16>
    %cst_46 = arith.constant dense<0.000000e+00> : vector<32x33xf32>
    %122 = tpu.matmul %121, %120, %cst_46 {dimension_numbers = #tpu.dot_dimension_numbers<[1], [0], [0], [1], [0, 0, 1, 1], [], []>} : vector<32x32xbf16>, vector<32x33xbf16>, vector<32x33xf32> -> vector<32x33xf32>
    %123 = vector.extract_strided_slice %122 {offsets = [0, 32], sizes = [32, 1], strides = [1, 1]} : vector<32x33xf32> to vector<32x1xf32>
    %124 = tpu.reciprocal %123 {approx = true} : vector<32x1xf32> -> vector<32x1xf32>
    %125 = vector.extract_strided_slice %122 {offsets = [0, 0], sizes = [32, 32], strides = [1, 1]} : vector<32x33xf32> to vector<32x32xf32>
    %126 = vector.broadcast %124 : vector<32x1xf32> to vector<32x32xf32>
    %127 = arith.mulf %125, %126 : vector<32x32xf32>
    %c0_47 = arith.constant 0 : index
    %c64_48 = arith.constant 64 : index
    %128 = vector.load %arg18[%c0_47, %c64_48] : memref<32x128xf32, #tpu.memory_space<vmem>>, vector<32x32xf32>
    tpu.vector_store %arg18[%c0_47, %c64_48], %127 {strides = array<i32>} : memref<32x128xf32, #tpu.memory_space<vmem>>, vector<32x32xf32>,
    %129 = vector.extract_strided_slice %31 {offsets = [0, 96], sizes = [32, 32], strides = [1, 1]} : vector<32x128xf32> to vector<32x32xf32>
    %c0_49 = arith.constant 0 : index
    %c96 = arith.constant 96 : index
    %130 = vector.load %arg7[%c0_49, %c96] : memref<1x128xf32, #tpu.memory_space<vmem>>, vector<1x32xf32>
    %131 = vector.broadcast %130 : vector<1x32xf32> to vector<32x32xf32>
    %132 = arith.mulf %129, %131 : vector<32x32xf32>
    %cst_50 = arith.constant dense<0.000000e+00> : vector<32xf32>
    %133 = vector.multi_reduction <add>, %132, %cst_50 [1] : vector<32x32xf32> to vector<32xf32>
    %134 = vector.shape_cast %133 : vector<32xf32> to vector<32x1xf32>
    %c0_51 = arith.constant 0 : index
    %c96_52 = arith.constant 96 : index
    %135 = vector.load %arg8[%c0_51, %c96_52] : memref<1x128xf32, #tpu.memory_space<vmem>>, vector<1x32xf32>
    %136 = arith.truncf %135 : vector<1x32xf32> to vector<1x32xbf16>
    %137 = arith.truncf %129 : vector<32x32xf32> to vector<32x32xbf16>
    %cst_53 = arith.constant dense<0.000000e+00> : vector<1x32xf32>
    %138 = tpu.matmul %136, %137, %cst_53 {dimension_numbers = #tpu.dot_dimension_numbers<[1], [1], [0], [0], [0, 0, 1, 0], [], []>} : vector<1x32xbf16>, vector<32x32xbf16>, vector<1x32xf32> -> vector<1x32xf32>
    %139 = vector.broadcast %134 : vector<32x1xf32> to vector<32x32xf32>
    %140 = vector.broadcast %138 : vector<1x32xf32> to vector<32x32xf32>
    %141 = arith.addf %139, %140 : vector<32x32xf32>
    %cst_54 = arith.constant 2.000000e-01 : f32
    %142 = vector.broadcast %cst_54 : f32 to vector<32x32xf32>
    %143 = arith.mulf %141, %142 : vector<32x32xf32>
    %144 = arith.maximumf %141, %143 : vector<32x32xf32>
    %145 = arith.addf %144, %27 : vector<32x32xf32>
    %cst_55 = arith.constant dense<0xFF800000> : vector<32xf32>
    %146 = vector.multi_reduction <maximumf>, %145, %cst_55 [1] : vector<32x32xf32> to vector<32xf32>
    %147 = vector.shape_cast %146 : vector<32xf32> to vector<32x1xf32>
    %148 = vector.broadcast %147 : vector<32x1xf32> to vector<32x32xf32>
    %149 = arith.subf %145, %148 : vector<32x32xf32>
    %150 = math.exp %149 : vector<32x32xf32>
    %151 = tpu.concatenate %129, %32 in 1 : vector<32x32xf32>, vector<32x1xf32> -> vector<32x33xf32>
    %152 = arith.truncf %151 : vector<32x33xf32> to vector<32x33xbf16>
    %153 = arith.truncf %150 : vector<32x32xf32> to vector<32x32xbf16>
    %cst_56 = arith.constant dense<0.000000e+00> : vector<32x33xf32>
    %154 = tpu.matmul %153, %152, %cst_56 {dimension_numbers = #tpu.dot_dimension_numbers<[1], [0], [0], [1], [0, 0, 1, 1], [], []>} : vector<32x32xbf16>, vector<32x33xbf16>, vector<32x33xf32> -> vector<32x33xf32>
    %155 = vector.extract_strided_slice %154 {offsets = [0, 32], sizes = [32, 1], strides = [1, 1]} : vector<32x33xf32> to vector<32x1xf32>
    %156 = tpu.reciprocal %155 {approx = true} : vector<32x1xf32> -> vector<32x1xf32>
    %157 = vector.extract_strided_slice %154 {offsets = [0, 0], sizes = [32, 32], strides = [1, 1]} : vector<32x33xf32> to vector<32x32xf32>
    %158 = vector.broadcast %156 : vector<32x1xf32> to vector<32x32xf32>
    %159 = arith.mulf %157, %158 : vector<32x32xf32>
    %c0_57 = arith.constant 0 : index
    %c96_58 = arith.constant 96 : index
    %160 = vector.load %arg18[%c0_57, %c96_58] : memref<32x128xf32, #tpu.memory_space<vmem>>, vector<32x32xf32>
    tpu.vector_store %arg18[%c0_57, %c96_58], %159 {strides = array<i32>} : memref<32x128xf32, #tpu.memory_space<vmem>>, vector<32x32xf32>,
    %c0_59 = arith.constant 0 : index
    %c0_60 = arith.constant 0 : index
    %161 = vector.load %arg18[%c0_59, %c0_60] : memref<32x128xf32, #tpu.memory_space<vmem>>, vector<32x128xf32>
    %c0_61 = arith.constant 0 : index
    %c0_62 = arith.constant 0 : index
    %162 = vector.load %arg9[%c0_61, %c0_62] : memref<1x128xf32, #tpu.memory_space<vmem>>, vector<1x128xf32>
    %163 = vector.broadcast %162 : vector<1x128xf32> to vector<32x128xf32>
    %164 = arith.addf %161, %163 : vector<32x128xf32>
    %cst_63 = arith.constant 0.00999999977 : f32
    %165 = vector.broadcast %cst_63 : f32 to vector<32x128xf32>
    %166 = arith.mulf %164, %165 : vector<32x128xf32>
    %167 = arith.maximumf %164, %166 : vector<32x128xf32>
    %168 = vector.broadcast %0 : vector<32x1xf32> to vector<32x128xf32>
    %169 = arith.addf %167, %168 : vector<32x128xf32>
    %170 = vector.broadcast %16 : vector<32x1xf32> to vector<32x128xf32>
    %171 = arith.mulf %169, %170 : vector<32x128xf32>
    %cst_64 = arith.constant dense<0.000000e+00> : vector<128xf32>
    %172 = vector.multi_reduction <add>, %171, %cst_64 [0] : vector<32x128xf32> to vector<128xf32>
    %173 = vector.shape_cast %172 : vector<128xf32> to vector<1x128xf32>
    %cst_65 = arith.constant 3.200000e+01 : f32
    %174 = vector.broadcast %cst_65 : f32 to vector<1x128xf32>
    %175 = arith.divf %173, %174 : vector<1x128xf32>
    %176 = vector.broadcast %175 : vector<1x128xf32> to vector<32x128xf32>
    %177 = arith.subf %171, %176 : vector<32x128xf32>
    %178 = arith.mulf %177, %177 : vector<32x128xf32>
    %cst_66 = arith.constant dense<0.000000e+00> : vector<128xf32>
    %179 = vector.multi_reduction <add>, %178, %cst_66 [0] : vector<32x128xf32> to vector<128xf32>
    %180 = vector.shape_cast %179 : vector<128xf32> to vector<1x128xf32>
    %cst_67 = arith.constant 3.200000e+01 : f32
    %181 = vector.broadcast %cst_67 : f32 to vector<1x128xf32>
    %182 = arith.divf %180, %181 : vector<1x128xf32>
    %183 = vector.broadcast %175 : vector<1x128xf32> to vector<32x128xf32>
    %184 = arith.subf %171, %183 : vector<32x128xf32>
    %cst_68 = arith.constant 9.99999974E-6 : f32
    %185 = vector.broadcast %cst_68 : f32 to vector<1x128xf32>
    %186 = arith.addf %182, %185 : vector<1x128xf32>
    %187 = math.rsqrt %186 : vector<1x128xf32>
    %188 = vector.broadcast %187 : vector<1x128xf32> to vector<32x128xf32>
    %189 = arith.mulf %184, %188 : vector<32x128xf32>
    %190 = vector.broadcast %9 : vector<32x1xf32> to vector<32x128xf32>
    %191 = arith.mulf %189, %190 : vector<32x128xf32>
    %c0_69 = arith.constant 0 : index
    %c0_70 = arith.constant 0 : index
    %c0_71 = arith.constant 0 : index
    %192 = vector.load %arg10[%c0_69, %c0_70, %c0_71] : memref<2x128x128xbf16, #tpu.memory_space<vmem>>, vector<1x128x128xbf16>
    %193 = vector.shape_cast %192 : vector<1x128x128xbf16> to vector<128x128xbf16>
    %c0_72 = arith.constant 0 : index
    %c0_73 = arith.constant 0 : index
    %c0_74 = arith.constant 0 : index
    %194 = vector.load %arg11[%c0_72, %c0_73, %c0_74] : memref<2x1x128xf32, #tpu.memory_space<vmem>>, vector<1x1x128xf32>
    %195 = vector.shape_cast %194 : vector<1x1x128xf32> to vector<1x128xf32>
    %196 = arith.truncf %191 : vector<32x128xf32> to vector<32x128xbf16>
    %cst_75 = arith.constant dense<0.000000e+00> : vector<32x128xf32>
    %197 = tpu.matmul %196, %193, %cst_75 {dimension_numbers = #tpu.dot_dimension_numbers<[1], [0], [0], [1], [0, 0, 1, 1], [], []>} : vector<32x128xbf16>, vector<128x128xbf16>, vector<32x128xf32> -> vector<32x128xf32>
    %198 = vector.broadcast %4 : vector<32x1xf32> to vector<32x128xf32>
    %199 = arith.mulf %198, %197 : vector<32x128xf32>
    %200 = tpu.concatenate %199, %9 in 1 : vector<32x128xf32>, vector<32x1xf32> -> vector<32x129xf32>
    %201 = arith.truncf %200 : vector<32x129xf32> to vector<32x129xbf16>
    %cst_76 = arith.constant dense<0.000000e+00> : vector<32x129xf32>
    %202 = tpu.matmul %1, %201, %cst_76 {dimension_numbers = #tpu.dot_dimension_numbers<[1], [0], [0], [1], [0, 0, 1, 1], [], []>} : vector<32x32xbf16>, vector<32x129xbf16>, vector<32x129xf32> -> vector<32x129xf32>
    %203 = vector.extract_strided_slice %202 {offsets = [0, 0], sizes = [32, 128], strides = [1, 1]} : vector<32x129xf32> to vector<32x128xf32>
    %204 = vector.broadcast %4 : vector<32x1xf32> to vector<32x128xf32>
    %205 = arith.mulf %204, %203 : vector<32x128xf32>
    %206 = vector.broadcast %195 : vector<1x128xf32> to vector<32x128xf32>
    %207 = arith.addf %205, %206 : vector<32x128xf32>
    %cst_77 = arith.constant 0.00999999977 : f32
    %208 = vector.broadcast %cst_77 : f32 to vector<32x128xf32>
    %209 = arith.mulf %207, %208 : vector<32x128xf32>
    %210 = arith.maximumf %207, %209 : vector<32x128xf32>
    %211 = arith.addf %191, %210 : vector<32x128xf32>
    %212 = vector.extract_strided_slice %202 {offsets = [0, 128], sizes = [32, 1], strides = [1, 1]} : vector<32x129xf32> to vector<32x1xf32>
    %cst_78 = arith.constant 0.000000e+00 : f32
    %213 = vector.broadcast %cst_78 : f32 to vector<32x1xf32>
    %214 = arith.cmpf ogt, %212, %213 : vector<32x1xf32>
    %215 = arith.extui %214 : vector<32x1xi1> to vector<32x1xi32>
    %216 = arith.sitofp %215 : vector<32x1xi32> to vector<32x1xf32>
    %217 = vector.broadcast %216 : vector<32x1xf32> to vector<32x128xf32>
    %218 = arith.mulf %211, %217 : vector<32x128xf32>
    %219 = vector.broadcast %16 : vector<32x1xf32> to vector<32x128xf32>
    %220 = arith.mulf %218, %219 : vector<32x128xf32>
    %cst_79 = arith.constant dense<0.000000e+00> : vector<128xf32>
    %221 = vector.multi_reduction <add>, %220, %cst_79 [0] : vector<32x128xf32> to vector<128xf32>
    %222 = vector.shape_cast %221 : vector<128xf32> to vector<1x128xf32>
    %cst_80 = arith.constant 3.200000e+01 : f32
    %223 = vector.broadcast %cst_80 : f32 to vector<1x128xf32>
    %224 = arith.divf %222, %223 : vector<1x128xf32>
    %225 = vector.broadcast %224 : vector<1x128xf32> to vector<32x128xf32>
    %226 = arith.subf %220, %225 : vector<32x128xf32>
    %227 = arith.mulf %226, %226 : vector<32x128xf32>
    %cst_81 = arith.constant dense<0.000000e+00> : vector<128xf32>
    %228 = vector.multi_reduction <add>, %227, %cst_81 [0] : vector<32x128xf32> to vector<128xf32>
    %229 = vector.shape_cast %228 : vector<128xf32> to vector<1x128xf32>
    %cst_82 = arith.constant 3.200000e+01 : f32
    %230 = vector.broadcast %cst_82 : f32 to vector<1x128xf32>
    %231 = arith.divf %229, %230 : vector<1x128xf32>
    %232 = vector.broadcast %224 : vector<1x128xf32> to vector<32x128xf32>
    %233 = arith.subf %220, %232 : vector<32x128xf32>
    %cst_83 = arith.constant 9.99999974E-6 : f32
    %234 = vector.broadcast %cst_83 : f32 to vector<1x128xf32>
    %235 = arith.addf %231, %234 : vector<1x128xf32>
    %236 = math.rsqrt %235 : vector<1x128xf32>
    %237 = vector.broadcast %236 : vector<1x128xf32> to vector<32x128xf32>
    %238 = arith.mulf %233, %237 : vector<32x128xf32>
    %c1 = arith.constant 1 : index
    %c0_84 = arith.constant 0 : index
    %c0_85 = arith.constant 0 : index
    %239 = vector.load %arg10[%c1, %c0_84, %c0_85] : memref<2x128x128xbf16, #tpu.memory_space<vmem>>, vector<1x128x128xbf16>
    %240 = vector.shape_cast %239 : vector<1x128x128xbf16> to vector<128x128xbf16>
    %c1_86 = arith.constant 1 : index
    %c0_87 = arith.constant 0 : index
    %c0_88 = arith.constant 0 : index
    %241 = vector.load %arg11[%c1_86, %c0_87, %c0_88] : memref<2x1x128xf32, #tpu.memory_space<vmem>>, vector<1x1x128xf32>
    %242 = vector.shape_cast %241 : vector<1x1x128xf32> to vector<1x128xf32>
    %243 = arith.truncf %238 : vector<32x128xf32> to vector<32x128xbf16>
    %cst_89 = arith.constant dense<0.000000e+00> : vector<32x128xf32>
    %244 = tpu.matmul %243, %240, %cst_89 {dimension_numbers = #tpu.dot_dimension_numbers<[1], [0], [0], [1], [0, 0, 1, 1], [], []>} : vector<32x128xbf16>, vector<128x128xbf16>, vector<32x128xf32> -> vector<32x128xf32>
    %245 = vector.broadcast %4 : vector<32x1xf32> to vector<32x128xf32>
    %246 = arith.mulf %245, %244 : vector<32x128xf32>
    %247 = tpu.concatenate %246, %216 in 1 : vector<32x128xf32>, vector<32x1xf32> -> vector<32x129xf32>
    %248 = arith.truncf %247 : vector<32x129xf32> to vector<32x129xbf16>
    %cst_90 = arith.constant dense<0.000000e+00> : vector<32x129xf32>
    %249 = tpu.matmul %1, %248, %cst_90 {dimension_numbers = #tpu.dot_dimension_numbers<[1], [0], [0], [1], [0, 0, 1, 1], [], []>} : vector<32x32xbf16>, vector<32x129xbf16>, vector<32x129xf32> -> vector<32x129xf32>
    %250 = vector.extract_strided_slice %249 {offsets = [0, 0], sizes = [32, 128], strides = [1, 1]} : vector<32x129xf32> to vector<32x128xf32>
    %251 = vector.broadcast %4 : vector<32x1xf32> to vector<32x128xf32>
    %252 = arith.mulf %251, %250 : vector<32x128xf32>
    %253 = vector.broadcast %242 : vector<1x128xf32> to vector<32x128xf32>
    %254 = arith.addf %252, %253 : vector<32x128xf32>
    %cst_91 = arith.constant 0.00999999977 : f32
    %255 = vector.broadcast %cst_91 : f32 to vector<32x128xf32>
    %256 = arith.mulf %254, %255 : vector<32x128xf32>
    %257 = arith.maximumf %254, %256 : vector<32x128xf32>
    %258 = arith.addf %238, %257 : vector<32x128xf32>
    %259 = vector.extract_strided_slice %249 {offsets = [0, 128], sizes = [32, 1], strides = [1, 1]} : vector<32x129xf32> to vector<32x1xf32>
    %cst_92 = arith.constant 0.000000e+00 : f32
    %260 = vector.broadcast %cst_92 : f32 to vector<32x1xf32>
    %261 = arith.cmpf ogt, %259, %260 : vector<32x1xf32>
    %262 = arith.extui %261 : vector<32x1xi1> to vector<32x1xi32>
    %263 = arith.sitofp %262 : vector<32x1xi32> to vector<32x1xf32>
    %264 = vector.broadcast %263 : vector<32x1xf32> to vector<32x128xf32>
    %265 = arith.mulf %258, %264 : vector<32x128xf32>
    %266 = vector.broadcast %16 : vector<32x1xf32> to vector<32x128xf32>
    %267 = arith.mulf %265, %266 : vector<32x128xf32>
    %cst_93 = arith.constant dense<0.000000e+00> : vector<128xf32>
    %268 = vector.multi_reduction <add>, %267, %cst_93 [0] : vector<32x128xf32> to vector<128xf32>
    %269 = vector.shape_cast %268 : vector<128xf32> to vector<1x128xf32>
    %cst_94 = arith.constant 3.200000e+01 : f32
    %270 = vector.broadcast %cst_94 : f32 to vector<1x128xf32>
    %271 = arith.divf %269, %270 : vector<1x128xf32>
    %272 = vector.broadcast %271 : vector<1x128xf32> to vector<32x128xf32>
    %273 = arith.subf %267, %272 : vector<32x128xf32>
    %274 = arith.mulf %273, %273 : vector<32x128xf32>
    %cst_95 = arith.constant dense<0.000000e+00> : vector<128xf32>
    %275 = vector.multi_reduction <add>, %274, %cst_95 [0] : vector<32x128xf32> to vector<128xf32>
    %276 = vector.shape_cast %275 : vector<128xf32> to vector<1x128xf32>
    %cst_96 = arith.constant 3.200000e+01 : f32
    %277 = vector.broadcast %cst_96 : f32 to vector<1x128xf32>
    %278 = arith.divf %276, %277 : vector<1x128xf32>
    %279 = vector.broadcast %271 : vector<1x128xf32> to vector<32x128xf32>
    %280 = arith.subf %267, %279 : vector<32x128xf32>
    %cst_97 = arith.constant 9.99999974E-6 : f32
    %281 = vector.broadcast %cst_97 : f32 to vector<1x128xf32>
    %282 = arith.addf %278, %281 : vector<1x128xf32>
    %283 = math.rsqrt %282 : vector<1x128xf32>
    %284 = vector.broadcast %283 : vector<1x128xf32> to vector<32x128xf32>
    %285 = arith.mulf %280, %284 : vector<32x128xf32>
    %286 = arith.truncf %285 : vector<32x128xf32> to vector<32x128xbf16>
    %c0_98 = arith.constant 0 : index
    %c0_99 = arith.constant 0 : index
    %287 = vector.load %arg12[%c0_98, %c0_99] : memref<128x32xbf16, #tpu.memory_space<vmem>>, vector<128x32xbf16>
    %cst_100 = arith.constant dense<0.000000e+00> : vector<32x32xf32>
    %288 = tpu.matmul %286, %287, %cst_100 {dimension_numbers = #tpu.dot_dimension_numbers<[1], [0], [0], [1], [0, 0, 1, 1], [], []>} : vector<32x128xbf16>, vector<128x32xbf16>, vector<32x32xf32> -> vector<32x32xf32>
    %c0_101 = arith.constant 0 : index
    %c0_102 = arith.constant 0 : index
    %289 = vector.load %arg13[%c0_101, %c0_102] : memref<1x32xf32, #tpu.memory_space<vmem>>, vector<1x32xf32>
    %290 = vector.broadcast %289 : vector<1x32xf32> to vector<32x32xf32>
    %291 = arith.addf %288, %290 : vector<32x32xf32>
    %cst_103 = arith.constant 0.00999999977 : f32
    %292 = vector.broadcast %cst_103 : f32 to vector<32x32xf32>
    %293 = arith.mulf %291, %292 : vector<32x32xf32>
    %294 = arith.maximumf %291, %293 : vector<32x32xf32>
    %295 = vector.broadcast %263 : vector<32x1xf32> to vector<32x32xf32>
    %296 = arith.mulf %294, %295 : vector<32x32xf32>
    %c0_104 = arith.constant 0 : index
    %c0_105 = arith.constant 0 : index
    %297 = vector.load %arg14[%c0_104, %c0_105] : memref<1x32xf32, #tpu.memory_space<vmem>>, vector<1x32xf32>
    %298 = vector.broadcast %297 : vector<1x32xf32> to vector<32x32xf32>
    %299 = arith.mulf %296, %298 : vector<32x32xf32>
    %cst_106 = arith.constant dense<0.000000e+00> : vector<32xf32>
    %300 = vector.multi_reduction <add>, %299, %cst_106 [1] : vector<32x32xf32> to vector<32xf32>
    %301 = vector.shape_cast %300 : vector<32xf32> to vector<32x1xf32>
    %c0_107 = arith.constant 0 : index
    %c0_108 = arith.constant 0 : index
    %302 = vector.load %arg15[%c0_107, %c0_108] : memref<1x1xf32, #tpu.memory_space<vmem>>, vector<1x1xf32>
    %303 = vector.broadcast %302 : vector<1x1xf32> to vector<32x1xf32>
    %304 = arith.addf %301, %303 : vector<32x1xf32>
    %cst_109 = arith.constant 0.00999999977 : f32
    %305 = vector.broadcast %cst_109 : f32 to vector<32x1xf32>
    %306 = arith.mulf %304, %305 : vector<32x1xf32>
    %307 = arith.maximumf %304, %306 : vector<32x1xf32>
    %308 = arith.mulf %307, %263 : vector<32x1xf32>
    %cst_110 = arith.constant 0.000000e+00 : f32
    %309 = vector.broadcast %cst_110 : f32 to vector<32x2xf32>
    %310 = arith.cmpf ogt, %2, %309 : vector<32x2xf32>
    %cst_111 = arith.constant -1.000000e+30 : f32
    %311 = vector.shape_cast %308 : vector<32x1xf32> to vector<32x1xf32>
    %312 = vector.broadcast %311 : vector<32x1xf32> to vector<32x2xf32>
    %313 = vector.broadcast %cst_111 : f32 to vector<32x2xf32>
    %314 = arith.select %310, %312, %313 : vector<32x2xi1>, vector<32x2xf32>
    %cst_112 = arith.constant dense<0xFF800000> : vector<2xf32>
    %315 = vector.multi_reduction <maximumf>, %314, %cst_112 [0] : vector<32x2xf32> to vector<2xf32>
    %316 = vector.shape_cast %315 : vector<2xf32> to vector<1x2xf32>
    %cst_113 = arith.constant 0.000000e+00 : f32
    %317 = vector.broadcast %cst_113 : f32 to vector<32x2xf32>
    %318 = arith.cmpf ogt, %2, %317 : vector<32x2xf32>
    %cst_114 = arith.constant 1.000000e+30 : f32
    %319 = vector.shape_cast %308 : vector<32x1xf32> to vector<32x1xf32>
    %320 = vector.broadcast %319 : vector<32x1xf32> to vector<32x2xf32>
    %321 = vector.broadcast %cst_114 : f32 to vector<32x2xf32>
    %322 = arith.select %318, %320, %321 : vector<32x2xi1>, vector<32x2xf32>
    %cst_115 = arith.constant dense<0x7F800000> : vector<2xf32>
    %323 = vector.multi_reduction <minimumf>, %322, %cst_115 [0] : vector<32x2xf32> to vector<2xf32>
    %324 = vector.shape_cast %323 : vector<2xf32> to vector<1x2xf32>
    %325 = vector.broadcast %316 : vector<1x2xf32> to vector<32x2xf32>
    %326 = arith.mulf %2, %325 : vector<32x2xf32>
    %cst_116 = arith.constant dense<0.000000e+00> : vector<32xf32>
    %327 = vector.multi_reduction <add>, %326, %cst_116 [1] : vector<32x2xf32> to vector<32xf32>
    %328 = vector.shape_cast %327 : vector<32xf32> to vector<32x1xf32>
    %329 = vector.broadcast %324 : vector<1x2xf32> to vector<32x2xf32>
    %330 = arith.mulf %2, %329 : vector<32x2xf32>
    %cst_117 = arith.constant dense<0.000000e+00> : vector<32xf32>
    %331 = vector.multi_reduction <add>, %330, %cst_117 [1] : vector<32x2xf32> to vector<32xf32>
    %332 = vector.shape_cast %331 : vector<32xf32> to vector<32x1xf32>
    %333 = arith.subf %308, %332 : vector<32x1xf32>
    %cst_118 = arith.constant 9.99999997E-7 : f32
    %334 = vector.broadcast %cst_118 : f32 to vector<32x1xf32>
    %335 = arith.addf %328, %334 : vector<32x1xf32>
    %336 = arith.subf %335, %332 : vector<32x1xf32>
    %337 = tpu.reciprocal %336 {approx = true} : vector<32x1xf32> -> vector<32x1xf32>
    %338 = arith.mulf %333, %337 : vector<32x1xf32>
    %339 = arith.mulf %338, %263 : vector<32x1xf32>
    %cst_119 = arith.constant 9.99999997E-7 : f32
    %340 = vector.broadcast %cst_119 : f32 to vector<32x1xf32>
    %341 = arith.mulf %263, %340 : vector<32x1xf32>
    %342 = arith.addf %339, %341 : vector<32x1xf32>
    %343 = arith.subf %342, %5 : vector<32x1xf32>
    %cst_120 = arith.constant 0.000000e+00 : f32
    %344 = vector.broadcast %cst_120 : f32 to vector<32x1xf32>
    %345 = arith.cmpf ogt, %343, %344 : vector<32x1xf32>
    %346 = arith.extui %345 : vector<32x1xi1> to vector<32x1xi32>
    %347 = arith.sitofp %346 : vector<32x1xi32> to vector<32x1xf32>
    %348 = tpu.concatenate %342, %347 in 1 : vector<32x1xf32>, vector<32x1xf32> -> vector<32x2xf32>
    %349 = arith.truncf %348 : vector<32x2xf32> to vector<32x2xbf16>
    %cst_121 = arith.constant dense<0.000000e+00> : vector<32x2xf32>
    %350 = tpu.matmul %1, %349, %cst_121 {dimension_numbers = #tpu.dot_dimension_numbers<[1], [0], [0], [1], [0, 0, 1, 1], [], []>} : vector<32x32xbf16>, vector<32x2xbf16>, vector<32x2xf32> -> vector<32x2xf32>
    %351 = vector.extract_strided_slice %350 {offsets = [0, 0], sizes = [32, 1], strides = [1, 1]} : vector<32x2xf32> to vector<32x1xf32>
    %352 = vector.extract_strided_slice %350 {offsets = [0, 1], sizes = [32, 1], strides = [1, 1]} : vector<32x2xf32> to vector<32x1xf32>
    %cst_122 = arith.constant 1.000000e+00 : f32
    %353 = vector.broadcast %cst_122 : f32 to vector<32x1xf32>
    %354 = arith.mulf %342, %3 : vector<32x1xf32>
    %355 = arith.mulf %3, %347 : vector<32x1xf32>
    %356 = arith.mulf %3, %263 : vector<32x1xf32>
    %357 = arith.mulf %342, %342 : vector<32x1xf32>
    %358 = arith.mulf %342, %351 : vector<32x1xf32>
    %359 = arith.mulf %347, %352 : vector<32x1xf32>
    %cst_123 = arith.constant 0.000000e+00 : f32
    %360 = vector.broadcast %cst_123 : f32 to vector<32x5xf32>
    %361 = tpu.concatenate %354, %342, %263, %347, %355, %3, %353, %356, %357, %358, %359, %360 in 1 : vector<32x1xf32>, vector<32x1xf32>, vector<32x1xf32>, vector<32x1xf32>, vector<32x1xf32>, vector<32x1xf32>, vector<32x1xf32>, vector<32x1xf32>, vector<32x1xf32>, vector<32x1xf32>, vector<32x1xf32>, vector<32x5xf32> -> vector<32x16xf32>
    %362 = vector.extract_strided_slice %2 {offsets = [0, 0], sizes = [32, 1], strides = [1, 1]} : vector<32x2xf32> to vector<32x1xf32>
    %363 = vector.broadcast %362 : vector<32x1xf32> to vector<32x16xf32>
    %364 = arith.mulf %361, %363 : vector<32x16xf32>
    %cst_124 = arith.constant dense<0.000000e+00> : vector<16xf32>
    %365 = vector.multi_reduction <add>, %364, %cst_124 [0] : vector<32x16xf32> to vector<16xf32>
    %366 = vector.shape_cast %365 : vector<16xf32> to vector<1x16xf32>
    %367 = vector.extract_strided_slice %2 {offsets = [0, 1], sizes = [32, 1], strides = [1, 1]} : vector<32x2xf32> to vector<32x1xf32>
    %368 = vector.broadcast %367 : vector<32x1xf32> to vector<32x16xf32>
    %369 = arith.mulf %361, %368 : vector<32x16xf32>
    %cst_125 = arith.constant dense<0.000000e+00> : vector<16xf32>
    %370 = vector.multi_reduction <add>, %369, %cst_125 [0] : vector<32x16xf32> to vector<16xf32>
    %371 = vector.shape_cast %370 : vector<16xf32> to vector<1x16xf32>
    %372 = tpu.concatenate %366, %371 in 0 : vector<1x16xf32>, vector<1x16xf32> -> vector<2x16xf32>
    %c0_126 = arith.constant 0 : index
    %c0_127 = arith.constant 0 : index
    %373 = vector.load %arg17[%c0_126, %c0_127] : memref<2x16xf32, #tpu.memory_space<vmem>>, vector<2x16xf32>
    tpu.vector_store %arg17[%c0_126, %c0_127], %372 {strides = array<i32>} : memref<2x16xf32, #tpu.memory_space<vmem>>, vector<2x16xf32>,
    %cst_128 = arith.constant 0.000000e+00 : f32
    %374 = vector.broadcast %cst_128 : f32 to vector<32x5xf32>
    %375 = tpu.concatenate %342, %347, %263, %374 in 1 : vector<32x1xf32>, vector<32x1xf32>, vector<32x1xf32>, vector<32x5xf32> -> vector<32x8xf32>
    %376 = tpu.iota {dimensions = array<i32: 0>} : vector<8x8xi32>
    %377 = tpu.iota {dimensions = array<i32: 1>} : vector<8x8xi32>
    %378 = arith.cmpi eq, %376, %377 : vector<8x8xi32>
    %379 = arith.extui %378 : vector<8x8xi1> to vector<8x8xi32>
    %380 = arith.sitofp %379 : vector<8x8xi32> to vector<8x8xf32>
    %cst_129 = arith.constant dense<0.000000e+00> : vector<8x32xf32>
    %381 = tpu.matmul %380, %375, %cst_129 {dimension_numbers = #tpu.dot_dimension_numbers<[1], [1], [0], [0], [0, 0, 1, 0], [], []>} : vector<8x8xf32>, vector<32x8xf32>, vector<8x32xf32> -> vector<8x32xf32>
    %c0_130 = arith.constant 0 : index
    %c0_131 = arith.constant 0 : index
    %382 = vector.load %arg16[%c0_130, %c0_131] : memref<8x32xf32, #tpu.memory_space<vmem>>, vector<8x32xf32>
    tpu.vector_store %arg16[%c0_130, %c0_131], %381 {strides = array<i32>} : memref<8x32xf32, #tpu.memory_space<vmem>>, vector<8x32xf32>,
    return
  }
}

</mosaic_0001>

<bundles_post_ra>
// kernel: tpu_custom_call.1
= control target key start
LH: loop header
LB: loop body
LE: loop exit
PB: predicated region body
PF: predicated region fallthrough
CT: control target
= control target key end

     0   :  { %s4415_s0 = inlined_call_operand.vmem [shape: f32[32,1], index: 0, kind: input, shape index: {}]   ;;  %s4416_s1 = inlined_call_operand.vmem [shape: bf16[32,32], index: 1, kind: input, shape index: {}]   ;;  %s4417_s2 = inlined_call_operand.vmem [shape: f32[32,2], index: 2, kind: input, shape index: {}]   ;;  %s4418_s3 = inlined_call_operand.vmem [shape: f32[32,1], index: 3, kind: input, shape index: {}]   ;;  %s4419_s4 = inlined_call_operand.vmem [shape: f32[32,1], index: 4, kind: input, shape index: {}]   ;;  %s4420_s5 = inlined_call_operand.vmem [shape: f32[32,1], index: 5, kind: input, shape index: {}]   ;;  %s4421_s6 = inlined_call_operand.vmem [shape: f32[1,128], index: 6, kind: input, shape index: {}]   ;;  %s4422_s7 = inlined_call_operand.vmem [shape: f32[1,128], index: 7, kind: input, shape index: {}]   ;;  %s4423_s8 = inlined_call_operand.vmem [shape: f32[1,128], index: 8, kind: input, shape index: {}]   ;;  %s4424_s9 = inlined_call_operand.vmem [shape: f32[1,128], index: 9, kind: input, shape index: {}]   ;;  %s4425_s10 = inlined_call_operand.vmem [shape: bf16[2,128,128], index: 10, kind: input, shape index: {}]   ;;  %s4426_s11 = inlined_call_operand.vmem [shape: f32[2,1,128], index: 11, kind: input, shape index: {}]   ;;  %s4427_s12 = inlined_call_operand.vmem [shape: bf16[128,32], index: 12, kind: input, shape index: {}]   ;;  %s4428_s13 = inlined_call_operand.vmem [shape: f32[1,32], index: 13, kind: input, shape index: {}]   ;;  %s4429_s14 = inlined_call_operand.vmem [shape: f32[1,32], index: 14, kind: input, shape index: {}]   ;;  %s4430_s15 = inlined_call_operand.<no memory space> [shape: f32[1,1], index: 15, kind: input, shape index: {}]   ;;  %s4431_s16 = inlined_call_operand.hbm [shape: f32[8,32], index: 16, kind: output, shape index: {0}]   ;;  %s4432_s17 = inlined_call_operand.hbm [shape: f32[2,16], index: 17, kind: output, shape index: {1}]  }
   0x1   :  { %4435 = sst [smem:[#allocation10_spill]] %s4415_s0  ;;  %v23_v0 = vstv %s4430_s15 }
   0x2   :  { %4436 = sst [smem:[#allocation11_spill]] %s4416_s1  ;;  %24 = vst [vmem:[#allocation3] sm:$0x1] %v23_v0 }
   0x3   :  { %25 = vsyncpa [#allocation5], 0  ;;  %s4437_s28 = sld [smem:[#allocation10_spill]]  ;;  %v3310_v3 = vmov 0   ;;  %v3311_v6 = vmov 0.0  }
   0x4   :  { %3057 = vset.pattern.permute.xlu0 %v3310_v3  ;;  %3058 = vset.pattern.permute.xlu1 %v3310_v3 }
   0x5   :  { %2884 = vmatprep.subr.bf16.mxu0 %v3311_v6 }
   0x9   :  { %v60_v1 = vld [vmem:[%s4437_s28] sm:$0xff]  ;;  %v62_v2 = vld [vmem:[%s4437_s28 + $0x10] sm:$0xff]  ;;  %v61_v4 = vld [vmem:[%s4437_s28 + $0x8] sm:$0xff] }
   0xa   :  { %165 = vperm.xlu0 %3057, %v60_v1   ;;  %175 = vperm.xlu1 %3058, %v62_v2   ;;  %v63_v5 = vld [vmem:[%s4437_s28 + $0x18] sm:$0xff] }
   0xe   :  { %170 = vperm.xlu0 %3057, %v61_v4   ;;  %180 = vperm.xlu1 %3058, %v63_v5  }
   0xf   :  { %26 = vsyncpa [#allocation7], 0  ;;  %vm3312_vm0 = vmmov 0   ;;  %v2720_v7 = vld [vmem:[%s4421_s6] ss:$0 sm:$0xff]  ;;  %vm204_vm1 = vcmask 261120   ;;  %v127_v39 = vlaneseq }
  0x10   :  { %2888 = vmatprep.mubr.msk.bf16.mxu0 %vm3312_vm0, %v3311_v6  ;;  %v2721_v10 = vld [vmem:[%s4422_s7] ss:$0 sm:$0xff]  ;;  %s4438_s25 = sld [smem:[#allocation11_spill]]  ;;  %s3313_s28 = smov 96   ;;  %vm675_vm6 = vcmask 523520   ;;  %vm940_vm7 = vcmask 785920  }
  0x11   :  { %v217_v37 = vld [vmem:[%s4423_s8] sm:$0x1]  ;;  %v128_v40 = vshrl.u32 %v127_v39, 7  ;;  %v133_v42 = vand.u32 127, %v127_v39  ;;  %s3314_s30 = smov 64   ;;  %s3315_s20 = smov 32  }
  0x12   :  { %v218_v38 = vpack.c.bf16 %v217_v37, %v217_v37  ;;  %vm96_vm8 = vcmask 15360   ;;  %vm1205_vm13 = vcmask 1048320   ;;  %s3318_s18 = smov 1   ;;  %s3319_s15 = smov 2  }
  0x13   :  { %v129_v41 = vadd.s32 8, %v128_v40  ;;  %v130_v43 = vadd.s32 16, %v128_v40  ;;  %v131_v44 = vadd.s32 24, %v128_v40  ;;  %vm134_vm3 = vcmp.eq.s32.totalorder %v128_v40, %v133_v42  ;;  %s3326_s7 = smov 8   ;;  %s3330_s23 = smov [#allocation4]  }
  0x14   :  { %v3509_v51 = vsel %vm134_vm3, 1.0, %v3311_v6  ;;  %v3514_v59 = vsub.s32 0, %v128_v40  ;;  %s2686_s24 = sshll.u32 %s3330_s23, 4  ;;  %s2687_s24 = int_to_ptr.vmem [resolvable:$true] %s2686_s24 }
  0x15   :  { %vm135_vm2 = vcmp.eq.s32.totalorder %v129_v41, %v133_v42  ;;  %vm136_vm4 = vcmp.eq.s32.totalorder %v130_v43, %v133_v42  ;;  %vm137_vm5 = vcmp.eq.s32.totalorder %v131_v44, %v133_v42  ;;  %s3262_s26 = scalar_lea.vmem %s2687_s24, 128  ;;  %p3267_p1 = scmp.lt.s32.totalorder %s2687_s24, %s2687_s24 }
  0x16   :  { %v65_v45 = vld [vmem:[%s4438_s25] sm:$0xff]   ;;  %v66_v47 = vld [vmem:[%s4438_s25 + $0x8] sm:$0xff]   ;;  %v2713_v50 = vsel %vm135_vm2, 1.0, %v3311_v6  ;;  %v2714_v54 = vsel %vm136_vm4, 1.0, %v3311_v6  ;;  %v2715_v55 = vsel %vm137_vm5, 1.0, %v3311_v6  ;;  %p3263_p0 = scmp.ne.s32.totalorder %s2687_s24, %s3262_s26  ;;  %p3268_p2 = scmp.lt.s32.totalorder %s3262_s26, %s3262_s26 }
  0x17   :  { %v147_v48 = vunpack.c.h.bf16 %v65_v45  ;;  %v146_v49 = vunpack.c.l.bf16 %v65_v45  ;;  %v148_v52 = vunpack.c.l.bf16 %v66_v47  ;;  %v149_v53 = vunpack.c.h.bf16 %v66_v47  ;;  %v448_v47 = vld [vmem:[%s4423_s8] sm:$0x1] }
  0x18   :  { %p3269_p3 = por %p3268_p2, %p3267_p1 }
  0x19   :  { %v151_v57 = vadd.f32 %v2713_v50, %v147_v48  ;;  %v150_v58 = vadd.f32 %v3509_v51, %v146_v49  ;;  %v152_v60 = vadd.f32 %v2714_v54, %v148_v52  ;;  %v153_v61 = vadd.f32 %v2715_v55, %v149_v53  ;;  %v719_v49 = vld [vmem:[%s4423_s8] sm:$0x1] }
  0x1a   :  { %v449_v48 = vpack.c.bf16 %v448_v47, %v448_v47  ;;  %v720_v50 = vpack.c.bf16 %v719_v49, %v719_v49  ;;  %p3270_p4 = pnand %p3269_p3, %p3263_p0 }
  0x1b   :  { %v2717_v63 = vadd.f32 -1.0, %v151_v57  ;;  %v2716_v0 = vadd.f32 -1.0, %v150_v58 }
  0x89   :  { %v3445_v8 = vpop.permute.xlu0 %165  ;;  %v3447_v9 = vpop.permute.xlu1 %175 }
  0x8a   :  { %v189_v11 = vmul.f32 %v2720_v7, %v3445_v8  ;;  %v191_v12 = vmul.f32 %v2720_v7, %v3447_v9 }
  0x8c   :  { %v3454_v13 = vmul.f32 %v2721_v10, %v189_v11  ;;  %v3456_v14 = vmul.f32 %v2721_v10, %v191_v12  ;;  %v314_v21 = vsel %vm204_vm1, %v189_v11, 1.0  ;;  %v316_v22 = vsel %vm204_vm1, %v191_v12, 1.0 }
  0x8d   :  { %v3458_v15 = vpop.permute.xlu0 %170  ;;  %v3460_v16 = vpop.permute.xlu1 %180 }
  0x8e   :  { %v190_v17 = vmul.f32 %v2720_v7, %v3458_v15  ;;  %v205_v18 = vsel %vm204_vm1, %v3454_v13, 0.0  ;;  %v192_v19 = vmul.f32 %v2720_v7, %v3460_v16  ;;  %v211_v20 = vsel %vm204_vm1, %v3456_v14, 0.0 }
  0x8f   :  { %206 = vadd.xlane.f32.xlu0 %v205_v18 }
  0x90   :  { %v3470_v23 = vpack.c.bf16 %v190_v17, %v189_v11  ;;  %v315_v24 = vsel %vm204_vm1, %v190_v17, 1.0  ;;  %v3473_v25 = vmul.f32 %v2721_v10, %v190_v17  ;;  %v3475_v26 = vmul.f32 %v2721_v10, %v192_v19 }
  0x91   :  { %v318_v27 = vpack.c.bf16 %v315_v24, %v314_v21  ;;  %v317_v28 = vsel %vm204_vm1, %v192_v19, 1.0  ;;  %v3478_v29 = vpack.i.bf16 %v190_v17, %v189_v11  ;;  %v3484_v33 = vpack.i.bf16 %v192_v19, %v191_v12 }
  0x92   :  { %v225_v30 = vsel %vm204_vm1, %v3470_v23, 0  ;;  %v208_v31 = vsel %vm204_vm1, %v3473_v25, 0.0  ;;  %v319_v32 = vpack.c.bf16 %v317_v28, %v316_v22  ;;  %v214_v34 = vsel %vm204_vm1, %v3475_v26, 0.0 }
  0x93   :  { %212 = vadd.xlane.f32.xlu0 %v211_v20  ;;  %2885 = vmatpush3.bf16.xpose.msra.mxu0 %v225_v30  ;;  %v3489_v35 = vpack.c.bf16 %v192_v19, %v191_v12  ;;  %v2718_v10 = vadd.f32 -1.0, %v152_v60  ;;  %v2719_v11 = vadd.f32 -1.0, %v153_v61  ;;  %v3517_v21 = vmul.f32 1e+30, %v2717_v63 }
  0x94   :  { %2892 = vmatprep.subr.bf16.mxu1 %v318_v27  ;;  %209 = vadd.xlane.f32.xlu1 %v208_v31  ;;  %v3519_v22 = vmul.f32 1e+30, %v2716_v0 }
  0x95   :  { %2893 = vmatpush3.bf16.msra.mxu1 %v318_v27  ;;  %2886 = vmatprep.subr.bf16.mxu0 %v3311_v6  ;;  %v228_v36 = vsel %vm204_vm1, %v3489_v35, 0  ;;  %v3521_v30 = vmul.f32 1e+30, %v2718_v10  ;;  %v3523_v37 = vmul.f32 1e+30, %v2719_v11 }
  0x96   :  { %2894 = vmatprep.subr.bf16.mxu1 %v319_v32 }
  0x97   :  { %215 = vadd.xlane.f32.xlu0 %v214_v34 }
  0x99   :  { %2895 = vmatpush3.bf16.msra.mxu1 %v319_v32 }
  0x9a   :  { %2900 = vmatprep.subr.bf16.mxu1 %v3311_v6 }
  0x9b   :  { %2887 = vmatpush3.bf16.xpose.msra.mxu0 %v228_v36 }
  0x9c   :  { %2916 = vmatprep.subr.bf16.mxu0 %v3311_v6 }
  0xa2   :  { %2889 = vmatmul.mubr.msk.bf16.vlgmr.msra.gmra.mrb[0].mxu0 %vm204_vm1, %v218_v38 }
  0xa3   :  { %2920 = vmatprep.mubr.msk.bf16.mxu0 %vm3312_vm0, %v3311_v6 }
 0x11c   :  { %v207_v46 = vpop.xlane.xlu0 %206 }
 0x120   :  { %v213_v56 = vpop.xlane.xlu0 %212 }
 0x121   :  { %v210_v1 = vpop.xlane.xlu1 %209 }
 0x124   :  { %v216_v5 = vpop.xlane.xlu0 %215 }
 0x175   :  { %v264_v62 = vpop.f32.mrb[0].mxu0 }
 0x176   :  { %v273_v2 = vrot.slane %v264_v62, %v3514_v59  ;;  %v2890_v4 = vpop.f32.mrb[1].mxu0 }
 0x177   :  { %v267_v7 = vpop.f32.mrb[2].mxu0 }
 0x178   :  { %v2891_v12 = vpop.f32.mrb[3].mxu0  ;;  %v275_v17 = vadd.f32 %v273_v2, %v210_v1  ;;  %v274_v18 = vadd.f32 %v273_v2, %v207_v46  ;;  %v276_v19 = vadd.f32 %v273_v2, %v213_v56  ;;  %v277_v20 = vadd.f32 %v273_v2, %v216_v5 }
 0x17a   :  { %v279_v24 = vmul.f32 0.2, %v275_v17  ;;  %v278_v27 = vmul.f32 0.2, %v274_v18  ;;  %v280_v28 = vmul.f32 0.2, %v276_v19 }
 0x17b   :  { %v281_v31 = vmul.f32 0.2, %v277_v20 }
 0x17c   :  { %v283_v32 = vmax.f32 %v275_v17, %v279_v24  ;;  %v282_v34 = vmax.f32 %v274_v18, %v278_v27  ;;  %v284_v36 = vmax.f32 %v276_v19, %v280_v28 }
 0x17d   :  { %v285_v38 = vmax.f32 %v277_v20, %v281_v31 }
 0x17e   :  { %v287_v39 = vadd.f32 %v283_v32, %v3517_v21  ;;  %v286_v40 = vadd.f32 %v282_v34, %v3519_v22  ;;  %v288_v43 = vadd.f32 %v284_v36, %v3521_v30 }
 0x17f   :  { %v289_v44 = vadd.f32 %v285_v38, %v3523_v37 }
 0x180   :  { %v293_v41 = vsel %vm204_vm1, %v287_v39, -inf  ;;  %v290_v42 = vsel %vm204_vm1, %v286_v40, -inf  ;;  %v296_v45 = vsel %vm204_vm1, %v288_v43, -inf }
 0x181   :  { %294 = vmax.xlane.f32.xlu0 %v293_v41  ;;  %291 = vmax.xlane.f32.xlu1 %v290_v42  ;;  %v299_v46 = vsel %vm204_vm1, %v289_v44, -inf }
 0x185   :  { %297 = vmax.xlane.f32.xlu1 %v296_v45  ;;  %300 = vmax.xlane.f32.xlu0 %v299_v46 }
 0x196   :  { %455 = vrot.lane.b32.xlu1 %v3470_v23, %s3313_s28 }
 0x19a   :  { %724 = vrot.lane.b32.xlu1 %v3470_v23, %s3314_s30 }
 0x19b   :  { %457 = vrot.lane.b32.xlu0 %v3489_v35, %s3313_s28 }
 0x19e   :  { %451 = vrot.lane.b32.xlu1 %v449_v48, %s3313_s28 }
 0x19f   :  { %726 = vrot.lane.b32.xlu0 %v3489_v35, %s3314_s30 }
 0x1a2   :  { %722 = vrot.lane.b32.xlu1 %v720_v50, %s3314_s30 }
 0x1a3   :  { %424 = vrot.lane.b32.xlu0 %v3454_v13, %s3313_s28 }
 0x1a6   :  { %426 = vrot.lane.b32.xlu1 %v3473_v25, %s3313_s28 }
 0x1a7   :  { %428 = vrot.lane.b32.xlu0 %v3456_v14, %s3313_s28 }
 0x1aa   :  { %430 = vrot.lane.b32.xlu1 %v3475_v26, %s3313_s28 }
 0x1ab   :  { %695 = vrot.lane.b32.xlu0 %v3454_v13, %s3314_s30 }
 0x1ae   :  { %697 = vrot.lane.b32.xlu1 %v3473_v25, %s3314_s30 }
 0x1af   :  { %699 = vrot.lane.b32.xlu0 %v3456_v14, %s3314_s30 }
 0x1b2   :  { %701 = vrot.lane.b32.xlu1 %v3475_v26, %s3314_s30 }
 0x20e   :  { %v292_v52 = vpop.xlane.xlu1 %291  ;;  %v295_v53 = vpop.xlane.xlu0 %294 }
 0x20f   :  { %v302_v54 = vsub.f32 %v286_v40, %v292_v52  ;;  %v303_v55 = vsub.f32 %v287_v39, %v295_v53 }
 0x211   :  { %v306_v56 = vmul.f32 1.442695, %v302_v54  ;;  %v308_v57 = vmul.f32 1.442695, %v303_v55 }
 0x212   :  { %v298_v58 = vpop.xlane.xlu1 %297  ;;  %v301_v60 = vpop.xlane.xlu0 %300 }
 0x213   :  { %3172 = vpow2.f32 %v306_v56  ;;  %v304_v61 = vsub.f32 %v288_v43, %v298_v58  ;;  %v305_v62 = vsub.f32 %v289_v44, %v301_v60 }
 0x214   :  { %3174 = vpow2.f32 %v308_v57 }
 0x215   :  { %v310_v63 = vmul.f32 1.442695, %v304_v61  ;;  %v312_v0 = vmul.f32 1.442695, %v305_v62 }
 0x216   :  { %v456_v1 = vpop.permute.xlu1 %455  ;;  %v458_v2 = vpop.permute.xlu0 %457 }
 0x217   :  { %3176 = vpow2.f32 %v310_v63  ;;  %v463_v36 = vsel %vm204_vm1, %v456_v1, 0  ;;  %v466_v45 = vsel %vm204_vm1, %v458_v2, 0 }
 0x218   :  { %3178 = vpow2.f32 %v312_v0 }
 0x21a   :  { %v725_v4 = vpop.permute.xlu1 %724  ;;  %v727_v5 = vpop.permute.xlu0 %726 }
 0x21b   :  { %v732_v7 = vsel %vm204_vm1, %v725_v4, 0  ;;  %v735_v31 = vsel %vm204_vm1, %v727_v5, 0 }
 0x21c   :  { %2917 = vmatpush3.bf16.xpose.msra.mxu0 %v732_v7 }
 0x21d   :  { %v3173_v10 = vpop.eup %3172  ;;  %2918 = vmatprep.subr.bf16.mxu0 %v3311_v6 }
 0x21e   :  { %v3175_v11 = vpop.eup %3174  ;;  %v452_v12 = vpop.permute.xlu1 %451 }
 0x21f   :  { %v425_v17 = vpop.permute.xlu0 %424  ;;  %v320_v18 = vpack.c.bf16 %v3175_v11, %v3173_v10 }
 0x220   :  { %v436_v19 = vsel %vm204_vm1, %v425_v17, 0.0 }
 0x221   :  { %437 = vadd.xlane.f32.xlu0 %v436_v19  ;;  %v3177_v20 = vpop.eup %3176  ;;  %2896 = vmatprep.mubr.msk.bf16.mxu1 %vm204_vm1, %v320_v18 }
 0x222   :  { %v3179_v24 = vpop.eup %3178  ;;  %v723_v27 = vpop.permute.xlu1 %722 }
 0x223   :  { %v429_v28 = vpop.permute.xlu0 %428  ;;  %v321_v32 = vpack.c.bf16 %v3179_v24, %v3177_v20 }
 0x224   :  { %v442_v34 = vsel %vm204_vm1, %v429_v28, 0.0  ;;  %2919 = vmatpush3.bf16.xpose.msra.mxu0 %v735_v31 }
 0x225   :  { %443 = vadd.xlane.f32.xlu0 %v442_v34  ;;  %2897 = vmatmul.mubr.msk.bf16.vlgmr.msra.gmra.mrb[0].mxu1 %vm204_vm1, %v321_v32 }
 0x226   :  { %2901 = vmatpush3.bf16.xpose.msra.mxu1 %v463_v36  ;;  %v427_v38 = vpop.permute.xlu1 %426  ;;  %2904 = vmatprep.mubr.msk.bf16.mxu1 %vm3312_vm0, %v3311_v6 }
 0x227   :  { %v696_v39 = vpop.permute.xlu0 %695  ;;  %v439_v40 = vsel %vm204_vm1, %v427_v38, 0.0  ;;  %2902 = vmatprep.subr.bf16.mxu1 %v3311_v6 }
 0x228   :  { %440 = vadd.xlane.f32.xlu1 %v439_v40  ;;  %v707_v43 = vsel %vm204_vm1, %v696_v39, 0.0 }
 0x22a   :  { %v431_v41 = vpop.permute.xlu1 %430 }
 0x22b   :  { %2921 = vmatmul.mubr.msk.bf16.vlgmr.msra.gmra.mrb[4].mxu0 %vm204_vm1, %v723_v27  ;;  %v445_v42 = vsel %vm204_vm1, %v431_v41, 0.0  ;;  %v700_v44 = vpop.permute.xlu0 %699 }
 0x22c   :  { %446 = vadd.xlane.f32.xlu0 %v445_v42  ;;  %708 = vadd.xlane.f32.xlu1 %v707_v43  ;;  %v713_v48 = vsel %vm204_vm1, %v700_v44, 0.0 }
 0x22e   :  { %2903 = vmatpush3.bf16.xpose.msra.mxu1 %v466_v45  ;;  %v698_v46 = vpop.permute.xlu1 %697 }
 0x22f   :  { %v710_v47 = vsel %vm204_vm1, %v698_v46, 0.0 }
 0x230   :  { %711 = vadd.xlane.f32.xlu0 %v710_v47  ;;  %714 = vadd.xlane.f32.xlu1 %v713_v48 }
 0x232   :  { %v702_v49 = vpop.permute.xlu1 %701 }
 0x233   :  { %v716_v50 = vsel %vm204_vm1, %v702_v49, 0.0 }
 0x234   :  { %717 = vadd.xlane.f32.xlu0 %v716_v50 }
 0x235   :  { %2905 = vmatmul.mubr.msk.bf16.vlgmr.msra.gmra.mrb[4].mxu1 %vm204_vm1, %v452_v12 }
 0x241   :  { %3060 = vrot.lane.b32.xlu1 %v3478_v29, %s3313_s28 }
 0x2ae   :  { %v438_v62 = vpop.xlane.xlu0 %437 }
 0x2b2   :  { %v444_v63 = vpop.xlane.xlu0 %443 }
 0x2b5   :  { %v441_v52 = vpop.xlane.xlu1 %440 }
 0x2b9   :  { %v709_v53 = vpop.xlane.xlu1 %708  ;;  %v447_v0 = vpop.xlane.xlu0 %446 }
 0x2bd   :  { %v715_v54 = vpop.xlane.xlu1 %714  ;;  %v712_v4 = vpop.xlane.xlu0 %711 }
 0x2c1   :  { %v3061_v55 = vpop.permute.xlu1 %3060  ;;  %v718_v17 = vpop.xlane.xlu0 %717 }
 0x2c2   :  { %v3063_v56 = vunpack.i.h.bf16 %v3061_v55  ;;  %v3062_v57 = vunpack.i.l.bf16 %v3061_v55 }
 0x2c4   :  { %v568_v58 = vsel %vm204_vm1, %v3062_v57, 1.0  ;;  %v569_v60 = vsel %vm204_vm1, %v3063_v56, 1.0 }
 0x2c5   :  { %v572_v61 = vpack.c.bf16 %v569_v60, %v568_v58 }
 0x2c7   :  { %2908 = vmatprep.subr.bf16.mxu1 %v572_v61 }
 0x2c8   :  { %2909 = vmatpush3.bf16.msra.mxu1 %v572_v61 }
 0x2f8   :  { %v3589_v1 = vpop.f32.mrb[0].mxu1 }
 0x2f9   :  { %v3591_v2 = vpop.f32.mrb[1].mxu1 }
 0x2fa   :  { %v3593_v5 = vpop.f32.mrb[2].mxu1 }
 0x2fb   :  { %v3595_v7 = vpop.f32.mrb[3].mxu1 }
 0x2fe   :  { %v771_v10 = vpop.f32.mrb[4].mxu0 }
 0x2ff   :  { %v780_v11 = vrot.slane %v771_v10, %v3514_v59  ;;  %v2922_v12 = vpop.f32.mrb[5].mxu0 }
 0x300   :  { %v774_v18 = vpop.f32.mrb[6].mxu0 }
 0x301   :  { %v2923_v19 = vpop.f32.mrb[7].mxu0  ;;  %v781_v20 = vadd.f32 %v780_v11, %v709_v53  ;;  %v782_v24 = vadd.f32 %v780_v11, %v712_v4  ;;  %v783_v27 = vadd.f32 %v780_v11, %v715_v54  ;;  %v784_v28 = vadd.f32 %v780_v11, %v718_v17 }
 0x303   :  { %v785_v31 = vmul.f32 0.2, %v781_v20  ;;  %v786_v32 = vmul.f32 0.2, %v782_v24  ;;  %v787_v34 = vmul.f32 0.2, %v783_v27 }
 0x304   :  { %v788_v36 = vmul.f32 0.2, %v784_v28 }
 0x305   :  { %v789_v38 = vmax.f32 %v781_v20, %v785_v31  ;;  %v790_v39 = vmax.f32 %v782_v24, %v786_v32  ;;  %v791_v40 = vmax.f32 %v783_v27, %v787_v34  ;;  %v984_v32 = vld [vmem:[%s4423_s8] sm:$0x1] }
 0x306   :  { %v792_v41 = vmax.f32 %v784_v28, %v788_v36  ;;  %v985_v34 = vpack.c.bf16 %v984_v32, %v984_v32 }
 0x307   :  { %v3599_v42 = vadd.f32 %v789_v38, %v3519_v22  ;;  %v3602_v43 = vadd.f32 %v790_v39, %v3517_v21  ;;  %v3605_v45 = vadd.f32 %v791_v40, %v3521_v30 }
 0x308   :  { %v502_v44 = vpop.f32.mrb[4].mxu1  ;;  %v3608_v46 = vadd.f32 %v792_v41, %v3523_v37 }
 0x309   :  { %v511_v47 = vrot.slane %v502_v44, %v3514_v59  ;;  %v2906_v48 = vpop.f32.mrb[5].mxu1  ;;  %v797_v49 = vsel %vm204_vm1, %v3599_v42, -inf  ;;  %v800_v50 = vsel %vm204_vm1, %v3602_v43, -inf  ;;  %v803_v60 = vsel %vm204_vm1, %v3605_v45, -inf }
 0x30a   :  { %v505_v53 = vpop.f32.mrb[6].mxu1  ;;  %798 = vmax.xlane.f32.xlu1 %v797_v49  ;;  %801 = vmax.xlane.f32.xlu0 %v800_v50  ;;  %v806_v61 = vsel %vm204_vm1, %v3608_v46, -inf }
 0x30b   :  { %v2907_v54 = vpop.f32.mrb[7].mxu1  ;;  %v512_v55 = vadd.f32 %v511_v47, %v438_v62  ;;  %v513_v56 = vadd.f32 %v511_v47, %v441_v52  ;;  %v514_v57 = vadd.f32 %v511_v47, %v444_v63  ;;  %v515_v58 = vadd.f32 %v511_v47, %v447_v0 }
 0x30d   :  { %v516_v4 = vmul.f32 0.2, %v512_v55  ;;  %v517_v10 = vmul.f32 0.2, %v513_v56  ;;  %v518_v11 = vmul.f32 0.2, %v514_v57 }
 0x30e   :  { %804 = vmax.xlane.f32.xlu1 %v803_v60  ;;  %807 = vmax.xlane.f32.xlu0 %v806_v61  ;;  %v519_v12 = vmul.f32 0.2, %v515_v58 }
 0x30f   :  { %v520_v17 = vmax.f32 %v512_v55, %v516_v4  ;;  %v521_v18 = vmax.f32 %v513_v56, %v517_v10  ;;  %v522_v19 = vmax.f32 %v514_v57, %v518_v11 }
 0x310   :  { %v523_v20 = vmax.f32 %v515_v58, %v519_v12 }
 0x311   :  { %v524_v52 = vadd.f32 %v520_v17, %v3519_v22  ;;  %v525_v62 = vadd.f32 %v521_v18, %v3517_v21  ;;  %v526_v24 = vadd.f32 %v522_v19, %v3521_v30 }
 0x312   :  { %v527_v27 = vadd.f32 %v523_v20, %v3523_v37 }
 0x313   :  { %v528_v63 = vsel %vm204_vm1, %v524_v52, -inf  ;;  %v531_v0 = vsel %vm204_vm1, %v525_v62, -inf  ;;  %v534_v28 = vsel %vm204_vm1, %v526_v24, -inf }
 0x314   :  { %529 = vmax.xlane.f32.xlu1 %v528_v63  ;;  %532 = vmax.xlane.f32.xlu0 %v531_v0  ;;  %v537_v31 = vsel %vm204_vm1, %v527_v27, -inf }
 0x318   :  { %535 = vmax.xlane.f32.xlu1 %v534_v28  ;;  %538 = vmax.xlane.f32.xlu0 %v537_v31 }
 0x329   :  { %3070 = vrot.lane.b32.xlu1 %v3478_v29, %s3314_s30 }
 0x32d   :  { %3075 = vrot.lane.b32.xlu1 %v3484_v33, %s3314_s30 }
 0x32e   :  { %3065 = vrot.lane.b32.xlu0 %v3484_v33, %s3313_s28 }
 0x331   :  { %991 = vrot.lane.b32.xlu1 %v3489_v35, %s3315_s20 }
 0x332   :  { %989 = vrot.lane.b32.xlu0 %v3470_v23, %s3315_s20 }
 0x335   :  { %960 = vrot.lane.b32.xlu1 %v3454_v13, %s3315_s20 }
 0x336   :  { %987 = vrot.lane.b32.xlu0 %v985_v34, %s3315_s20 }
 0x339   :  { %964 = vrot.lane.b32.xlu1 %v3456_v14, %s3315_s20 }
 0x33a   :  { %962 = vrot.lane.b32.xlu0 %v3473_v25, %s3315_s20 }
 0x33e   :  { %966 = vrot.lane.b32.xlu0 %v3475_v26, %s3315_s20 }
 0x397   :  { %v799_v36 = vpop.xlane.xlu1 %798  ;;  %v802_v35 = vpop.xlane.xlu0 %801 }
 0x398   :  { %v809_v23 = vsub.f32 %v3599_v42, %v799_v36  ;;  %v810_v40 = vsub.f32 %v3602_v43, %v802_v35 }
 0x39a   :  { %v813_v48 = vmul.f32 1.442695, %v809_v23  ;;  %v815_v50 = vmul.f32 1.442695, %v810_v40 }
 0x39b   :  { %v805_v38 = vpop.xlane.xlu1 %804  ;;  %v808_v39 = vpop.xlane.xlu0 %807 }
 0x39c   :  { %v811_v55 = vsub.f32 %v3605_v45, %v805_v38  ;;  %v812_v43 = vsub.f32 %v3608_v46, %v808_v39 }
 0x39e   :  { %v817_v11 = vmul.f32 1.442695, %v811_v55  ;;  %v819_v17 = vmul.f32 1.442695, %v812_v43  ;;  %v3316_v43 = vmov 32  }
 0x39f   :  { %3089 = vset.pattern.permute.xlu1 %v3316_v43  ;;  %3090 = vset.pattern.permute.xlu0 %v3316_v43 }
 0x3a1   :  { %v530_v13 = vpop.xlane.xlu1 %529  ;;  %v533_v41 = vpop.xlane.xlu0 %532 }
 0x3a2   :  { %v540_v44 = vsub.f32 %v524_v52, %v530_v13  ;;  %v541_v47 = vsub.f32 %v525_v62, %v533_v41 }
 0x3a4   :  { %v544_v14 = vmul.f32 1.442695, %v540_v44  ;;  %v546_v49 = vmul.f32 1.442695, %v541_v47 }
 0x3a5   :  { %v536_v25 = vpop.xlane.xlu1 %535  ;;  %v539_v53 = vpop.xlane.xlu0 %538 }
 0x3a6   :  { %3180 = vpow2.f32 %v544_v14  ;;  %v542_v26 = vsub.f32 %v526_v24, %v536_v25  ;;  %v543_v54 = vsub.f32 %v527_v27, %v539_v53 }
 0x3a7   :  { %3182 = vpow2.f32 %v546_v49 }
 0x3a8   :  { %3184 = vpow2.f32 %v813_v48  ;;  %v548_v42 = vmul.f32 1.442695, %v542_v26  ;;  %v550_v56 = vmul.f32 1.442695, %v543_v54 }
 0x3a9   :  { %3186 = vpow2.f32 %v815_v50  ;;  %v3071_v57 = vpop.permute.xlu1 %3070  ;;  %v3066_v58 = vpop.permute.xlu0 %3065 }
 0x3aa   :  { %3188 = vpow2.f32 %v548_v42  ;;  %v3073_v60 = vunpack.i.h.bf16 %v3071_v57  ;;  %v3072_v61 = vunpack.i.l.bf16 %v3071_v57  ;;  %v3068_v4 = vunpack.i.h.bf16 %v3066_v58 }
 0x3ab   :  { %3190 = vpow2.f32 %v550_v56  ;;  %v3067_v10 = vunpack.i.l.bf16 %v3066_v58 }
 0x3ac   :  { %v571_v12 = vsel %vm204_vm1, %v3068_v4, 1.0  ;;  %v833_v20 = vsel %vm204_vm1, %v3072_v61, 1.0  ;;  %v834_v46 = vsel %vm204_vm1, %v3073_v60, 1.0  ;;  %3192 = vpow2.f32 %v817_v11 }
 0x3ad   :  { %v3076_v18 = vpop.permute.xlu1 %3075  ;;  %v990_v19 = vpop.permute.xlu0 %989  ;;  %v570_v45 = vsel %vm204_vm1, %v3067_v10, 1.0  ;;  %v837_v63 = vpack.c.bf16 %v834_v46, %v833_v20  ;;  %3194 = vpow2.f32 %v819_v17 }
 0x3ae   :  { %v573_v52 = vpack.c.bf16 %v571_v12, %v570_v45  ;;  %v3078_v24 = vunpack.i.h.bf16 %v3076_v18  ;;  %v3077_v27 = vunpack.i.l.bf16 %v3076_v18  ;;  %v997_v42 = vsel %vm204_vm1, %v990_v19, 0 }
 0x3b0   :  { %v3181_v62 = vpop.eup %3180  ;;  %2910 = vmatprep.subr.bf16.mxu1 %v573_v52  ;;  %v835_v40 = vsel %vm204_vm1, %v3077_v27, 1.0  ;;  %v836_v13 = vsel %vm204_vm1, %v3078_v24, 1.0 }
 0x3b1   :  { %v3183_v0 = vpop.eup %3182  ;;  %2911 = vmatpush3.bf16.msra.mxu1 %v573_v52  ;;  %v992_v28 = vpop.permute.xlu1 %991  ;;  %v838_v14 = vpack.c.bf16 %v836_v13, %v835_v40 }
 0x3b2   :  { %v988_v31 = vpop.permute.xlu0 %987  ;;  %v3185_v32 = vpop.eup %3184  ;;  %2924 = vmatprep.subr.bf16.mxu1 %v837_v63  ;;  %v574_v34 = vpack.c.bf16 %v3183_v0, %v3181_v62  ;;  %v1000_v56 = vsel %vm204_vm1, %v992_v28, 0 }
 0x3b3   :  { %v3187_v36 = vpop.eup %3186 }
 0x3b4   :  { %v3189_v35 = vpop.eup %3188  ;;  %2912 = vmatprep.mubr.msk.bf16.mxu1 %vm204_vm1, %v574_v34  ;;  %v839_v48 = vpack.c.bf16 %v3187_v36, %v3185_v32 }
 0x3b5   :  { %v3191_v38 = vpop.eup %3190  ;;  %v961_v39 = vpop.permute.xlu1 %960 }
 0x3b6   :  { %v963_v23 = vpop.permute.xlu0 %962  ;;  %v972_v41 = vsel %vm204_vm1, %v961_v39, 0.0  ;;  %v575_v47 = vpack.c.bf16 %v3191_v38, %v3189_v35  ;;  %v3193_v25 = vpop.eup %3192 }
 0x3b7   :  { %v975_v44 = vsel %vm204_vm1, %v963_v23, 0.0  ;;  %973 = vadd.xlane.f32.xlu1 %v972_v41  ;;  %v3195_v54 = vpop.eup %3194 }
 0x3b8   :  { %976 = vadd.xlane.f32.xlu0 %v975_v44  ;;  %2913 = vmatmul.mubr.msk.bf16.vlgmr.msra.gmra.mrb[8].mxu1 %vm204_vm1, %v575_v47  ;;  %v840_v55 = vpack.c.bf16 %v3195_v54, %v3193_v25 }
 0x3b9   :  { %2925 = vmatpush3.bf16.msra.mxu1 %v837_v63  ;;  %2928 = vmatprep.mubr.msk.bf16.mxu1 %vm204_vm1, %v839_v48  ;;  %v965_v49 = vpop.permute.xlu1 %964 }
 0x3ba   :  { %v967_v50 = vpop.permute.xlu0 %966  ;;  %2926 = vmatprep.subr.bf16.mxu1 %v838_v14  ;;  %v978_v53 = vsel %vm204_vm1, %v965_v49, 0.0 }
 0x3bb   :  { %v981_v26 = vsel %vm204_vm1, %v967_v50, 0.0 }
 0x3bc   :  { %979 = vadd.xlane.f32.xlu0 %v978_v53  ;;  %982 = vadd.xlane.f32.xlu1 %v981_v26 }
 0x3bd   :  { %2927 = vmatpush3.bf16.msra.mxu1 %v838_v14 }
 0x3be   :  { %2932 = vmatprep.subr.bf16.mxu1 %v3311_v6 }
 0x3c0   :  { %2929 = vmatmul.mubr.msk.bf16.vlgmr.msra.gmra.mrb[12].mxu1 %vm204_vm1, %v840_v55 }
 0x3c1   :  { %2936 = vmatprep.mubr.msk.bf16.mxu1 %vm3312_vm0, %v3311_v6 }
 0x3c6   :  { %2933 = vmatpush3.bf16.xpose.msra.mxu1 %v997_v42 }
 0x3c7   :  { %2934 = vmatprep.subr.bf16.mxu1 %v3311_v6 }
 0x3ce   :  { %2935 = vmatpush3.bf16.xpose.msra.mxu1 %v1000_v56 }
 0x3d5   :  { %2937 = vmatmul.mubr.msk.bf16.vlgmr.msra.gmra.mrb[16].mxu1 %vm204_vm1, %v988_v31 }
 0x3d6   :  { %1492 = vmatprep.mubr.bf16.mxu1 %v3310_v3 }
 0x444   :  { %v974_v17 = vpop.xlane.xlu1 %973 }
 0x445   :  { %v977_v18 = vpop.xlane.xlu0 %976 }
 0x449   :  { %v983_v45 = vpop.xlane.xlu1 %982  ;;  %v980_v52 = vpop.xlane.xlu0 %979 }
 0x48b   :  { %v3675_v57 = vpop.f32.mrb[8].mxu1 }
 0x48c   :  { %v3677_v58 = vpop.f32.mrb[9].mxu1 }
 0x48d   :  { %v3679_v60 = vpop.f32.mrb[10].mxu1  ;;  %3196 = vrcp.f32 %v3677_v58 }
 0x48e   :  { %v3681_v61 = vpop.f32.mrb[11].mxu1 }
 0x493   :  { %v3683_v4 = vpop.f32.mrb[12].mxu1 }
 0x494   :  { %v3685_v10 = vpop.f32.mrb[13].mxu1 }
 0x495   :  { %v3687_v11 = vpop.f32.mrb[14].mxu1  ;;  %3198 = vrcp.f32 %v3685_v10 }
 0x496   :  { %v3689_v12 = vpop.f32.mrb[15].mxu1  ;;  %3200 = vrcp.f32 %v3681_v61 }
 0x497   :  { %3202 = vrcp.f32 %v3689_v12 }
 0x498   :  { %3204 = vrcp.f32 %v3675_v57 }
 0x499   :  { %3206 = vrcp.f32 %v3683_v4 }
 0x49a   :  { %3208 = vrcp.f32 %v3679_v60 }
 0x49b   :  { %3210 = vrcp.f32 %v3595_v7 }
 0x49c   :  { %3212 = vrcp.f32 %v3687_v11 }
 0x49d   :  { %3214 = vrcp.f32 %v3593_v5 }
 0x49e   :  { %3216 = vrcp.f32 %v3591_v2 }
 0x49f   :  { %3218 = vrcp.f32 %v3589_v1 }
 0x4a8   :  { %v1036_v19 = vpop.f32.mrb[16].mxu1 }
 0x4a9   :  { %v1045_v20 = vrot.slane %v1036_v19, %v3514_v59  ;;  %v2938_v46 = vpop.f32.mrb[17].mxu1 }
 0x4aa   :  { %v1039_v62 = vpop.f32.mrb[18].mxu1 }
 0x4ab   :  { %v2939_v63 = vpop.f32.mrb[19].mxu1  ;;  %v1047_v0 = vadd.f32 %v1045_v20, %v977_v18  ;;  %v1046_v24 = vadd.f32 %v1045_v20, %v974_v17  ;;  %v1049_v27 = vadd.f32 %v1045_v20, %v983_v45  ;;  %v1048_v28 = vadd.f32 %v1045_v20, %v980_v52 }
 0x4ad   :  { %v1051_v31 = vmul.f32 0.2, %v1047_v0  ;;  %v1050_v32 = vmul.f32 0.2, %v1046_v24  ;;  %v1053_v34 = vmul.f32 0.2, %v1049_v27 }
 0x4ae   :  { %v1052_v36 = vmul.f32 0.2, %v1048_v28 }
 0x4af   :  { %v1055_v35 = vmax.f32 %v1047_v0, %v1051_v31  ;;  %v1054_v38 = vmax.f32 %v1046_v24, %v1050_v32  ;;  %v1057_v39 = vmax.f32 %v1049_v27, %v1053_v34 }
 0x4b0   :  { %v1056_v23 = vmax.f32 %v1048_v28, %v1052_v36 }
 0x4b1   :  { %v1059_v40 = vadd.f32 %v1055_v35, %v3517_v21  ;;  %v1058_v59 = vadd.f32 %v1054_v38, %v3519_v22  ;;  %v1061_v44 = vadd.f32 %v1057_v39, %v3523_v37  ;;  %v3197_v21 = vpop.eup %3196 }
 0x4b2   :  { %v1060_v47 = vadd.f32 %v1056_v23, %v3521_v30  ;;  %v3199_v22 = vpop.eup %3198 }
 0x4b3   :  { %v1065_v13 = vsel %vm204_vm1, %v1059_v40, -inf  ;;  %v1062_v41 = vsel %vm204_vm1, %v1058_v59, -inf  ;;  %v1071_v48 = vsel %vm204_vm1, %v1061_v44, -inf  ;;  %v3201_v30 = vpop.eup %3200 }
 0x4b4   :  { %1066 = vmax.xlane.f32.xlu1 %v1065_v13  ;;  %1063 = vmax.xlane.f32.xlu0 %v1062_v41  ;;  %v1068_v14 = vsel %vm204_vm1, %v1060_v47, -inf }
 0x4b8   :  { %1072 = vmax.xlane.f32.xlu1 %v1071_v48  ;;  %1069 = vmax.xlane.f32.xlu0 %v1068_v14 }
 0x4c9   :  { %3085 = vrot.lane.b32.xlu1 %v3484_v33, %s3315_s20  ;;  %v3203_v33 = vpop.eup %3202 }
 0x4ca   :  { %v3205_v37 = vpop.eup %3204 }
 0x4cb   :  { %v3207_v49 = vpop.eup %3206 }
 0x4cd   :  { %637 = vperm.xlu1 %3089, %v3197_v21  }
 0x4ce   :  { %3080 = vrot.lane.b32.xlu0 %v3478_v29, %s3315_s20  ;;  %v3209_v29 = vpop.eup %3208 }
 0x4cf   :  { %v3211_v50 = vpop.eup %3210 }
 0x4d0   :  { %v3213_v25 = vpop.eup %3212 }
 0x4d1   :  { %902 = vperm.xlu1 %3089, %v3199_v22   ;;  %v3215_v53 = vpop.eup %3214 }
 0x4d2   :  { %642 = vperm.xlu0 %3090, %v3201_v30   ;;  %v3217_v26 = vpop.eup %3216 }
 0x4d3   :  { %v3219_v54 = vpop.eup %3218 }
 0x4d5   :  { %907 = vperm.xlu1 %3089, %v3203_v33  }
 0x4d6   :  { %647 = vperm.xlu0 %3090, %v3205_v37  }
 0x4d9   :  { %912 = vperm.xlu1 %3089, %v3207_v49  }
 0x4da   :  { %652 = vperm.xlu0 %3090, %v3209_v29  }
 0x4dd   :  { %388 = vperm.xlu1 %3089, %v3211_v50  }
 0x4de   :  { %917 = vperm.xlu0 %3090, %v3213_v25  }
 0x4e1   :  { %398 = vperm.xlu1 %3089, %v3215_v53  }
 0x4e2   :  { %383 = vperm.xlu0 %3090, %v3217_v26  }
 0x4e6   :  { %393 = vperm.xlu0 %3090, %v3219_v54  }
 0x541   :  { %v1067_v55 = vpop.xlane.xlu1 %1066  ;;  %v1064_v42 = vpop.xlane.xlu0 %1063 }
 0x542   :  { %v1075_v56 = vsub.f32 %v1059_v40, %v1067_v55  ;;  %v1074_v43 = vsub.f32 %v1058_v59, %v1064_v42 }
 0x544   :  { %v1080_v17 = vmul.f32 1.442695, %v1075_v56  ;;  %v1078_v18 = vmul.f32 1.442695, %v1074_v43 }
 0x545   :  { %v1073_v19 = vpop.xlane.xlu1 %1072  ;;  %v1070_v45 = vpop.xlane.xlu0 %1069 }
 0x546   :  { %3220 = vpow2.f32 %v1080_v17  ;;  %v1077_v20 = vsub.f32 %v1061_v44, %v1073_v19  ;;  %v1076_v46 = vsub.f32 %v1060_v47, %v1070_v45  ;;  %v69_v17 = vld [vmem:[%s4417_s2 + $0x8] sm:$0xff]  ;;  %v70_v45 = vld [vmem:[%s4417_s2 + $0x10] sm:$0xff] }
 0x547   :  { %3222 = vpow2.f32 %v1078_v18  ;;  %v98_v19 = vsel %vm96_vm8, %v69_v17, 0.0 }
 0x548   :  { %v1084_v52 = vmul.f32 1.442695, %v1077_v20  ;;  %v1082_v62 = vmul.f32 1.442695, %v1076_v46  ;;  %v100_v46 = vsel %vm96_vm8, %v70_v45, 0.0 }
 0x549   :  { %v3086_v63 = vpop.permute.xlu1 %3085  ;;  %v3081_v0 = vpop.permute.xlu0 %3080 }
 0x54a   :  { %3224 = vpow2.f32 %v1084_v52  ;;  %v3088_v24 = vunpack.i.h.bf16 %v3086_v63  ;;  %v3087_v27 = vunpack.i.l.bf16 %v3086_v63  ;;  %v3083_v28 = vunpack.i.h.bf16 %v3081_v0  ;;  %v71_v52 = vld [vmem:[%s4417_s2 + $0x18] sm:$0xff] }
 0x54b   :  { %3226 = vpow2.f32 %v1082_v62  ;;  %v3082_v31 = vunpack.i.l.bf16 %v3081_v0  ;;  %v102_v63 = vsel %vm96_vm8, %v71_v52, 0.0 }
 0x54c   :  { %v1099_v32 = vsel %vm204_vm1, %v3083_v28, 1.0  ;;  %v1100_v35 = vsel %vm204_vm1, %v3087_v27, 1.0  ;;  %v1101_v38 = vsel %vm204_vm1, %v3088_v24, 1.0 }
 0x54d   :  { %v638_v34 = vpop.permute.xlu1 %637  ;;  %v1098_v36 = vsel %vm204_vm1, %v3082_v31, 1.0  ;;  %v1103_v40 = vpack.c.bf16 %v1101_v38, %v1100_v35 }
 0x54e   :  { %v1102_v39 = vpack.c.bf16 %v1099_v32, %v1098_v36 }
 0x550   :  { %v3221_v23 = vpop.eup %3220  ;;  %2940 = vmatprep.subr.bf16.mxu0 %v1102_v39 }
 0x551   :  { %v3223_v59 = vpop.eup %3222  ;;  %2941 = vmatpush3.bf16.msra.mxu0 %v1102_v39  ;;  %v903_v13 = vpop.permute.xlu1 %902 }
 0x552   :  { %v643_v41 = vpop.permute.xlu0 %642  ;;  %2942 = vmatprep.subr.bf16.mxu0 %v1103_v40  ;;  %v1104_v47 = vpack.c.bf16 %v3221_v23, %v3223_v59  ;;  %v920_v53 = vmul.f32 %v903_v13, %v3685_v10 }
 0x553   :  { %v656_v44 = vmul.f32 %v643_v41, %v3681_v61  ;;  %v655_v61 = vmul.f32 %v638_v34, %v3677_v58 }
 0x554   :  { %v3225_v48 = vpop.eup %3224  ;;  %2944 = vmatprep.mubr.msk.bf16.mxu0 %vm204_vm1, %v1104_v47 }
 0x555   :  { %665 = vrot.lane.b32.xlu1 %v656_v44, %s3315_s20  ;;  %v3227_v14 = vpop.eup %3226  ;;  %2943 = vmatpush3.bf16.msra.mxu0 %v1103_v40  ;;  %v908_v21 = vpop.permute.xlu1 %907 }
 0x556   :  { %v648_v22 = vpop.permute.xlu0 %647  ;;  %v1105_v33 = vpack.c.bf16 %v3225_v48, %v3227_v14  ;;  %v921_v26 = vmul.f32 %v908_v21, %v3689_v12 }
 0x557   :  { %v657_v30 = vmul.f32 %v3675_v57, %v648_v22 }
 0x558   :  { %2945 = vmatmul.mubr.msk.bf16.vlgmr.msra.gmra.mrb[8].mxu0 %vm204_vm1, %v1105_v33 }
 0x559   :  { %667 = vrot.lane.b32.xlu0 %v657_v30, %s3315_s20  ;;  %v913_v37 = vpop.permute.xlu1 %912 }
 0x55a   :  { %v653_v49 = vpop.permute.xlu0 %652  ;;  %v922_v29 = vmul.f32 %v3683_v4, %v913_v37 }
 0x55b   :  { %v3729_v50 = vmul.f32 %v3679_v60, %v653_v49 }
 0x55c   :  { %932 = vrot.lane.b32.xlu1 %v922_v29, %s3314_s30 }
 0x55d   :  { %663 = vrot.lane.b32.xlu0 %v655_v61, %s3315_s20  ;;  %v389_v25 = vpop.permute.xlu1 %388 }
 0x55e   :  { %v918_v57 = vpop.permute.xlu0 %917  ;;  %v402_v54 = vmul.f32 %v389_v25, %v3595_v7 }
 0x55f   :  { %v3737_v55 = vmul.f32 %v3687_v11, %v918_v57 }
 0x560   :  { %406 = vst.msk [vmem:[#allocation2 + $0x8] sm:$0xff] %vm204_vm1, %v402_v54  ;;  %930 = vrot.lane.b32.xlu1 %v921_v26, %s3314_s30  ;;  %v3787_v26 = vld [vmem:[%s4418_s3] sm:$0xff]  ;;  %v3792_v54 = vld [vmem:[%s4418_s3 + $0x8] sm:$0xff] }
 0x561   :  { %928 = vrot.lane.b32.xlu0 %v920_v53, %s3314_s30  ;;  %v399_v58 = vpop.permute.xlu1 %398  ;;  %vm84_vm9 = vcmp.gt.f32.partialorder %v3787_v26, 0.0  ;;  %vm85_vm10 = vcmp.gt.f32.partialorder %v3792_v54, 0.0 }
 0x562   :  { %v384_v60 = vpop.permute.xlu0 %383  ;;  %v404_v4 = vmul.f32 %v3593_v5, %v399_v58  ;;  %vm2748_vm14 = vmpackc.low %vm85_vm10, %vm84_vm9 }
 0x563   :  { %v401_v42 = vmul.f32 %v384_v60, %v3591_v2  ;;  %v2708_v60 = vsel %vm84_vm9, 1.0, %v3311_v6 }
 0x564   :  { %408 = vst.msk [vmem:[#allocation2 + $0x18] sm:$0xff] %vm204_vm1, %v404_v4  ;;  %v2709_v4 = vsel %vm85_vm10, 1.0, %v3311_v6 }
 0x565   :  { %405 = vst.msk [vmem:[#allocation2] sm:$0xff] %vm204_vm1, %v401_v42  ;;  %v3808_v42 = vld [vmem:[%s4418_s3 + $0x10] sm:$0xff] }
 0x566   :  { %v394_v7 = vpop.permute.xlu0 %393  ;;  %vm86_vm11 = vcmp.gt.f32.partialorder %v3808_v42, 0.0  ;;  %v3923_v42 = vld [vmem:[%s4438_s25 + $0x8] sm:$0xff]  }
 0x567   :  { %v403_v10 = vmul.f32 %v3589_v1, %v394_v7  ;;  %v68_v1 = vld [vmem:[%s4417_s2] sm:$0xff]  ;;  %v3813_v7 = vld [vmem:[%s4418_s3 + $0x18] sm:$0xff] }
 0x568   :  { %v97_v18 = vsel %vm96_vm8, %v68_v1, 0.0  ;;  %vm87_vm12 = vcmp.gt.f32.partialorder %v3813_v7, 0.0 }
 0x569   :  { %407 = vst.msk [vmem:[#allocation2 + $0x10] sm:$0xff] %vm204_vm1, %v403_v10  ;;  %v99_v20 = vadd.f32 %v98_v19, %v97_v18  ;;  %v3146_v18 = vld [vmem:[%s4425_s10] sm:$0xff]   ;;  %v3147_v19 = vld [vmem:[%s4425_s10 + $0x8] sm:$0xff]   ;;  %vm2750_vm15 = vmpackc.low %vm87_vm12, %vm86_vm11 }
 0x56a   :  { %2948 = vmatprep.subr.bf16.mxu0 %v3146_v18 }
 0x56b   :  { %v101_v62 = vadd.f32 %v100_v46, %v99_v20  ;;  %2949 = vmatpush3.bf16.msra.mxu0 %v3146_v18  ;;  %v3149_v20 = vld [vmem:[%s4425_s10 + $0x18] sm:$0xff]   ;;  %v3150_v46 = vld [vmem:[%s4425_s10 + $0x20] sm:$0xff]  }
 0x56c   :  { %2950 = vmatprep.subr.bf16.mxu0 %v3147_v19 }
 0x56d   :  { %v103_v0 = vadd.f32 %v102_v63, %v101_v62  ;;  %v3152_v63 = vld [vmem:[%s4425_s10 + $0x30] sm:$0xff]  }
 0x56f   :  { %v104_v31 = vrot.slane %v103_v0, 4  ;;  %2951 = vmatpush3.bf16.msra.mxu0 %v3147_v19 }
 0x571   :  { %v105_v34 = vadd.f32 %v104_v31, %v103_v0  ;;  %v3153_v0 = vld [vmem:[%s4425_s10 + $0x38] sm:$0xff]  }
 0x573   :  { %v106_v36 = vrot.slane %v105_v34, 2 }
 0x575   :  { %v107_v39 = vadd.f32 %v106_v36, %v105_v34  ;;  %v2737_v34 = vld [vmem:[%s4424_s9] ss:$0 sm:$0xff]  ;;  %s3328_s9 = smov 9  }
 0x577   :  { %v108_v40 = vrot.slane %v107_v39, 1 }
 0x579   :  { %v109_v13 = vadd.f32 %v108_v40, %v107_v39 }
 0x5c7   :  { %v666_v11 = vpop.permute.xlu1 %665 }
 0x5c8   :  { %677 = vst.msk [vmem:[#allocation2 + $0x8] sm:$0xff] %vm675_vm6, %v666_v11  ;;  %v3092_v11 = vpack.i.bf16 %v2709_v4, %v2708_v60 }
 0x5cb   :  { %v668_v12 = vpop.permute.xlu0 %667 }
 0x5cc   :  { %678 = vst.msk [vmem:[#allocation2 + $0x10] sm:$0xff] %vm675_vm6, %v668_v12  ;;  %v76_v12 = vld [vmem:[%s4419_s4] sm:$0xff] }
 0x5ce   :  { %v933_v5 = vpop.permute.xlu1 %932 }
 0x5cf   :  { %v664_v56 = vpop.permute.xlu0 %663  ;;  %943 = vst.msk [vmem:[#allocation2 + $0x10] sm:$0xff] %vm940_vm7, %v933_v5  ;;  %v2710_v5 = vsel %vm86_vm11, 1.0, %v3311_v6 }
 0x5d0   :  { %676 = vst.msk [vmem:[#allocation2] sm:$0xff] %vm675_vm6, %v664_v56  ;;  %v2711_v56 = vsel %vm87_vm12, 1.0, %v3311_v6 }
 0x5d2   :  { %v931_v2 = vpop.permute.xlu1 %930 }
 0x5d3   :  { %v929_v43 = vpop.permute.xlu0 %928  ;;  %942 = vst.msk [vmem:[#allocation2 + $0x8] sm:$0xff] %vm940_vm7, %v931_v2  ;;  %v3098_v2 = vpack.i.bf16 %v2711_v56, %v2710_v5 }
 0x5d4   :  { %941 = vst.msk [vmem:[#allocation2] sm:$0xff] %vm940_vm7, %v929_v43  ;;  %v77_v43 = vld [vmem:[%s4419_s4 + $0x8] sm:$0xff] }
 0x62b   :  { %v2946_v24 = vpop.f32.mrb[8].mxu0 }
 0x62c   :  { %3228 = vrcp.f32 %v2946_v24  ;;  %v1146_v27 = vpop.f32.mrb[9].mxu0 }
 0x62d   :  { %v2947_v28 = vpop.f32.mrb[10].mxu0 }
 0x62e   :  { %v1149_v32 = vpop.f32.mrb[11].mxu0 }
 0x62f   :  { %3230 = vrcp.f32 %v1149_v32 }
 0x630   :  { %3232 = vrcp.f32 %v1146_v27 }
 0x631   :  { %3234 = vrcp.f32 %v2947_v28 }
 0x632   :  { %3236 = vrsqrt.f32 %v109_v13 }
 0x636   :  { %v3229_v35 = vpop.eup %3228 }
 0x637   :  { %1177 = vperm.xlu1 %3089, %v3229_v35  }
 0x639   :  { %v3231_v38 = vpop.eup %3230 }
 0x63a   :  { %v3233_v23 = vpop.eup %3232  ;;  %1172 = vperm.xlu0 %3090, %v3231_v38  }
 0x63b   :  { %1167 = vperm.xlu1 %3089, %v3233_v23   ;;  %v3235_v59 = vpop.eup %3234 }
 0x63c   :  { %v3237_v41 = vpop.eup %3236 }
 0x63d   :  { %v111_v44 = vmul.f32 %v3237_v41, %v68_v1  ;;  %v112_v48 = vmul.f32 %v3237_v41, %v69_v17  ;;  %v114_v25 = vmul.f32 %v3237_v41, %v71_v52  ;;  %v78_v1 = vld [vmem:[%s4419_s4 + $0x10] sm:$0xff]  ;;  %v79_v17 = vld [vmem:[%s4419_s4 + $0x18] sm:$0xff]  ;;  %v3151_v52 = vld [vmem:[%s4425_s10 + $0x28] sm:$0xff]  }
 0x63e   :  { %3097 = vset.pattern.permute.xlu0 %v3310_v3 }
 0x63f   :  { %1182 = vperm.xlu1 %3089, %v3235_v59   ;;  %v115_v47 = vsel %vm96_vm8, %v111_v44, 0.0  ;;  %v118_v14 = vsel %vm96_vm8, %v112_v48, 0.0  ;;  %v124_v53 = vsel %vm96_vm8, %v114_v25, 0.0 }
 0x643   :  { %3091 = vset.pattern.permute.xlu1 %v3310_v3 }
 0x659   :  { %116 = vadd.xlane.f32.xlu0 %v115_v47 }
 0x663   :  { %119 = vadd.xlane.f32.xlu1 %v118_v14 }
 0x66f   :  { %669 = vrot.lane.b32.xlu0 %v3729_v50, %s3315_s20  ;;  %v113_v50 = vmul.f32 %v3237_v41, %v70_v45  ;;  %v3148_v45 = vld [vmem:[%s4425_s10 + $0x10] sm:$0xff]   ;;  %s3321_s20 = smov 4  }
 0x670   :  { %2952 = vmatprep.subr.bf16.mxu0 %v3148_v45 }
 0x671   :  { %v121_v57 = vsel %vm96_vm8, %v113_v50, 0.0  ;;  %2953 = vmatpush3.bf16.msra.mxu0 %v3148_v45 }
 0x672   :  { %2954 = vmatprep.subr.bf16.mxu0 %v3149_v20 }
 0x673   :  { %934 = vrot.lane.b32.xlu0 %v3737_v55, %s3314_s30 }
 0x675   :  { %2955 = vmatpush3.bf16.msra.mxu0 %v3149_v20 }
 0x676   :  { %2956 = vmatprep.subr.bf16.mxu0 %v3150_v46 }
 0x679   :  { %2957 = vmatpush3.bf16.msra.mxu0 %v3150_v46 }
 0x67a   :  { %2958 = vmatprep.subr.bf16.mxu0 %v3151_v52 }
 0x67d   :  { %2959 = vmatpush3.bf16.msra.mxu0 %v3151_v52 }
 0x67e   :  { %2960 = vmatprep.subr.bf16.mxu0 %v3152_v63 }
 0x681   :  { %2961 = vmatpush3.bf16.msra.mxu0 %v3152_v63 }
 0x682   :  { %2962 = vmatprep.subr.bf16.mxu0 %v3153_v0 }
 0x685   :  { %2963 = vmatpush3.bf16.msra.mxu0 %v3153_v0 }
 0x6b6   :  { %v1178_v21 = vpop.permute.xlu1 %1177 }
 0x6b7   :  { %v1187_v22 = vmul.f32 %v2946_v24, %v1178_v21 }
 0x6b9   :  { %1197 = vrot.lane.b32.xlu1 %v1187_v22, %s3313_s28  ;;  %v1173_v61 = vpop.permute.xlu0 %1172 }
 0x6ba   :  { %v1168_v30 = vpop.permute.xlu1 %1167  ;;  %v1186_v29 = vmul.f32 %v1173_v61, %v1149_v32 }
 0x6bb   :  { %v1185_v33 = vmul.f32 %v1168_v30, %v1146_v27 }
 0x6bd   :  { %1193 = vrot.lane.b32.xlu1 %v1185_v33, %s3313_s28 }
 0x6be   :  { %v1183_v37 = vpop.permute.xlu1 %1182 }
 0x6bf   :  { %v1188_v49 = vmul.f32 %v2947_v28, %v1183_v37 }
 0x6c1   :  { %1199 = vrot.lane.b32.xlu0 %v1188_v49, %s3313_s28 }
 0x6c5   :  { %1195 = vrot.lane.b32.xlu0 %v1186_v29, %s3313_s28 }
 0x6e1   :  { %122 = vadd.xlane.f32.xlu1 %v121_v57 }
 0x6e4   :  { %125 = vadd.xlane.f32.xlu0 %v124_v53 }
 0x6e6   :  { %v3794_v55 = vpop.xlane.xlu0 %116 }
 0x6ea   :  { %v670_v58 = vpop.permute.xlu0 %669 }
 0x6eb   :  { %679 = vst.msk [vmem:[#allocation2 + $0x18] sm:$0xff] %vm675_vm6, %v670_v58 }
 0x6ee   :  { %v935_v10 = vpop.permute.xlu0 %934 }
 0x6ef   :  { %944 = vst.msk [vmem:[#allocation2 + $0x18] sm:$0xff] %vm940_vm7, %v935_v10 }
 0x6f0   :  { %v3854_v62 = vpop.xlane.xlu1 %119 }
 0x6f2   :  { %3093 = vperm.xlu1 %3091, %v3092_v11  }
 0x6f6   :  { %1418 = vperm.xlu1 %3091, %v76_v12  }
 0x6fa   :  { %1423 = vperm.xlu1 %3091, %v77_v43   ;;  %3099 = vperm.xlu0 %3097, %v3098_v2  }
 0x6fe   :  { %1428 = vperm.xlu1 %3091, %v78_v1  }
 0x702   :  { %1433 = vperm.xlu1 %3091, %v79_v17  }
 0x72b   :  { %v1198_v24 = vpop.permute.xlu1 %1197 }
 0x72c   :  { %1208 = vst.msk [vmem:[#allocation2 + $0x10] sm:$0xff] %vm1205_vm13, %v1198_v24 }
 0x72f   :  { %v1194_v27 = vpop.permute.xlu1 %1193 }
 0x730   :  { %1206 = vst.msk [vmem:[#allocation2] sm:$0xff] %vm1205_vm13, %v1194_v27 }
 0x733   :  { %v1200_v28 = vpop.permute.xlu0 %1199  ;;  %v1212_v39 = vld [vmem:[#allocation2 + $0x10] sm:$0xff] }
 0x734   :  { %1209 = vst.msk [vmem:[#allocation2 + $0x18] sm:$0xff] %vm1205_vm13, %v1200_v28  ;;  %v1223_v40 = vadd.f32 %v2737_v34, %v1212_v39 }
 0x736   :  { %v1227_v47 = vmul.f32 0.01, %v1223_v40 }
 0x737   :  { %v1196_v31 = vpop.permute.xlu0 %1195  ;;  %v1210_v36 = vld [vmem:[#allocation2] sm:$0xff] }
 0x738   :  { %1207 = vst.msk [vmem:[#allocation2 + $0x8] sm:$0xff] %vm1205_vm13, %v1196_v31  ;;  %v1221_v38 = vadd.f32 %v2737_v34, %v1210_v36  ;;  %v1231_v22 = vmax.f32 %v1223_v40, %v1227_v47 }
 0x73a   :  { %v1225_v59 = vmul.f32 0.01, %v1221_v38  ;;  %v1235_v49 = vadd.f32 %v1231_v22, %v3447_v9 }
 0x73b   :  { %v1213_v13 = vld [vmem:[#allocation2 + $0x18] sm:$0xff] }
 0x73c   :  { %v1224_v44 = vadd.f32 %v2737_v34, %v1213_v13  ;;  %v1229_v48 = vmax.f32 %v1221_v38, %v1225_v59 }
 0x73e   :  { %v1228_v21 = vmul.f32 0.01, %v1224_v44  ;;  %v1233_v30 = vadd.f32 %v1229_v48, %v3445_v8 }
 0x73f   :  { %v1211_v32 = vld [vmem:[#allocation2 + $0x8] sm:$0xff] }
 0x740   :  { %v1222_v35 = vadd.f32 %v2737_v34, %v1211_v32  ;;  %v1232_v37 = vmax.f32 %v1224_v44, %v1228_v21  ;;  %v1237_v61 = vmul.f32 %v1233_v30, %v3794_v55 }
 0x742   :  { %v1226_v23 = vmul.f32 0.01, %v1222_v35  ;;  %v1236_v57 = vadd.f32 %v1232_v37, %v3460_v16 }
 0x744   :  { %v1230_v41 = vmax.f32 %v1222_v35, %v1226_v23 }
 0x746   :  { %v1234_v14 = vadd.f32 %v1230_v41, %v3458_v15 }
 0x748   :  { %v1238_v33 = vmul.f32 %v1234_v14, %v3854_v62 }
 0x74a   :  { %v1241_v25 = vadd.f32 %v1238_v33, %v1237_v61 }
 0x76e   :  { %v3870_v29 = vpop.xlane.xlu1 %122 }
 0x76f   :  { %v1239_v50 = vmul.f32 %v1235_v49, %v3870_v29 }
 0x771   :  { %v1242_v53 = vadd.f32 %v1241_v25, %v1239_v50  ;;  %v3874_v15 = vpop.xlane.xlu0 %125 }
 0x772   :  { %v1240_v58 = vmul.f32 %v1236_v57, %v3874_v15  ;;  %v3094_v36 = vpop.permute.xlu1 %3093 }
 0x773   :  { %v3096_v35 = vunpack.i.h.bf16 %v3094_v36  ;;  %v3095_v38 = vunpack.i.l.bf16 %v3094_v36  ;;  %v2754_v36 = vld [vmem:[%s4426_s11] ss:$0 sm:$0xff] }
 0x774   :  { %v1243_v8 = vadd.f32 %v1242_v53, %v1240_v58 }
 0x776   :  { %v1244_v60 = vrot.slane %v1243_v8, 4  ;;  %v3895_v37 = vpop.permute.xlu1 %1418 }
 0x778   :  { %v1245_v4 = vadd.f32 %v1244_v60, %v1243_v8 }
 0x779   :  { %v3100_v34 = vpop.permute.xlu0 %3099 }
 0x77a   :  { %v1246_v10 = vrot.slane %v1245_v4, 2  ;;  %v3102_v39 = vunpack.i.h.bf16 %v3100_v34  ;;  %v3101_v23 = vunpack.i.l.bf16 %v3100_v34  ;;  %v3897_v49 = vpop.permute.xlu1 %1423 }
 0x77c   :  { %v1247_v11 = vadd.f32 %v1246_v10, %v1245_v4 }
 0x77e   :  { %v1248_v9 = vrot.slane %v1247_v11, 1 }
 0x780   :  { %v1249_v12 = vadd.f32 %v1248_v9, %v1247_v11  ;;  %v3915_v11 = vld [vmem:[%s4438_s25] sm:$0xff]  }
 0x782   :  { %v1251_v5 = vmul.f32 0.03125, %v1249_v12 }
 0x784   :  { %v1254_v56 = vsub.f32 %v1239_v50, %v1251_v5  ;;  %v1252_v2 = vsub.f32 %v1237_v61, %v1251_v5  ;;  %v1253_v43 = vsub.f32 %v1238_v33, %v1251_v5  ;;  %v1255_v1 = vsub.f32 %v1240_v58, %v1251_v5  ;;  %v3899_v61 = vpop.permute.xlu1 %1428 }
 0x785   :  { %v3317_v33 = vmov 1.0|1.0  }
 0x786   :  { %v1256_v17 = vmul.f32 %v1252_v2, %v1252_v2  ;;  %v1257_v18 = vmul.f32 %v1253_v43, %v1253_v43  ;;  %v1258_v16 = vmul.f32 %v1254_v56, %v1254_v56  ;;  %v1259_v45 = vmul.f32 %v1255_v1, %v1255_v1  ;;  %2749 = vmatprep.subr.msk.bf16.mxu1 %vm2748_vm14, %v3317_v33 }
 0x788   :  { %v1260_v19 = vadd.f32 %v1257_v18, %v1256_v17  ;;  %v3901_v57 = vpop.permute.xlu1 %1433 }
 0x78a   :  { %v1261_v20 = vadd.f32 %v1260_v19, %v1258_v16 }
 0x78c   :  { %v1262_v46 = vadd.f32 %v1261_v20, %v1259_v45 }
 0x78e   :  { %v1263_v52 = vrot.slane %v1262_v46, 4 }
 0x790   :  { %v1264_v63 = vadd.f32 %v1263_v52, %v1262_v46  ;;  %v3154_v46 = vld [vmem:[%s4425_s10 + $0x40] sm:$0xff]   ;;  %v3155_v52 = vld [vmem:[%s4425_s10 + $0x48] sm:$0xff]  }
 0x792   :  { %v1265_v0 = vrot.slane %v1264_v63, 2 }
 0x794   :  { %v1266_v24 = vadd.f32 %v1265_v0, %v1264_v63  ;;  %v3156_v63 = vld [vmem:[%s4425_s10 + $0x50] sm:$0xff]   ;;  %v3157_v0 = vld [vmem:[%s4425_s10 + $0x58] sm:$0xff]  }
 0x796   :  { %v1267_v27 = vrot.slane %v1266_v24, 1 }
 0x798   :  { %v1268_v28 = vadd.f32 %v1267_v27, %v1266_v24  ;;  %v3158_v24 = vld [vmem:[%s4425_s10 + $0x60] sm:$0xff]   ;;  %v3159_v27 = vld [vmem:[%s4425_s10 + $0x68] sm:$0xff]  }
 0x79a   :  { %v1269_v31 = vmul.f32 0.03125, %v1268_v28  ;;  %v3160_v28 = vld [vmem:[%s4425_s10 + $0x70] sm:$0xff]  }
 0x79c   :  { %v1270_v32 = vadd.f32 1e-05, %v1269_v31  ;;  %v3161_v31 = vld [vmem:[%s4425_s10 + $0x78] sm:$0xff]   ;;  %s3329_s10 = smov 10  }
 0x79e   :  { %3238 = vrsqrt.f32 %v1270_v32 }
 0x7a8   :  { %v3239_v40 = vpop.eup %3238 }
 0x7a9   :  { %v1272_v59 = vmul.f32 %v3239_v40, %v1252_v2  ;;  %v1273_v13 = vmul.f32 %v3239_v40, %v1253_v43  ;;  %v1274_v41 = vmul.f32 %v3239_v40, %v1254_v56  ;;  %v1275_v44 = vmul.f32 %v3239_v40, %v1255_v1 }
 0x7ab   :  { %v3877_v47 = vmul.f32 %v3095_v38, %v1272_v59  ;;  %v3879_v48 = vmul.f32 %v3096_v35, %v1273_v13  ;;  %v3881_v14 = vmul.f32 %v3102_v39, %v1275_v44  ;;  %v3883_v21 = vmul.f32 %v3101_v23, %v1274_v41 }
 0x7ad   :  { %v1318_v22 = vpack.c.bf16 %v3881_v14, %v3883_v21  ;;  %v1317_v30 = vpack.c.bf16 %v3879_v48, %v3877_v47 }
 0x7af   :  { %2964 = vmatprep.mubr.bf16.mxu0 %v1317_v30 }
 0x7b0   :  { %2965 = vmatmul.mubr.bf16.vlgmr.msra.gmra.mrb[12].mxu0 %v1318_v22 }
 0x7b1   :  { %1771 = vmatprep.mubr.bf16.mxu0 %v3310_v3 }
 0x883   :  { %v2966_v50 = vpop.f32.mrb[12].mxu0 }
 0x884   :  { %v1401_v25 = vpop.f32.mrb[13].mxu0  ;;  %v1438_v58 = vmul.f32 %v2966_v50, %v3899_v61 }
 0x885   :  { %v2967_v53 = vpop.f32.mrb[14].mxu0  ;;  %v1436_v8 = vmul.f32 %v3895_v37, %v1401_v25 }
 0x886   :  { %v1439_v26 = vmul.f32 %v2967_v53, %v3901_v57  ;;  %v1404_v54 = vpop.f32.mrb[15].mxu0 }
 0x887   :  { %v1437_v60 = vmul.f32 %v3897_v49, %v1404_v54 }
 0x888   :  { %v1442_v4 = vpack.c.bf16 %v1439_v26, %v1438_v58 }
 0x889   :  { %v1440_v10 = vpack.c.bf16 %v1437_v60, %v1436_v8 }
 0x88b   :  { %1461 = vmatpush1.bf16.msra.mxu1 %v1440_v10 }
 0x88c   :  { %2751 = vmatprep.subr.msk.bf16.mxu1 %vm2750_vm15, %v3317_v33 }
 0x88f   :  { %1463 = vmatpush1.bf16.msra.mxu1 %v1442_v4 }
 0x890   :  { %2968 = vmatprep.subr.bf16.mxu1 %v3154_v46 }
 0x892   :  { %2752 = vmatmul.mubr.msk.bf16.vlgmr.msra.gmra.mrb[20].mxu1 %vm204_vm1, %v3915_v11 }
 0x893   :  { %1502 = vmatprep.mubr.bf16.mxu1 %v3310_v3  ;;  %2969 = vmatpush3.bf16.msra.mxu1 %v3154_v46 }
 0x894   :  { %2970 = vmatprep.subr.bf16.mxu1 %v3155_v52 }
 0x897   :  { %2971 = vmatpush3.bf16.msra.mxu1 %v3155_v52 }
 0x898   :  { %2972 = vmatprep.subr.bf16.mxu1 %v3156_v63 }
 0x89a   :  { %2753 = vmatmul.mubr.msk.bf16.gmra.mrb[24].mxu1 %vm204_vm1, %v3923_v42 }
 0x89b   :  { %2973 = vmatpush3.bf16.msra.mxu1 %v3156_v63 }
 0x89c   :  { %2974 = vmatprep.subr.bf16.mxu1 %v3157_v0 }
 0x89f   :  { %2975 = vmatpush3.bf16.msra.mxu1 %v3157_v0 }
 0x8a0   :  { %2976 = vmatprep.subr.bf16.mxu1 %v3158_v24 }
 0x8a3   :  { %2977 = vmatpush3.bf16.msra.mxu1 %v3158_v24 }
 0x8a4   :  { %2978 = vmatprep.subr.bf16.mxu1 %v3159_v27 }
 0x8a7   :  { %2979 = vmatpush3.bf16.msra.mxu1 %v3159_v27 }
 0x8a8   :  { %2980 = vmatprep.subr.bf16.mxu1 %v3160_v28 }
 0x8ab   :  { %2981 = vmatpush3.bf16.msra.mxu1 %v3160_v28 }
 0x8ac   :  { %2982 = vmatprep.subr.bf16.mxu1 %v3161_v31 }
 0x8af   :  { %2983 = vmatpush3.bf16.msra.mxu1 %v3161_v31 }
 0x965   :  { %v1494_v7 = vpop.f32.mrb[20].mxu1 }
 0x966   :  { %v1496_v9 = vpop.f32.mrb[21].mxu1  ;;  %v1513_v32 = vmul.f32 %v1494_v7, %v3895_v37 }
 0x967   :  { %vm1539_vm2 = vcmp.gt.f32.partialorder %v1496_v9, 0.0  ;;  %v1498_v12 = vpop.f32.mrb[22].mxu1 }
 0x968   :  { %v1500_v5 = vpop.f32.mrb[23].mxu1  ;;  %v2755_v56 = vsel %vm1539_vm2, 1.0, %v3311_v6  ;;  %v1514_v34 = vmul.f32 %v1498_v12, %v3897_v49  ;;  %v1523_v38 = vadd.f32 %v2754_v36, %v1513_v32 }
 0x969   :  { %vm1540_vm3 = vcmp.gt.f32.partialorder %v1500_v5, 0.0 }
 0x96a   :  { %v2756_v2 = vsel %vm1540_vm3, 1.0, %v3311_v6  ;;  %vm2784_vm4 = vmpackc.low %vm1540_vm3, %vm1539_vm2  ;;  %v1524_v39 = vadd.f32 %v2754_v36, %v1514_v34  ;;  %v1527_v59 = vmul.f32 0.01, %v1523_v38 }
 0x96b   :  { %v3103_v43 = vpack.i.bf16 %v2756_v2, %v2755_v56  ;;  %2785 = vmatprep.subr.msk.bf16.mxu0 %vm2784_vm4, %v3317_v33 }
 0x96c   :  { %v1528_v13 = vmul.f32 0.01, %v1524_v39  ;;  %v1531_v22 = vmax.f32 %v1523_v38, %v1527_v59 }
 0x96d   :  { %3104 = vperm.xlu1 %3091, %v3103_v43   ;;  %v1504_v1 = vpop.f32.mrb[24].mxu1 }
 0x96e   :  { %v1506_v17 = vpop.f32.mrb[25].mxu1  ;;  %v1515_v35 = vmul.f32 %v1504_v1, %v3899_v61  ;;  %v1532_v30 = vmax.f32 %v1524_v39, %v1528_v13  ;;  %v1535_v58 = vadd.f32 %v1531_v22, %v3877_v47 }
 0x96f   :  { %vm1541_vm5 = vcmp.gt.f32.partialorder %v1506_v17, 0.0  ;;  %v1508_v18 = vpop.f32.mrb[26].mxu1 }
 0x970   :  { %v2757_v16 = vsel %vm1541_vm5, 1.0, %v3311_v6  ;;  %v1510_v19 = vpop.f32.mrb[27].mxu1  ;;  %v1525_v23 = vadd.f32 %v2754_v36, %v1515_v35  ;;  %v1516_v40 = vmul.f32 %v1508_v18, %v3901_v57  ;;  %v1536_v26 = vadd.f32 %v1532_v30, %v3879_v48 }
 0x971   :  { %vm1542_vm6 = vcmp.gt.f32.partialorder %v1510_v19, 0.0  ;;  %1563 = vperm.xlu1 %3091, %v2757_v16  }
 0x972   :  { %vm3931_vm7 = vmpackc.low %vm1542_vm6, %vm1541_vm5  ;;  %v2758_v20 = vsel %vm1542_vm6, 1.0, %v3311_v6  ;;  %v1529_v41 = vmul.f32 0.01, %v1525_v23  ;;  %v1526_v44 = vadd.f32 %v2754_v36, %v1516_v40 }
 0x974   :  { %v1530_v50 = vmul.f32 0.01, %v1526_v44  ;;  %v1533_v25 = vmax.f32 %v1525_v23, %v1529_v41 }
 0x975   :  { %1568 = vperm.xlu1 %3091, %v2758_v20  }
 0x976   :  { %v1537_v10 = vadd.f32 %v1533_v25, %v3883_v21  ;;  %v1534_v7 = vmax.f32 %v1526_v44, %v1530_v50 }
 0x978   :  { %v1538_v47 = vadd.f32 %v1534_v7, %v3881_v14 }
 0x9ec   :  { %v3105_v53 = vpop.permute.xlu1 %3104 }
 0x9ed   :  { %v3107_v54 = vunpack.i.h.bf16 %v3105_v53  ;;  %v3106_v8 = vunpack.i.l.bf16 %v3105_v53 }
 0x9ef   :  { %v1572_v60 = vmul.f32 %v3107_v54, %v1536_v26  ;;  %v1571_v4 = vmul.f32 %v3106_v8, %v1535_v58 }
 0x9f0   :  { %v1564_v9 = vpop.permute.xlu1 %1563 }
 0x9f1   :  { %v1576_v12 = vmul.f32 %v1572_v60, %v3854_v62  ;;  %v1575_v5 = vmul.f32 %v1571_v4, %v3794_v55  ;;  %v1573_v56 = vmul.f32 %v1564_v9, %v1537_v10 }
 0x9f3   :  { %v1579_v2 = vadd.f32 %v1576_v12, %v1575_v5  ;;  %v1577_v43 = vmul.f32 %v1573_v56, %v3870_v29 }
 0x9f4   :  { %v1569_v1 = vpop.permute.xlu1 %1568 }
 0x9f5   :  { %v1580_v48 = vadd.f32 %v1579_v2, %v1577_v43  ;;  %v1574_v17 = vmul.f32 %v1569_v1, %v1538_v47 }
 0x9f7   :  { %v1578_v18 = vmul.f32 %v1574_v17, %v3874_v15 }
 0x9f9   :  { %v1581_v16 = vadd.f32 %v1580_v48, %v1578_v18 }
 0x9fb   :  { %v1582_v19 = vrot.slane %v1581_v16, 4 }
 0x9fd   :  { %v1583_v21 = vadd.f32 %v1582_v19, %v1581_v16 }
 0x9ff   :  { %v1584_v20 = vrot.slane %v1583_v21, 2 }
 0xa01   :  { %v1585_v46 = vadd.f32 %v1584_v20, %v1583_v21 }
 0xa03   :  { %v1586_v52 = vrot.slane %v1585_v46, 1 }
 0xa05   :  { %v1587_v63 = vadd.f32 %v1586_v52, %v1585_v46  ;;  %v3162_v52 = vld [vmem:[%s4427_s12] sm:$0xff]  }
 0xa07   :  { %v1588_v0 = vmul.f32 0.03125, %v1587_v63  ;;  %v3163_v63 = vld [vmem:[%s4427_s12 + $0x8] sm:$0xff]  }
 0xa09   :  { %v1589_v24 = vsub.f32 %v1575_v5, %v1588_v0  ;;  %v1590_v27 = vsub.f32 %v1576_v12, %v1588_v0  ;;  %v1591_v28 = vsub.f32 %v1577_v43, %v1588_v0  ;;  %v1592_v31 = vsub.f32 %v1578_v18, %v1588_v0  ;;  %v3164_v0 = vld [vmem:[%s4427_s12 + $0x10] sm:$0xff]  }
 0xa0b   :  { %v1593_v32 = vmul.f32 %v1589_v24, %v1589_v24  ;;  %v1594_v34 = vmul.f32 %v1590_v27, %v1590_v27  ;;  %v1595_v14 = vmul.f32 %v1591_v28, %v1591_v28  ;;  %v1596_v35 = vmul.f32 %v1592_v31, %v1592_v31 }
 0xa0d   :  { %v1597_v36 = vadd.f32 %v1594_v34, %v1593_v32  ;;  %v3169_v32 = vld [vmem:[%s4427_s12 + $0x38] sm:$0xff]  }
 0xa0f   :  { %v1598_v38 = vadd.f32 %v1597_v36, %v1595_v14  ;;  %v2790_v14 = vld [vmem:[%s4426_s11 + $0x1] ss:$0 sm:$0xff] }
 0xa11   :  { %v1599_v39 = vadd.f32 %v1598_v38, %v1596_v35 }
 0xa13   :  { %v1600_v23 = vrot.slane %v1599_v39, 4 }
 0xa15   :  { %v1601_v40 = vadd.f32 %v1600_v23, %v1599_v39 }
 0xa17   :  { %v1602_v59 = vrot.slane %v1601_v40, 2 }
 0xa19   :  { %v1603_v13 = vadd.f32 %v1602_v59, %v1601_v40 }
 0xa1b   :  { %v1604_v41 = vrot.slane %v1603_v13, 1 }
 0xa1d   :  { %v1605_v44 = vadd.f32 %v1604_v41, %v1603_v13 }
 0xa1f   :  { %v1606_v22 = vmul.f32 0.03125, %v1605_v44 }
 0xa21   :  { %v1607_v30 = vadd.f32 1e-05, %v1606_v22 }
 0xa23   :  { %3240 = vrsqrt.f32 %v1607_v30 }
 0xa2d   :  { %v3241_v50 = vpop.eup %3240 }
 0xa2e   :  { %v3975_v25 = vmul.f32 %v3241_v50, %v1591_v28  ;;  %v3977_v53 = vmul.f32 %v3241_v50, %v1592_v31  ;;  %v3979_v58 = vmul.f32 %v3241_v50, %v1589_v24  ;;  %v3981_v26 = vmul.f32 %v3241_v50, %v1590_v27  ;;  %v3165_v24 = vld [vmem:[%s4427_s12 + $0x18] sm:$0xff]   ;;  %v3166_v27 = vld [vmem:[%s4427_s12 + $0x20] sm:$0xff]   ;;  %v3167_v28 = vld [vmem:[%s4427_s12 + $0x28] sm:$0xff]  }
 0xa2f   :  { %v3168_v31 = vld [vmem:[%s4427_s12 + $0x30] sm:$0xff]  }
 0xa30   :  { %v1633_v54 = vpack.c.bf16 %v3977_v53, %v3975_v25  ;;  %v1632_v8 = vpack.c.bf16 %v3981_v26, %v3979_v58 }
 0xa32   :  { %2984 = vmatprep.mubr.bf16.mxu1 %v1632_v8 }
 0xa33   :  { %2985 = vmatmul.mubr.bf16.vlgmr.msra.gmra.mrb[28].mxu1 %v1633_v54 }
 0xa34   :  { %3012 = vmatprep.mubr.msk.bf16.mxu1 %vm204_vm1, %v3915_v11 }
 0xb06   :  { %v2986_v60 = vpop.f32.mrb[28].mxu1 }
 0xb07   :  { %v1716_v4 = vpop.f32.mrb[29].mxu1  ;;  %v1733_v7 = vmul.f32 %v2986_v60, %v3899_v61 }
 0xb08   :  { %v2987_v10 = vpop.f32.mrb[30].mxu1  ;;  %v1731_v5 = vmul.f32 %v1716_v4, %v3895_v37 }
 0xb09   :  { %v1734_v9 = vmul.f32 %v2987_v10, %v3901_v57  ;;  %v1719_v12 = vpop.f32.mrb[31].mxu1 }
 0xb0a   :  { %v1732_v56 = vmul.f32 %v1719_v12, %v3897_v49 }
 0xb0b   :  { %v1737_v2 = vpack.c.bf16 %v1734_v9, %v1733_v7 }
 0xb0c   :  { %v1735_v43 = vpack.c.bf16 %v1732_v56, %v1731_v5 }
 0xb0e   :  { %1740 = vmatpush1.bf16.msra.mxu0 %v1735_v43 }
 0xb0f   :  { %2787 = vmatprep.subr.msk.bf16.mxu0 %vm3931_vm7, %v3317_v33  ;;  %vm2226_vm7 = vcmask 7168  }
 0xb12   :  { %1742 = vmatpush1.bf16.msra.mxu0 %v1737_v2 }
 0xb13   :  { %2988 = vmatprep.subr.bf16.mxu0 %v3162_v52 }
 0xb15   :  { %2788 = vmatmul.mubr.msk.bf16.vlgmr.msra.gmra.mrb[16].mxu0 %vm204_vm1, %v3915_v11 }
 0xb16   :  { %1781 = vmatprep.mubr.bf16.mxu0 %v3310_v3  ;;  %2989 = vmatpush3.bf16.msra.mxu0 %v3162_v52 }
 0xb17   :  { %2990 = vmatprep.subr.bf16.mxu0 %v3163_v63 }
 0xb1a   :  { %2991 = vmatpush3.bf16.msra.mxu0 %v3163_v63 }
 0xb1b   :  { %2992 = vmatprep.subr.bf16.mxu0 %v3164_v0 }
 0xb1d   :  { %2789 = vmatmul.mubr.msk.bf16.gmra.mrb[20].mxu0 %vm204_vm1, %v3923_v42 }
 0xb1e   :  { %2993 = vmatpush3.bf16.msra.mxu0 %v3164_v0 }
 0xb1f   :  { %2994 = vmatprep.subr.bf16.mxu0 %v3165_v24 }
 0xb22   :  { %2995 = vmatpush3.bf16.msra.mxu0 %v3165_v24 }
 0xb23   :  { %2996 = vmatprep.subr.bf16.mxu0 %v3166_v27 }
 0xb26   :  { %2997 = vmatpush3.bf16.msra.mxu0 %v3166_v27 }
 0xb27   :  { %2998 = vmatprep.subr.bf16.mxu0 %v3167_v28 }
 0xb2a   :  { %2999 = vmatpush3.bf16.msra.mxu0 %v3167_v28 }
 0xb2b   :  { %3000 = vmatprep.subr.bf16.mxu0 %v3168_v31 }
 0xb2e   :  { %3001 = vmatpush3.bf16.msra.mxu0 %v3168_v31 }
 0xb2f   :  { %3002 = vmatprep.subr.bf16.mxu0 %v3169_v32 }
 0xb32   :  { %3003 = vmatpush3.bf16.msra.mxu0 %v3169_v32 }
 0xbe8   :  { %v1773_v47 = vpop.f32.mrb[16].mxu0 }
 0xbe9   :  { %v1775_v1 = vpop.f32.mrb[17].mxu0  ;;  %v1792_v34 = vmul.f32 %v1773_v47, %v3895_v37 }
 0xbea   :  { %vm1818_vm9 = vcmp.gt.f32.partialorder %v1775_v1, 0.0  ;;  %v1777_v48 = vpop.f32.mrb[18].mxu0 }
 0xbeb   :  { %v1779_v17 = vpop.f32.mrb[19].mxu0  ;;  %v4002_v18 = vsel %vm1818_vm9, 1.0, %v3311_v6  ;;  %v1793_v36 = vmul.f32 %v1777_v48, %v3897_v49  ;;  %v1802_v38 = vadd.f32 %v2790_v14, %v1792_v34  ;;  %vm2466_vm9 = vcmask 23552  }
 0xbec   :  { %vm1819_vm10 = vcmp.gt.f32.partialorder %v1779_v17, 0.0 }
 0xbed   :  { %v4005_v33 = vsel %vm1819_vm10, 1.0, %v3311_v6  ;;  %v1803_v39 = vadd.f32 %v2790_v14, %v1793_v36  ;;  %v1806_v59 = vmul.f32 0.01, %v1802_v38  ;;  %vm2491_vm10 = vcmask 64512  }
 0xbee   :  { %v4009_v11 = vpack.i.bf16 %v4005_v33, %v4002_v18 }
 0xbef   :  { %v1807_v13 = vmul.f32 0.01, %v1803_v39  ;;  %v1810_v22 = vmax.f32 %v1802_v38, %v1806_v59 }
 0xbf0   :  { %3109 = vperm.xlu1 %3091, %v4009_v11   ;;  %v1783_v45 = vpop.f32.mrb[20].mxu0 }
 0xbf1   :  { %v1785_v16 = vpop.f32.mrb[21].mxu0  ;;  %v1794_v35 = vmul.f32 %v1783_v45, %v3899_v61  ;;  %v1811_v30 = vmax.f32 %v1803_v39, %v1807_v13  ;;  %v1814_v54 = vadd.f32 %v1810_v22, %v3979_v58 }
 0xbf2   :  { %vm1820_vm11 = vcmp.gt.f32.partialorder %v1785_v16, 0.0  ;;  %v1787_v19 = vpop.f32.mrb[22].mxu0 }
 0xbf3   :  { %v4013_v21 = vsel %vm1820_vm11, 1.0, %v3311_v6  ;;  %v1789_v20 = vpop.f32.mrb[23].mxu0  ;;  %v1795_v23 = vmul.f32 %v1787_v19, %v3901_v57  ;;  %v1804_v40 = vadd.f32 %v2790_v14, %v1794_v35  ;;  %v1815_v61 = vadd.f32 %v1811_v30, %v3981_v26  ;;  %vm3029_vm11 = vmpackc.low %vm2491_vm10, %vm2491_vm10 }
 0xbf4   :  { %vm1821_vm12 = vcmp.gt.f32.partialorder %v1789_v20, 0.0  ;;  %1842 = vperm.xlu0 %3097, %v4013_v21  }
 0xbf5   :  { %v4017_v46 = vsel %vm1821_vm12, 1.0, %v3311_v6  ;;  %v1805_v41 = vadd.f32 %v2790_v14, %v1795_v23  ;;  %v1808_v44 = vmul.f32 0.01, %v1804_v40 }
 0xbf6   :  { %1847 = vperm.xlu1 %3091, %v4017_v46  }
 0xbf7   :  { %v1809_v37 = vmul.f32 0.01, %v1805_v41  ;;  %v1812_v50 = vmax.f32 %v1804_v40, %v1808_v44 }
 0xbf9   :  { %v1813_v49 = vmax.f32 %v1805_v41, %v1809_v37  ;;  %v1816_v7 = vadd.f32 %v1812_v50, %v3975_v25  ;;  %v2795_v50 = vld [vmem:[%s4428_s13] ss:$0 sm:$0xff]  ;;  %s3324_s13 = smov 5  }
 0xbfb   :  { %v1817_v5 = vadd.f32 %v1813_v49, %v3977_v53 }
 0xc6f   :  { %v4052_v8 = vpop.permute.xlu1 %3109 }
 0xc70   :  { %v3112_v60 = vunpack.i.h.bf16 %v4052_v8  ;;  %v3111_v57 = vunpack.i.l.bf16 %v4052_v8  ;;  %v2805_v8 = vld [vmem:[#allocation3] ss:$0 sm:$0xff] }
 0xc72   :  { %v1851_v4 = vmul.f32 %v3112_v60, %v1815_v61  ;;  %v1850_v10 = vmul.f32 %v3111_v57, %v1814_v54 }
 0xc73   :  { %v4062_v9 = vpop.permute.xlu0 %1842 }
 0xc74   :  { %v1855_v58 = vmul.f32 %v1851_v4, %v3854_v62  ;;  %v1854_v12 = vmul.f32 %v1850_v10, %v3794_v55  ;;  %v1852_v26 = vmul.f32 %v4062_v9, %v1816_v7 }
 0xc75   :  { %v4068_v56 = vpop.permute.xlu1 %1847 }
 0xc76   :  { %v1858_v2 = vadd.f32 %v1855_v58, %v1854_v12  ;;  %v1856_v43 = vmul.f32 %v1852_v26, %v3870_v29  ;;  %v1853_v47 = vmul.f32 %v4068_v56, %v1817_v5 }
 0xc78   :  { %v1859_v1 = vadd.f32 %v1858_v2, %v1856_v43  ;;  %v1857_v25 = vmul.f32 %v1853_v47, %v3874_v15 }
 0xc7a   :  { %v1860_v48 = vadd.f32 %v1859_v1, %v1857_v25 }
 0xc7c   :  { %v1861_v17 = vrot.slane %v1860_v48, 4 }
 0xc7e   :  { %v1862_v45 = vadd.f32 %v1861_v17, %v1860_v48 }
 0xc80   :  { %v1863_v62 = vrot.slane %v1862_v45, 2 }
 0xc82   :  { %v1864_v16 = vadd.f32 %v1863_v62, %v1862_v45 }
 0xc84   :  { %v1865_v55 = vrot.slane %v1864_v16, 1 }
 0xc86   :  { %v1866_v19 = vadd.f32 %v1865_v55, %v1864_v16 }
 0xc88   :  { %v1867_v20 = vmul.f32 0.03125, %v1866_v19 }
 0xc8a   :  { %v1868_v52 = vsub.f32 %v1854_v12, %v1867_v20  ;;  %v1869_v53 = vsub.f32 %v1855_v58, %v1867_v20  ;;  %v1870_v63 = vsub.f32 %v1856_v43, %v1867_v20  ;;  %v1871_v0 = vsub.f32 %v1857_v25, %v1867_v20  ;;  %v2804_v25 = vld [vmem:[%s4429_s14] ss:$0 sm:$0xff]  ;;  %s3325_s14 = smov 7  }
 0xc8c   :  { %v1872_v24 = vmul.f32 %v1868_v52, %v1868_v52  ;;  %v1873_v27 = vmul.f32 %v1869_v53, %v1869_v53  ;;  %v1874_v29 = vmul.f32 %v1870_v63, %v1870_v63  ;;  %v1875_v31 = vmul.f32 %v1871_v0, %v1871_v0 }
 0xc8e   :  { %v1876_v28 = vadd.f32 %v1873_v27, %v1872_v24 }
 0xc90   :  { %v1877_v32 = vadd.f32 %v1876_v28, %v1874_v29 }
 0xc92   :  { %v1878_v34 = vadd.f32 %v1877_v32, %v1875_v31 }
 0xc94   :  { %v1879_v15 = vrot.slane %v1878_v34, 4 }
 0xc96   :  { %v1880_v14 = vadd.f32 %v1879_v15, %v1878_v34 }
 0xc98   :  { %v1881_v36 = vrot.slane %v1880_v14, 2 }
 0xc9a   :  { %v1882_v35 = vadd.f32 %v1881_v36, %v1880_v14 }
 0xc9c   :  { %v1883_v38 = vrot.slane %v1882_v35, 1 }
 0xc9e   :  { %v1884_v39 = vadd.f32 %v1883_v38, %v1882_v35 }
 0xca0   :  { %v1885_v23 = vmul.f32 0.03125, %v1884_v39 }
 0xca2   :  { %v1886_v40 = vadd.f32 1e-05, %v1885_v23 }
 0xca4   :  { %3242 = vrsqrt.f32 %v1886_v40 }
 0xcae   :  { %v3243_v59 = vpop.eup %3242 }
 0xcaf   :  { %v1890_v13 = vmul.f32 %v3243_v59, %v1870_v63  ;;  %v1891_v41 = vmul.f32 %v3243_v59, %v1871_v0  ;;  %v1888_v44 = vmul.f32 %v3243_v59, %v1868_v52  ;;  %v1889_v22 = vmul.f32 %v3243_v59, %v1869_v53 }
 0xcb1   :  { %v1893_v30 = vpack.c.bf16 %v1891_v41, %v1890_v13  ;;  %v1892_v37 = vpack.c.bf16 %v1889_v22, %v1888_v44  ;;  %v4108_v22 = vld [vmem:[%s4417_s2 + $0x8] sm:$0xff] }
 0xcb2   :  { %vm2073_vm13 = vcmp.gt.f32.partialorder %v4108_v22, 0.0 }
 0xcb3   :  { %3004 = vmatprep.mubr.bf16.mxu0 %v1892_v37  ;;  %v4114_v37 = vld [vmem:[%s4417_s2] sm:$0xff] }
 0xcb4   :  { %3005 = vmatmul.mubr.bf16.vlgmr.msra.gmra.mrb[24].mxu0 %v1893_v30  ;;  %vm2072_vm14 = vcmp.gt.f32.partialorder %v4114_v37, 0.0 }
 0xd87   :  { %v3006_v54 = vpop.f32.mrb[24].mxu0 }
 0xd88   :  { %v2008_v49 = vadd.f32 %v3006_v54, %v2795_v50  ;;  %v1999_v61 = vpop.f32.mrb[25].mxu0 }
 0xd89   :  { %v2000_v4 = vadd.f32 %v2795_v50, %v1999_v61  ;;  %v3007_v10 = vpop.f32.mrb[26].mxu0 }
 0xd8a   :  { %v2016_v7 = vmul.f32 0.01, %v2008_v49  ;;  %v2011_v58 = vadd.f32 %v3007_v10, %v2795_v50  ;;  %v2002_v12 = vpop.f32.mrb[27].mxu0 }
 0xd8b   :  { %v2014_v26 = vmul.f32 0.01, %v2000_v4  ;;  %v2003_v5 = vadd.f32 %v2795_v50, %v2002_v12  ;;  %v4120_v50 = vld [vmem:[%s4417_s2 + $0x10] sm:$0xff] }
 0xd8c   :  { %v2020_v2 = vmax.f32 %v2008_v49, %v2016_v7  ;;  %v2017_v43 = vmul.f32 0.01, %v2011_v58  ;;  %vm2074_vm15 = vcmp.gt.f32.partialorder %v4120_v50, 0.0  ;;  %v4126_v7 = vld [vmem:[%s4417_s2 + $0x18] sm:$0xff] }
 0xd8d   :  { %v2018_v47 = vmax.f32 %v2000_v4, %v2014_v26  ;;  %v2015_v1 = vmul.f32 0.01, %v2003_v5  ;;  %vm2075_vm2 = vcmp.gt.f32.partialorder %v4126_v7, 0.0 }
 0xd8e   :  { %v2024_v48 = vmul.f32 %v2020_v2, %v4062_v9  ;;  %v2021_v45 = vmax.f32 %v2011_v58, %v2017_v43 }
 0xd8f   :  { %v2022_v17 = vmul.f32 %v3111_v57, %v2018_v47  ;;  %v2019_v62 = vmax.f32 %v2003_v5, %v2015_v1 }
 0xd90   :  { %v2025_v19 = vmul.f32 %v2021_v45, %v4068_v56  ;;  %v2035_v53 = vmul.f32 %v2804_v25, %v2024_v48 }
 0xd91   :  { %v2023_v16 = vmul.f32 %v3112_v60, %v2019_v62  ;;  %v2033_v55 = vmul.f32 %v2804_v25, %v2022_v17 }
 0xd92   :  { %v2043_v9 = vsel %vm204_vm1, %v2035_v53, 0.0  ;;  %v2036_v0 = vmul.f32 %v2804_v25, %v2025_v19 }
 0xd93   :  { %v2037_v20 = vsel %vm204_vm1, %v2033_v55, 0.0  ;;  %v2034_v52 = vmul.f32 %v2804_v25, %v2023_v16 }
 0xd94   :  { %2038 = vadd.xlane.f32.xlu0 %v2037_v20  ;;  %v2046_v57 = vsel %vm204_vm1, %v2036_v0, 0.0 }
 0xd95   :  { %v2040_v63 = vsel %vm204_vm1, %v2034_v52, 0.0 }
 0xd96   :  { %2041 = vadd.xlane.f32.xlu1 %v2040_v63 }
 0xd98   :  { %2044 = vadd.xlane.f32.xlu0 %v2043_v9 }
 0xd9c   :  { %2047 = vadd.xlane.f32.xlu0 %v2046_v57 }
 0xe21   :  { %v2039_v60 = vpop.xlane.xlu0 %2038 }
 0xe22   :  { %v2056_v24 = vadd.f32 %v2805_v8, %v2039_v60 }
 0xe23   :  { %v2042_v27 = vpop.xlane.xlu1 %2041 }
 0xe24   :  { %v2060_v56 = vmul.f32 0.01, %v2056_v24  ;;  %v2057_v29 = vadd.f32 %v2805_v8, %v2042_v27 }
 0xe25   :  { %v2045_v28 = vpop.xlane.xlu0 %2044 }
 0xe26   :  { %v2064_v31 = vmax.f32 %v2056_v24, %v2060_v56  ;;  %v2061_v32 = vmul.f32 0.01, %v2057_v29  ;;  %v2058_v34 = vadd.f32 %v2805_v8, %v2045_v28 }
 0xe28   :  { %v4090_v15 = vmul.f32 %v4002_v18, %v2064_v31  ;;  %v2065_v14 = vmax.f32 %v2057_v29, %v2061_v32  ;;  %v2062_v36 = vmul.f32 0.01, %v2058_v34 }
 0xe29   :  { %v2048_v35 = vpop.xlane.xlu0 %2047 }
 0xe2a   :  { %v4093_v38 = vmul.f32 %v4005_v33, %v2065_v14  ;;  %v2066_v39 = vmax.f32 %v2058_v34, %v2062_v36  ;;  %v2059_v23 = vadd.f32 %v2805_v8, %v2048_v35  ;;  %2078 = vperm.xlu1 %3091, %v4090_v15  }
 0xe2c   :  { %v4097_v40 = vmul.f32 %v4013_v21, %v2066_v39  ;;  %v2063_v59 = vmul.f32 0.01, %v2059_v23  ;;  %2083 = vperm.xlu0 %3097, %v4093_v38  }
 0xe2e   :  { %v2067_v13 = vmax.f32 %v2059_v23, %v2063_v59  ;;  %2088 = vperm.xlu1 %3091, %v4097_v40  }
 0xe30   :  { %v4102_v41 = vmul.f32 %v4017_v46, %v2067_v13 }
 0xe32   :  { %2093 = vperm.xlu1 %3091, %v4102_v41  }
 0xea9   :  { %v2079_v44 = vpop.permute.xlu1 %2078 }
 0xeaa   :  { %v2096_v4 = vsel %vm2072_vm14, %v2079_v44, -1e+30  ;;  %v2113_v10 = vsel %vm2072_vm14, %v2079_v44, 1e+30 }
 0xeab   :  { %v2084_v30 = vpop.permute.xlu0 %2083  ;;  %v2100_v43 = vsel %vm96_vm8, %v2096_v4, -inf  ;;  %v2117_v47 = vsel %vm96_vm8, %v2113_v10, inf }
 0xeac   :  { %v2097_v49 = vsel %vm2073_vm13, %v2084_v30, -1e+30  ;;  %v2114_v61 = vsel %vm2073_vm13, %v2084_v30, 1e+30 }
 0xead   :  { %v2089_v54 = vpop.permute.xlu1 %2088  ;;  %v2101_v26 = vsel %vm96_vm8, %v2097_v49, -inf  ;;  %v2118_v5 = vsel %vm96_vm8, %v2114_v61, inf }
 0xeae   :  { %v2098_v58 = vsel %vm2074_vm15, %v2089_v54, -1e+30  ;;  %v2115_v12 = vsel %vm2074_vm15, %v2089_v54, 1e+30  ;;  %v2104_v16 = vmax.f32 %v2100_v43, %v2101_v26  ;;  %v2121_v55 = vmin.f32 %v2117_v47, %v2118_v5 }
 0xeaf   :  { %v2102_v48 = vsel %vm96_vm8, %v2098_v58, -inf  ;;  %v2119_v17 = vsel %vm96_vm8, %v2115_v12, inf }
 0xeb1   :  { %v2094_v2 = vpop.permute.xlu1 %2093 }
 0xeb2   :  { %v2099_v1 = vsel %vm2075_vm2, %v2094_v2, -1e+30  ;;  %v2116_v25 = vsel %vm2075_vm2, %v2094_v2, 1e+30 }
 0xeb3   :  { %v2103_v45 = vsel %vm96_vm8, %v2099_v1, -inf  ;;  %v2120_v62 = vsel %vm96_vm8, %v2116_v25, inf }
 0xeb4   :  { %v2105_v19 = vmax.f32 %v2102_v48, %v2103_v45  ;;  %v2122_v20 = vmin.f32 %v2119_v17, %v2120_v62 }
 0xeb6   :  { %v2106_v52 = vmax.f32 %v2104_v16, %v2105_v19  ;;  %v2123_v53 = vmin.f32 %v2121_v55, %v2122_v20 }
 0xeb8   :  { %v2107_v63 = vrot.slane %v2106_v52, 4  ;;  %v2124_v9 = vrot.slane %v2123_v53, 4 }
 0xeba   :  { %v2108_v0 = vmax.f32 %v2106_v52, %v2107_v63  ;;  %v2125_v57 = vmin.f32 %v2123_v53, %v2124_v9  ;;  %v2186_v63 = vmul.f32 1e-06, %v4002_v18 }
 0xebc   :  { %v2109_v8 = vrot.slane %v2108_v0, 2  ;;  %v2126_v60 = vrot.slane %v2125_v57, 2 }
 0xebe   :  { %v2110_v24 = vmax.f32 %v2108_v0, %v2109_v8  ;;  %v2127_v27 = vmin.f32 %v2125_v57, %v2126_v60 }
 0xec0   :  { %v2111_v56 = vrot.slane %v2110_v24, 1  ;;  %v2128_v29 = vrot.slane %v2127_v27, 1 }
 0xec2   :  { %v2112_v28 = vmax.f32 %v2110_v24, %v2111_v56  ;;  %v2129_v31 = vmin.f32 %v2127_v27, %v2128_v29 }
 0xec4   :  { %v2131_v32 = vmul.f32 %v4108_v22, %v2112_v28  ;;  %v2130_v34 = vmul.f32 %v4114_v37, %v2112_v28  ;;  %v2132_v35 = vmul.f32 %v4120_v50, %v2112_v28  ;;  %v2146_v39 = vmul.f32 %v4114_v37, %v2129_v31 }
 0xec5   :  { %v2148_v13 = vmul.f32 %v4120_v50, %v2129_v31  ;;  %v2147_v44 = vmul.f32 %v4108_v22, %v2129_v31  ;;  %v2133_v49 = vmul.f32 %v4126_v7, %v2112_v28  ;;  %v2149_v4 = vmul.f32 %v4126_v7, %v2129_v31 }
 0xec6   :  { %v2137_v14 = vsel %vm96_vm8, %v2131_v32, 0.0  ;;  %v2134_v36 = vsel %vm96_vm8, %v2130_v34, 0.0  ;;  %v2140_v23 = vsel %vm96_vm8, %v2132_v35, 0.0  ;;  %v2150_v59 = vsel %vm96_vm8, %v2146_v39, 0.0 }
 0xec7   :  { %2138 = vadd.xlane.f32.xlu1 %v2137_v14  ;;  %2135 = vadd.xlane.f32.xlu0 %v2134_v36  ;;  %v2156_v30 = vsel %vm96_vm8, %v2148_v13, 0.0  ;;  %v2153_v54 = vsel %vm96_vm8, %v2147_v44, 0.0  ;;  %v2143_v61 = vsel %vm96_vm8, %v2133_v49, 0.0  ;;  %v2159_v10 = vsel %vm96_vm8, %v2149_v4, 0.0 }
 0xec8   :  { %v2187_v28 = vmul.f32 1e-06, %v4005_v33  ;;  %v2188_v32 = vmul.f32 1e-06, %v4013_v21  ;;  %v2189_v13 = vmul.f32 1e-06, %v4017_v46 }
 0xecb   :  { %2141 = vadd.xlane.f32.xlu1 %v2140_v23  ;;  %2151 = vadd.xlane.f32.xlu0 %v2150_v59  ;;  %v82_v23 = vld [vmem:[%s4420_s5 + $0x10] sm:$0xff] }
 0xecf   :  { %2157 = vadd.xlane.f32.xlu1 %v2156_v30  ;;  %2154 = vadd.xlane.f32.xlu0 %v2153_v54 }
 0xed3   :  { %2144 = vadd.xlane.f32.xlu0 %v2143_v61  ;;  %v83_v61 = vld [vmem:[%s4420_s5 + $0x18] sm:$0xff] }
 0xed7   :  { %2160 = vadd.xlane.f32.xlu0 %v2159_v10 }
 0xf54   :  { %v2139_v58 = vpop.xlane.xlu1 %2138  ;;  %v2136_v12 = vpop.xlane.xlu0 %2135 }
 0xf55   :  { %v2166_v26 = vadd.f32 1e-06, %v2136_v12  ;;  %v2167_v47 = vadd.f32 1e-06, %v2139_v58 }
 0xf58   :  { %v2142_v5 = vpop.xlane.xlu1 %2141  ;;  %v2152_v2 = vpop.xlane.xlu0 %2151 }
 0xf59   :  { %v2170_v43 = vsub.f32 %v2166_v26, %v2152_v2  ;;  %v2168_v1 = vadd.f32 1e-06, %v2142_v5  ;;  %v2162_v55 = vsub.f32 %v4090_v15, %v2152_v2  ;;  %v80_v15 = vld [vmem:[%s4420_s5] sm:$0xff]  ;;  %v3128_v5 = vpack.i.bf16 %v4017_v46, %v4013_v21 }
 0xf5b   :  { %3244 = vrcp.f32 %v2170_v43 }
 0xf5c   :  { %v2158_v25 = vpop.xlane.xlu1 %2157  ;;  %v2155_v48 = vpop.xlane.xlu0 %2154 }
 0xf5d   :  { %v2172_v17 = vsub.f32 %v2168_v1, %v2158_v25  ;;  %v2171_v45 = vsub.f32 %v2167_v47, %v2155_v48  ;;  %v2164_v0 = vsub.f32 %v4097_v40, %v2158_v25  ;;  %v2163_v8 = vsub.f32 %v4093_v38, %v2155_v48  ;;  %v81_v38 = vld [vmem:[%s4420_s5 + $0x8] sm:$0xff]  ;;  %s3320_s5 = smov 3  }
 0xf5f   :  { %3246 = vrcp.f32 %v2172_v17 }
 0xf60   :  { %3248 = vrcp.f32 %v2171_v45  ;;  %v2145_v62 = vpop.xlane.xlu0 %2144 }
 0xf61   :  { %v2169_v16 = vadd.f32 1e-06, %v2145_v62 }
 0xf64   :  { %v2161_v19 = vpop.xlane.xlu0 %2160 }
 0xf65   :  { %v3245_v20 = vpop.eup %3244  ;;  %v2173_v52 = vsub.f32 %v2169_v16, %v2161_v19  ;;  %v2165_v36 = vsub.f32 %v4102_v41, %v2161_v19 }
 0xf66   :  { %v2178_v53 = vmul.f32 %v3245_v20, %v2162_v55 }
 0xf67   :  { %3250 = vrcp.f32 %v2173_v52 }
 0xf68   :  { %v2182_v9 = vmul.f32 %v4002_v18, %v2178_v53 }
 0xf69   :  { %v3247_v57 = vpop.eup %3246 }
 0xf6a   :  { %v3249_v60 = vpop.eup %3248  ;;  %v4158_v24 = vadd.f32 %v2186_v63, %v2182_v9  ;;  %v2180_v27 = vmul.f32 %v3247_v57, %v2164_v0  ;;  %v4233_v0 = vld [vmem:[%s4418_s3 + $0x8] sm:$0xff] }
 0xf6b   :  { %v2179_v56 = vmul.f32 %v3249_v60, %v2163_v8 }
 0xf6c   :  { %v2184_v29 = vmul.f32 %v4013_v21, %v2180_v27  ;;  %v2194_v40 = vsub.f32 %v4158_v24, %v80_v15 }
 0xf6d   :  { %v2183_v31 = vmul.f32 %v4005_v33, %v2179_v56 }
 0xf6e   :  { %v4173_v14 = vadd.f32 %v2188_v32, %v2184_v29  ;;  %vm2198_vm3 = vcmp.gt.f32.partialorder %v2194_v40, 0.0 }
 0xf6f   :  { %v4171_v34 = vadd.f32 %v2187_v28, %v2183_v31  ;;  %v4183_v30 = vsel %vm2198_vm3, 1.0, %v3311_v6  ;;  %v4244_v31 = vld [vmem:[%s4418_s3 + $0x10] sm:$0xff] }
 0xf70   :  { %v2196_v41 = vsub.f32 %v4173_v14, %v82_v23  ;;  %v2284_v40 = vmul.f32 %v4244_v31, %v4173_v14 }
 0xf71   :  { %v3251_v35 = vpop.eup %3250  ;;  %v2195_v39 = vsub.f32 %v4171_v34, %v81_v38  ;;  %v2283_v57 = vmul.f32 %v4233_v0, %v4171_v34 }
 0xf72   :  { %v2181_v59 = vmul.f32 %v3251_v35, %v2165_v36  ;;  %vm2200_vm5 = vcmp.gt.f32.partialorder %v2196_v41, 0.0  ;;  %v4253_v35 = vld [vmem:[%s4418_s3 + $0x18] sm:$0xff] }
 0xf73   :  { %vm2199_vm4 = vcmp.gt.f32.partialorder %v2195_v39, 0.0  ;;  %v4199_v58 = vsel %vm2200_vm5, 1.0, %v3311_v6 }
 0xf74   :  { %v2185_v44 = vmul.f32 %v4017_v46, %v2181_v59  ;;  %v4186_v54 = vsel %vm2199_vm4, 1.0, %v3311_v6  ;;  %v3322_v59 = vmov 0.0|0.0  }
 0xf75   :  { %v3113_v49 = vpack.i.bf16 %v4186_v54, %v4183_v30 }
 0xf76   :  { %v4194_v4 = vadd.f32 %v2189_v13, %v2185_v44 }
 0xf77   :  { %3114 = vrot.lane.b32.xlu1 %v3113_v49, %s3318_s18 }
 0xf78   :  { %v2197_v10 = vsub.f32 %v4194_v4, %v83_v61  ;;  %v2285_v39 = vmul.f32 %v4253_v35, %v4194_v4 }
 0xf7a   :  { %vm2201_vm6 = vcmp.gt.f32.partialorder %v2197_v10, 0.0 }
 0xf7b   :  { %3124 = vrot.lane.b32.xlu1 %v4009_v11, %s3319_s15  ;;  %v4202_v12 = vsel %vm2201_vm6, 1.0, %v3311_v6  ;;  %v4215_v11 = vld [vmem:[%s4418_s3] sm:$0xff]  ;;  %s3323_s3 = smov 127  }
 0xf7c   :  { %v3118_v26 = vpack.i.bf16 %v4202_v12, %v4199_v58  ;;  %v2286_v2 = vmul.f32 %v4215_v11, %v4183_v30  ;;  %v2282_v20 = vmul.f32 %v4215_v11, %v4158_v24 }
 0xf7e   :  { %3119 = vrot.lane.b32.xlu0 %v3118_v26, %s3318_s18 }
 0xf7f   :  { %3129 = vrot.lane.b32.xlu1 %v3128_v5, %s3319_s15 }
 0xf82   :  { %2326 = vrot.lane.b32.xlu0 %v4158_v24, %s3318_s18 }
 0xf83   :  { %2328 = vrot.lane.b32.xlu1 %v4171_v34, %s3318_s18 }
 0xf86   :  { %2330 = vrot.lane.b32.xlu0 %v4173_v14, %s3318_s18 }
 0xf87   :  { %2332 = vrot.lane.b32.xlu1 %v4194_v4, %s3318_s18 }
 0xf8a   :  { %3134 = vrot.lane.b32.xlu0 %v3113_v49, %s3320_s5 }
 0xf8b   :  { %3139 = vrot.lane.b32.xlu1 %v3118_v26, %s3320_s5 }
 0xf8e   :  { %2366 = vrot.lane.b32.xlu0 %v2286_v2, %s3321_s20 }
 0xfe9   :  { %v3115_v43 = vpop.permute.xlu1 %3114 }
 0xfea   :  { %v3117_v47 = vunpack.i.h.bf16 %v3115_v43  ;;  %v3116_v1 = vunpack.i.l.bf16 %v3115_v43 }
 0xfec   :  { %v2227_v25 = vsel %vm2226_vm7, %v4158_v24, %v3116_v1  ;;  %v2228_v48 = vsel %vm2226_vm7, %v4171_v34, %v3117_v47 }
 0xfed   :  { %v3125_v17 = vpop.permute.xlu1 %3124  ;;  %v2231_v45 = vpack.c.bf16 %v2228_v48, %v2227_v25 }
 0xfee   :  { %v3127_v63 = vunpack.i.h.bf16 %v3125_v17  ;;  %v3126_v9 = vunpack.i.l.bf16 %v3125_v17 }
 0xfef   :  { %3008 = vmatprep.subr.bf16.mxu1 %v2231_v45 }
 0xff0   :  { %3009 = vmatpush3.bf16.msra.mxu1 %v2231_v45  ;;  %v3120_v62 = vpop.permute.xlu0 %3119  ;;  %v2586_v32 = vsel %vm96_vm8, %v2227_v25, %v3126_v9  ;;  %v2587_v38 = vsel %vm96_vm8, %v2228_v48, %v3127_v63 }
 0xff1   :  { %v3130_v16 = vpop.permute.xlu1 %3129  ;;  %v3122_v55 = vunpack.i.h.bf16 %v3120_v62  ;;  %v3121_v19 = vunpack.i.l.bf16 %v3120_v62  ;;  %v2590_v10 = vsel %vm2466_vm9, %v2586_v32, 0.0  ;;  %v2591_v26 = vsel %vm2466_vm9, %v2587_v38, 0.0 }
 0xff2   :  { %v3131_v36 = vunpack.i.l.bf16 %v3130_v16  ;;  %v3132_v13 = vunpack.i.h.bf16 %v3130_v16  ;;  %v3028_v25 = vpack.c.bf16 %v2591_v26, %v2590_v10 }
 0xff3   :  { %v2229_v52 = vsel %vm2226_vm7, %v4173_v14, %v3121_v19  ;;  %v2230_v53 = vsel %vm2226_vm7, %v4194_v4, %v3122_v55 }
 0xff4   :  { %v2327_v8 = vpop.permute.xlu0 %2326  ;;  %v2232_v60 = vpack.c.bf16 %v2230_v53, %v2229_v52  ;;  %v2588_v62 = vsel %vm96_vm8, %v2229_v52, %v3131_v36 }
 0xff5   :  { %v2329_v27 = vpop.permute.xlu1 %2328  ;;  %v2458_v15 = vsel %vm2226_vm7, %v2282_v20, %v2327_v8  ;;  %v2592_v19 = vsel %vm2466_vm9, %v2588_v62, 0.0  ;;  %v2288_v8 = vmul.f32 %v4244_v31, %v4199_v58 }
 0xff6   :  { %v2459_v56 = vsel %vm2226_vm7, %v2283_v57, %v2329_v27  ;;  %v2462_v29 = vsel %vm96_vm8, %v2458_v15, %v3126_v9  ;;  %3010 = vmatprep.subr.bf16.mxu1 %v2232_v60  ;;  %v2290_v27 = vmul.f32 %v4215_v11, %v4002_v18  ;;  %v2292_v15 = vmul.f32 %v4244_v31, %v4013_v21 }
 0xff7   :  { %v2463_v28 = vsel %vm96_vm8, %v2459_v56, %v3127_v63  ;;  %3011 = vmatpush3.bf16.msra.mxu1 %v2232_v60  ;;  %v2287_v60 = vmul.f32 %v4233_v0, %v4186_v54  ;;  %v2291_v56 = vmul.f32 %v4233_v0, %v4005_v33  ;;  %v2293_v18 = vmul.f32 %v4253_v35, %v4017_v46 }
 0xff8   :  { %v2331_v23 = vpop.permute.xlu0 %2330  ;;  %3027 = vmatprep.subr.bf16.mxu1 %v3322_v59  ;;  %v2295_v21 = vmul.f32 %v4171_v34, %v4171_v34  ;;  %v2297_v33 = vmul.f32 %v4194_v4, %v4194_v4 }
 0xff9   :  { %v2333_v44 = vpop.permute.xlu1 %2332  ;;  %v2460_v41 = vsel %vm2226_vm7, %v2284_v40, %v2331_v23 }
 0xffa   :  { %v2461_v49 = vsel %vm2226_vm7, %v2285_v39, %v2333_v44  ;;  %v2464_v61 = vsel %vm96_vm8, %v2460_v41, %v3131_v36  ;;  %3013 = vmatmul.mubr.msk.bf16.vlgmr.msra.gmra.mrb[32].mxu1 %vm204_vm1, %v3923_v42 }
 0xffb   :  { %v2465_v5 = vsel %vm96_vm8, %v2461_v49, %v3132_v13  ;;  %3024 = vmatprep.mubr.msk.f32.mxu1 %vm3312_vm0, %v3311_v6  ;;  %v2589_v6 = vsel %vm96_vm8, %v2230_v53, %v3132_v13 }
 0xffc   :  { %v3135_v2 = vpop.permute.xlu0 %3134  ;;  %v2593_v20 = vsel %vm2466_vm9, %v2589_v6, 0.0 }
 0xffd   :  { %v3140_v43 = vpop.permute.xlu1 %3139  ;;  %v3137_v47 = vunpack.i.h.bf16 %v3135_v2  ;;  %v3136_v1 = vunpack.i.l.bf16 %v3135_v2  ;;  %v3032_v63 = vpack.c.bf16 %v2593_v20, %v2592_v19 }
 0xffe   :  { %v3142_v48 = vunpack.i.h.bf16 %v3140_v43  ;;  %v3141_v42 = vunpack.i.l.bf16 %v3140_v43 }
 0xfff   :  { %v4270_v17 = vsel %vm2466_vm9, %v2462_v29, %v3136_v1  ;;  %v4273_v45 = vsel %vm2466_vm9, %v2463_v28, %v3137_v47  ;;  %v2294_v29 = vmul.f32 %v4158_v24, %v4158_v24 }
0x1000   :  { %3030 = vmatpush3.bf16.xpose.msk.msra.mxu1 %vm3029_vm11, %v3028_v25  ;;  %v4278_v16 = vsel %vm2466_vm9, %v2464_v61, %v3141_v42  ;;  %v4281_v55 = vsel %vm2466_vm9, %v2465_v5, %v3142_v48 }
0x1001   :  { %3031 = vmatprep.subr.bf16.mxu1 %v3322_v59 }
0x1008   :  { %3034 = vmatpush3.bf16.xpose.msk.msra.mxu1 %vm3029_vm11, %v3032_v63 }
0x100f   :  { %3025 = vmatmul.mubr.msk.f32.vlgmr.msra.gmra.mrb[36].mxu1 %vm2491_vm10, %v3509_v51  ;;  %v2289_v51 = vmul.f32 %v4253_v35, %v4202_v12 }
0x10cd   :  { %v3014_v52 = vpop.f32.mrb[32].mxu1 }
0x10ce   :  { %2310 = vrot.lane.b32.xlu0 %v3014_v52, %s3323_s3  ;;  %v2267_v53 = vpop.f32.mrb[33].mxu1 }
0x10cf   :  { %v4287_v9 = vpop.f32.mrb[34].mxu1  ;;  %v2298_v46 = vmul.f32 %v2267_v53, %v4158_v24 }
0x10d0   :  { %2312 = vrot.lane.b32.xlu1 %v4287_v9, %s3323_s3  ;;  %v2270_v57 = vpop.f32.mrb[35].mxu1 }
0x10d1   :  { %v2299_v28 = vmul.f32 %v2270_v57, %v4171_v34 }
0x10d2   :  { %2306 = vrot.lane.b32.xlu0 %v2267_v53, %s3323_s3 }
0x10d4   :  { %2308 = vrot.lane.b32.xlu1 %v2270_v57, %s3323_s3 }
0x10d6   :  { %2370 = vrot.lane.b32.xlu0 %v2288_v8, %s3321_s20 }
0x10d8   :  { %2368 = vrot.lane.b32.xlu1 %v2287_v60, %s3321_s20 }
0x10da   :  { %2382 = vrot.lane.b32.xlu0 %v4215_v11, %s3324_s13  ;;  %v2296_v11 = vmul.f32 %v4173_v14, %v4173_v14 }
0x10dc   :  { %2372 = vrot.lane.b32.xlu1 %v2289_v51, %s3321_s20 }
0x10de   :  { %2386 = vrot.lane.b32.xlu0 %v4244_v31, %s3324_s13  ;;  %v4331_v31 = vpop.permute.xlu0 %2366 }
0x10e0   :  { %2384 = vrot.lane.b32.xlu1 %v4233_v0, %s3324_s13  ;;  %v3327_v0 = vmov 1  }
0x10e2   :  { %2398 = vrot.lane.b32.xlu0 %v2290_v27, %s3325_s14  ;;  %v2675_v38 = vpop.f32.mrb[36].mxu1 }
0x10e3   :  { %2679 = vst.msk [vmem:[#allocation4] sm:$0xff] %vm204_vm1, %v2675_v38 }
0x10e4   :  { %2388 = vrot.lane.b32.xlu1 %v4253_v35, %s3324_s13 }
0x10e6   :  { %2402 = vrot.lane.b32.xlu0 %v2292_v15, %s3325_s14 }
0x10e8   :  { %2400 = vrot.lane.b32.xlu1 %v2291_v56, %s3325_s14 }
0x10ea   :  { %2414 = vrot.lane.b32.xlu0 %v2294_v29, %s3326_s7 }
0x10ec   :  { %2404 = vrot.lane.b32.xlu1 %v2293_v18, %s3325_s14 }
0x10ee   :  { %2418 = vrot.lane.b32.xlu0 %v2296_v11, %s3326_s7 }
0x10f0   :  { %2416 = vrot.lane.b32.xlu1 %v2295_v21, %s3326_s7 }
0x10f2   :  { %2513 = vperm.xlu0 %3097, %v4114_v37  }
0x10f4   :  { %2420 = vrot.lane.b32.xlu1 %v2297_v33, %s3326_s7 }
0x10f6   :  { %3143 = vset.pattern.permute.xlu0 %v3327_v0 }
0x10f7   :  { %2550 = vperm.xlu0 %3143, %v4114_v37   ;;  %v2300_v37 = vmul.f32 %v3014_v52, %v4173_v14  ;;  %v2301_v14 = vmul.f32 %v4287_v9, %v4194_v4 }
0x10f8   :  { %2518 = vperm.xlu1 %3091, %v4108_v22  }
0x10fb   :  { %2558 = vperm.xlu0 %3143, %v4120_v50  }
0x10fc   :  { %3144 = vset.pattern.permute.xlu1 %v3327_v0 }
0x10fd   :  { %2554 = vperm.xlu1 %3144, %v4108_v22  }
0x10ff   :  { %2562 = vperm.xlu0 %3143, %v4126_v7  }
0x1101   :  { %3145 = vset.pattern.permute.xlu1 %v3310_v3 }
0x1102   :  { %2523 = vperm.xlu1 %3145, %v4120_v50  }
0x1103   :  { %2430 = vrot.lane.b32.xlu0 %v2298_v46, %s3328_s9 }
0x1106   :  { %2528 = vperm.xlu1 %3145, %v4126_v7  }
0x110a   :  { %2434 = vrot.lane.b32.xlu1 %v2300_v37, %s3328_s9 }
0x110e   :  { %2432 = vrot.lane.b32.xlu1 %v2299_v28, %s3328_s9 }
0x1140   :  { %v2311_v22 = vpop.permute.xlu0 %2310 }
0x1141   :  { %v2320_v40 = vmul.f32 %v4199_v58, %v2311_v22  ;;  %v3026_v58 = vpop.f32.mrb[37].mxu1 }
0x1142   :  { %v2313_v24 = vpop.permute.xlu1 %2312 }
0x1143   :  { %2450 = vrot.lane.b32.xlu0 %v2320_v40, %s3329_s10  ;;  %v2321_v34 = vmul.f32 %v4202_v12, %v2313_v24 }
0x1144   :  { %v2307_v3 = vpop.permute.xlu0 %2306 }
0x1145   :  { %v2318_v50 = vmul.f32 %v4183_v30, %v2307_v3 }
0x1146   :  { %v2309_v32 = vpop.permute.xlu1 %2308 }
0x1147   :  { %v2319_v7 = vmul.f32 %v4186_v54, %v2309_v32  ;;  %2446 = vrot.lane.b32.xlu1 %v2318_v50, %s3329_s10 }
0x1149   :  { %2448 = vrot.lane.b32.xlu0 %v2319_v7, %s3329_s10 }
0x114b   :  { %2436 = vrot.lane.b32.xlu1 %v2301_v14, %s3328_s9 }
0x114d   :  { %2452 = vrot.lane.b32.xlu0 %v2321_v34, %s3329_s10 }
0x114e   :  { %3273 = shalt.err (!%p3270_p4)
}
0x114f   :  { %s3274_s27 = scalar_lea.hbm %s4431_s16, 128 }
0x1150   :  { %p3275_p5 = scmp.ne.s32.totalorder %s4431_s16, %s3274_s27  ;;  %p3278_p6 = scmp.lt.u32.totalorder %s3274_s27, %s4431_s16 }
0x1152   :  { %p3280_p7 = pnand %p3278_p6, %p3275_p5 }
0x1154   :  { %3283 = shalt.err (!%p3280_p7)
}
0x1155   :  { %2689 = dma.vmem_to_hbm [thread:$0]  %s2687_s24, 128, %s4431_s16, [#allocation5]   ;;  %v2369_v30 = vpop.permute.xlu1 %2368  ;;  %v2371_v54 = vpop.permute.xlu0 %2370  ;;  %vm2471_vm0 = vcmask 31744   ;;  %vm2476_vm1 = vcmask 39936   ;;  %vm2481_vm8 = vcmask 48128   ;;  %vm2486_vm12 = vcmask 56320  }
0x1156   :  { %v2474_v62 = vsel %vm2471_vm0, %v4278_v16, %v2371_v54  ;;  %v2472_v20 = vsel %vm2471_vm0, %v4270_v17, %v4331_v31  ;;  %v2473_v52 = vsel %vm2471_vm0, %v4273_v45, %v2369_v30  ;;  %vm2501_vm13 = vcmask 80896   ;;  %s3331_s16 = smov [#allocation6]  }
0x1157   :  { %vm2496_vm14 = vcmask 72704   ;;  %vm2506_vm15 = vcmask 89088   ;;  %vm2535_vm2 = vcmask 130048   ;;  %s2696_s15 = sshll.u32 %s3331_s16, 4  ;;  %vm2582_vm3 = vcmask 1040384   ;;  %s2697_s15 = int_to_ptr.vmem [resolvable:$true] %s2696_s15 }
0x1158   :  { %vm2584_vm4 = vcmask 123904   ;;  %s3284_s5 = scalar_lea.vmem %s2697_s15, 32  ;;  %p3289_p9 = scmp.lt.s32.totalorder %s2697_s15, %s2697_s15 }
0x1159   :  { %v2373_v4 = vpop.permute.xlu1 %2372  ;;  %v2383_v12 = vpop.permute.xlu0 %2382  ;;  %p3285_p8 = scmp.ne.s32.totalorder %s2697_s15, %s3284_s5  ;;  %p3290_p10 = scmp.lt.s32.totalorder %s3284_s5, %s3284_s5 }
0x115a   :  { %v2477_v63 = vsel %vm2476_vm1, %v2472_v20, %v2383_v12  ;;  %v2475_v51 = vsel %vm2471_vm0, %v4281_v55, %v2373_v4 }
0x115b   :  { %v2482_v60 = vsel %vm2481_vm8, %v2477_v63, 1.0  ;;  %p3291_p11 = por %p3290_p10, %p3289_p9 }
0x115d   :  { %v2385_v36 = vpop.permute.xlu1 %2384  ;;  %v2387_v35 = vpop.permute.xlu0 %2386  ;;  %p3292_p12 = pnand %p3291_p11, %p3285_p8 }
0x115e   :  { %v2479_v6 = vsel %vm2476_vm1, %v2474_v62, %v2387_v35  ;;  %v2478_v9 = vsel %vm2476_vm1, %v2473_v52, %v2385_v36 }
0x115f   :  { %v2484_v53 = vsel %vm2481_vm8, %v2479_v6, 1.0  ;;  %v2483_v15 = vsel %vm2481_vm8, %v2478_v9, 1.0 }
0x1161   :  { %v2389_v39 = vpop.permute.xlu1 %2388  ;;  %v2399_v23 = vpop.permute.xlu0 %2398 }
0x1162   :  { %v2487_v45 = vsel %vm2486_vm12, %v2482_v60, %v2399_v23  ;;  %v2480_v56 = vsel %vm2476_vm1, %v2475_v51, %v2389_v39 }
0x1163   :  { %v2485_v46 = vsel %vm2481_vm8, %v2480_v56, 1.0 }
0x1165   :  { %v2401_v59 = vpop.permute.xlu1 %2400  ;;  %v2403_v13 = vpop.permute.xlu0 %2402 }
0x1166   :  { %v2489_v16 = vsel %vm2486_vm12, %v2484_v53, %v2403_v13  ;;  %v2488_v11 = vsel %vm2486_vm12, %v2483_v15, %v2401_v59 }
0x1169   :  { %v2405_v44 = vpop.permute.xlu1 %2404  ;;  %v2415_v41 = vpop.permute.xlu0 %2414 }
0x116a   :  { %v2492_v29 = vsel %vm2491_vm10, %v2487_v45, %v2415_v41  ;;  %v2490_v40 = vsel %vm2486_vm12, %v2485_v46, %v2405_v44 }
0x116d   :  { %v2417_v49 = vpop.permute.xlu1 %2416  ;;  %v2419_v61 = vpop.permute.xlu0 %2418 }
0x116e   :  { %v2494_v17 = vsel %vm2491_vm10, %v2489_v16, %v2419_v61  ;;  %v2493_v55 = vsel %vm2491_vm10, %v2488_v11, %v2417_v49 }
0x1171   :  { %v2421_v10 = vpop.permute.xlu1 %2420  ;;  %v2514_v26 = vpop.permute.xlu0 %2513 }
0x1172   :  { %v2495_v32 = vsel %vm2491_vm10, %v2490_v40, %v2421_v10 }
0x1176   :  { %v2551_v43 = vpop.permute.xlu0 %2550 }
0x1177   :  { %v2519_v5 = vpop.permute.xlu1 %2518 }
0x117a   :  { %v2559_v1 = vpop.permute.xlu0 %2558 }
0x117c   :  { %v2555_v2 = vpop.permute.xlu1 %2554 }
0x117e   :  { %v4354_v48 = vpop.permute.xlu0 %2562 }
0x1181   :  { %v2524_v47 = vpop.permute.xlu1 %2523 }
0x1182   :  { %v2431_v19 = vpop.permute.xlu0 %2430 }
0x1183   :  { %v2497_v21 = vsel %vm2496_vm14, %v2492_v29, %v2431_v19 }
0x1185   :  { %v4352_v25 = vpop.permute.xlu1 %2528 }
0x1189   :  { %v2435_v42 = vpop.permute.xlu1 %2434 }
0x118a   :  { %v2499_v27 = vsel %vm2496_vm14, %v2494_v17, %v2435_v42 }
0x118d   :  { %v2433_v57 = vpop.permute.xlu1 %2432 }
0x118e   :  { %v2498_v37 = vsel %vm2496_vm14, %v2493_v55, %v2433_v57 }
0x11b5   :  { %v2451_v8 = vpop.permute.xlu0 %2450 }
0x11b6   :  { %v2504_v18 = vsel %vm2501_vm13, %v2499_v27, %v2451_v8 }
0x11b7   :  { %v2509_v28 = vsel %vm2506_vm15, %v2504_v18, 0.0 }
0x11b8   :  { %v2533_v34 = vmul.f32 %v2524_v47, %v2509_v28  ;;  %v2567_v38 = vmul.f32 %v2559_v1, %v2509_v28 }
0x11b9   :  { %v2447_v33 = vpop.permute.xlu1 %2446 }
0x11ba   :  { %v2502_v0 = vsel %vm2501_vm13, %v2497_v21, %v2447_v33  ;;  %v2539_v41 = vsel %vm2535_vm2, %v2533_v34, 0.0  ;;  %v2572_v49 = vsel %vm2535_vm2, %v2567_v38, 0.0 }
0x11bb   :  { %v2507_v31 = vsel %vm2506_vm15, %v2502_v0, 0.0  ;;  %v2449_v22 = vpop.permute.xlu0 %2448 }
0x11bc   :  { %v2531_v24 = vmul.f32 %v2514_v26, %v2507_v31  ;;  %v2565_v3 = vmul.f32 %v2551_v43, %v2507_v31  ;;  %v2503_v50 = vsel %vm2501_vm13, %v2498_v37, %v2449_v22 }
0x11bd   :  { %v2508_v7 = vsel %vm2506_vm15, %v2503_v50, 0.0  ;;  %v2437_v14 = vpop.permute.xlu1 %2436 }
0x11be   :  { %v2532_v58 = vmul.f32 %v2519_v5, %v2508_v7  ;;  %v2566_v30 = vmul.f32 %v2555_v2, %v2508_v7  ;;  %v2536_v54 = vsel %vm2535_vm2, %v2531_v24, 0.0  ;;  %v2500_v4 = vsel %vm2496_vm14, %v2495_v32, %v2437_v14 }
0x11bf   :  { %v2453_v12 = vpop.permute.xlu0 %2452  ;;  %v2569_v36 = vsel %vm2535_vm2, %v2565_v3, 0.0 }
0x11c0   :  { %v2537_v35 = vsel %vm2535_vm2, %v2532_v58, 0.0  ;;  %v2570_v39 = vsel %vm2535_vm2, %v2566_v30, 0.0  ;;  %v2505_v23 = vsel %vm2501_vm13, %v2500_v4, %v2453_v12 }
0x11c1   :  { %v2538_v59 = vadd.f32 %v2537_v35, %v2536_v54  ;;  %v2571_v13 = vadd.f32 %v2570_v39, %v2569_v36  ;;  %v2510_v44 = vsel %vm2506_vm15, %v2505_v23, 0.0 }
0x11c2   :  { %v2534_v61 = vmul.f32 %v4352_v25, %v2510_v44  ;;  %v2568_v10 = vmul.f32 %v4354_v48, %v2510_v44 }
0x11c3   :  { %v2540_v26 = vadd.f32 %v2539_v41, %v2538_v59  ;;  %v2573_v5 = vadd.f32 %v2572_v49, %v2571_v13 }
0x11c4   :  { %v2541_v2 = vsel %vm2535_vm2, %v2534_v61, 0.0  ;;  %v2574_v43 = vsel %vm2535_vm2, %v2568_v10, 0.0 }
0x11c5   :  { %v2542_v47 = vadd.f32 %v2541_v2, %v2540_v26  ;;  %v2575_v1 = vadd.f32 %v2574_v43, %v2573_v5 }
0x11c7   :  { %v2543_v42 = vrot.slane %v2542_v47, 4  ;;  %v2576_v62 = vrot.slane %v2575_v1, 4 }
0x11c9   :  { %v2544_v6 = vadd.f32 %v2543_v42, %v2542_v47  ;;  %v2577_v19 = vadd.f32 %v2576_v62, %v2575_v1 }
0x11cb   :  { %v2545_v20 = vrot.slane %v2544_v6, 2  ;;  %v2578_v63 = vrot.slane %v2577_v19, 2 }
0x11cd   :  { %v2546_v52 = vadd.f32 %v2545_v20, %v2544_v6  ;;  %v2579_v53 = vadd.f32 %v2578_v63, %v2577_v19 }
0x11cf   :  { %v2547_v9 = vrot.slane %v2546_v52, 1  ;;  %v2580_v25 = vrot.slane %v2579_v53, 1 }
0x11d1   :  { %v2548_v48 = vadd.f32 %v2547_v9, %v2546_v52  ;;  %v2581_v16 = vadd.f32 %v2580_v25, %v2579_v53 }
0x11d3   :  { %v2583_v57 = vsel %vm2582_vm3, %v2548_v48, %v2581_v16 }
0x11d4   :  { %2585 = vst.msk [vmem:[#allocation6] sm:$0x3] %vm2584_vm4, %v2583_v57 }
0x11d5   :  { %3295 = shalt.err (!%p3292_p12)
}
0x11d6   :  { %s3296_s20 = scalar_lea.hbm %s4432_s17, 32 }
0x11d7   :  { %p3297_p13 = scmp.ne.s32.totalorder %s4432_s17, %s3296_s20  ;;  %p3300_p0 = scmp.lt.u32.totalorder %s3296_s20, %s4432_s17 }
0x11d9   :  { %p3302_p1 = pnand %p3300_p0, %p3297_p13 }
0x11db   :  { %3305 = shalt.err (!%p3302_p1)
}
0x11dc   :  { %2699 = dma.vmem_to_hbm [thread:$0]  %s2697_s15, 32, %s4432_s17, [#allocation7]  }
0x11dd   :  { %3306 = dma.done.wait [#allocation5], 128  }
0x11de   :  { %3307 = vsyncadd [#allocation5], 4294967168 }
0x11df   :  { %3308 = dma.done.wait [#allocation7], 32  }
0x11e0   :  { %3309 = vsyncadd [#allocation7], 4294967264 }
0x11e1   :  { %2706 = vsyncpa [#allocation5], 1 }
0x11e2   :  { %2707 = vsyncpa [#allocation7], 1 }

</bundles_post_ra>
